<compile_context>
chip_gen: v7x
topology: tpu7x:2x2x1
jax: 0.10.0
libtpu: 0.0.40
codegen_flags: <defaults>
</compile_context>

<pallas_src>
import functools
import math

import jax
import jax.numpy as jnp
from jax import lax
from jax.experimental import pallas as pl
from jax.experimental.pallas import tpu as pltpu


# ----------------------------------------------------------------------------
# Kernel A: fused (pre-scaled) Q|K|V projection, tiled over (batch, seq rows).
# ----------------------------------------------------------------------------
def _qkv_proj_kernel(x_ref, wqkv_ref, bqkv_ref, q_ref, kv_ref, *, d_model):
    x = x_ref[0].astype(jnp.bfloat16)                         # (TL, D)
    qkv = (jnp.dot(x, wqkv_ref[...], preferred_element_type=jnp.float32)
           + bqkv_ref[...]).astype(jnp.bfloat16)              # (TL, 3D)
    q_ref[0] = qkv[:, :d_model]        # Q (softmax scale pre-folded into W_q)
    kv_ref[0] = qkv[:, d_model:]       # [K | V]


# ----------------------------------------------------------------------------
# Kernel B: per-(batch, Q-tile) attention + out-proj + LN1 + FFN + LN2
#           (+ optional fused final encoder LayerNorm).
# ----------------------------------------------------------------------------
def _attn_ffn_kernel(q_ref, kv_ref, x_ref, wo_ref, bo_ref,
                     ln1_g_ref, ln1_b_ref,
                     w1_ref, b1_ref, w2_ref, b2_ref,
                     ln2_g_ref, ln2_b_ref,
                     fn_g_ref, fn_b_ref,
                     *out_and_scratch,
                     n_heads, eps, output_attention, apply_final_norm):
    if output_attention:
        o_ref, a_ref, ctx_ref = out_and_scratch
    else:
        o_ref, ctx_ref = out_and_scratch
        a_ref = None

    D = x_ref.shape[-1]
    H = n_heads
    Dh = D // H

    q = q_ref[0]        # (TQ, D)  bf16, scale already folded into the weights
    kv = kv_ref[0]      # (L, 2D)  bf16 — full sequence K|V for this batch
    x = x_ref[0]        # (TQ, D)  f32 residual input

    # ---- Multi-head scaled-dot-product attention (all KV resident) --------
    for h in range(H):                                        # static unroll
        qh = q[:, h * Dh:(h + 1) * Dh]                        # (TQ, Dh)
        kh = kv[:, h * Dh:(h + 1) * Dh]                       # (L, Dh)
        vh = kv[:, D + h * Dh:D + (h + 1) * Dh]               # (L, Dh)

        # q @ k^T (contract last dims), bf16 operands, f32 accumulation.
        s = lax.dot_general(qh, kh, (((1,), (1,)), ((), ())),
                            preferred_element_type=jnp.float32)   # (TQ, L)
        s = s - jnp.max(s, axis=-1, keepdims=True)
        e = jnp.exp(s)
        denom = jnp.sum(e, axis=-1, keepdims=True)
        inv = pl.reciprocal(denom, approx=True)               # EUP slot
        inv = inv * (2.0 - denom * inv)                       # Newton refine
        p = e * inv                                           # softmax probs
        if output_attention:
            a_ref[0, h] = p.astype(a_ref.dtype)               # bf16 writeback
        ctx_ref[:, h * Dh:(h + 1) * Dh] = jnp.dot(
            p.astype(jnp.bfloat16), vh,
            preferred_element_type=jnp.float32)               # (TQ, Dh)

    # ---- Output projection + residual + LayerNorm1 -------------------------
    new_x = (jnp.dot(ctx_ref[...].astype(jnp.bfloat16), wo_ref[...],
                     preferred_element_type=jnp.float32) + bo_ref[...])
    z = x + new_x
    mu = jnp.mean(z, axis=-1, keepdims=True)
    var = jnp.mean((z - mu) ** 2, axis=-1, keepdims=True)
    x1 = (z - mu) * lax.rsqrt(var + eps) * ln1_g_ref[...] + ln1_b_ref[...]

    # ---- FFN (Conv1d k=1 pair) + residual + LayerNorm2 ---------------------
    hdn = jnp.maximum(
        jnp.dot(x1.astype(jnp.bfloat16), w1_ref[...],
                preferred_element_type=jnp.float32) + b1_ref[...],
        0.0)
    y = (jnp.dot(hdn.astype(jnp.bfloat16), w2_ref[...],
                 preferred_element_type=jnp.float32) + b2_ref[...])
    z2 = x1 + y
    mu2 = jnp.mean(z2, axis=-1, keepdims=True)
    var2 = jnp.mean((z2 - mu2) ** 2, axis=-1, keepdims=True)
    out = (z2 - mu2) * lax.rsqrt(var2 + eps) * ln2_g_ref[...] + ln2_b_ref[...]

    # ---- Optional fused final Encoder LayerNorm (last layer only) ----------
    if apply_final_norm:
        mu3 = jnp.mean(out, axis=-1, keepdims=True)
        var3 = jnp.mean((out - mu3) ** 2, axis=-1, keepdims=True)
        out = (out - mu3) * lax.rsqrt(var3 + eps) * fn_g_ref[...] + fn_b_ref[...]

    o_ref[0] = out


# ----------------------------------------------------------------------------
# One EncoderLayer forward (two pallas_calls).
# ----------------------------------------------------------------------------
def encoder_layer(x, p, n_heads, *, tq=None, output_attention=False,
                  final_norm=None, eps=1e-5):
    B, L, D = x.shape
    H = n_heads
    Dff = p["w_ff1"].shape[1]
    if tq is None:
        tq = min(L, 256)
    assert L % tq == 0, "sequence length must be divisible by the Q-tile size"

    cparams = pltpu.CompilerParams(
        dimension_semantics=("parallel", "parallel"),
        vmem_limit_bytes=64 * 1024 * 1024,  # leave headroom under v7x 64 MiB
    )

    # ---- Kernel A: fused QKV projection ------------------------------------
    q, kv = pl.pallas_call(
        functools.partial(_qkv_proj_kernel, d_model=D),
        out_shape=(jax.ShapeDtypeStruct((B, L, D), jnp.bfloat16),
                   jax.ShapeDtypeStruct((B, L, 2 * D), jnp.bfloat16)),
        grid=(B, L // tq),
        in_specs=[
            pl.BlockSpec((1, tq, D), lambda b, i: (b, i, 0)),    # x tile
            pl.BlockSpec((D, 3 * D), lambda b, i: (0, 0)),       # wqkv (bf16)
            pl.BlockSpec((1, 3 * D), lambda b, i: (0, 0)),       # bqkv
        ],
        out_specs=(pl.BlockSpec((1, tq, D), lambda b, i: (b, i, 0)),
                   pl.BlockSpec((1, tq, 2 * D), lambda b, i: (b, i, 0))),
        compiler_params=cparams,
    )(x, p["wqkv"], p["bqkv"])

    # ---- Kernel B: attention + FFN + LayerNorms -----------------------------
    apply_final = final_norm is not None
    fn_g = final_norm["g"] if apply_final else jnp.ones((1, D), jnp.float32)
    fn_b = final_norm["b"] if apply_final else jnp.zeros((1, D), jnp.float32)

    kern = functools.partial(_attn_ffn_kernel, n_heads=H, eps=eps,
                             output_attention=output_attention,
                             apply_final_norm=apply_final)

    def const2d(shape):
        return pl.BlockSpec(shape, lambda b, i: (0, 0))

    in_specs = [
        pl.BlockSpec((1, tq, D), lambda b, i: (b, i, 0)),        # q tile
        pl.BlockSpec((1, L, 2 * D), lambda b, i: (b, 0, 0)),     # full-seq K|V
        pl.BlockSpec((1, tq, D), lambda b, i: (b, i, 0)),        # x (residual)
        const2d((D, D)), const2d((1, D)),                        # wo, bo
        const2d((1, D)), const2d((1, D)),                        # ln1 g/b
        const2d((D, Dff)), const2d((1, Dff)),                    # w_ff1, b_ff1
        const2d((Dff, D)), const2d((1, D)),                      # w_ff2, b_ff2
        const2d((1, D)), const2d((1, D)),                        # ln2 g/b
        const2d((1, D)), const2d((1, D)),                        # final norm g/b
    ]

    if output_attention:
        out_shape = (jax.ShapeDtypeStruct((B, L, D), jnp.float32),
                     jax.ShapeDtypeStruct((B, H, L, L), jnp.bfloat16))
        out_specs = (pl.BlockSpec((1, tq, D), lambda b, i: (b, i, 0)),
                     pl.BlockSpec((1, H, tq, L), lambda b, i: (b, 0, i, 0)))
    else:
        out_shape = jax.ShapeDtypeStruct((B, L, D), jnp.float32)
        out_specs = pl.BlockSpec((1, tq, D), lambda b, i: (b, i, 0))

    result = pl.pallas_call(
        kern,
        out_shape=out_shape,
        grid=(B, L // tq),
        in_specs=in_specs,
        out_specs=out_specs,
        scratch_shapes=[pltpu.VMEM((tq, D), jnp.float32)],       # ctx assembly
        compiler_params=cparams,
    )(q, kv, x, p["wo"], p["bo"], p["ln1_g"], p["ln1_b"],
      p["w_ff1"], p["b_ff1"], p["w_ff2"], p["b_ff2"],
      p["ln2_g"], p["ln2_b"], fn_g, fn_b)

    if output_attention:
        out, attn = result
    else:
        out, attn = result, None
    return out, attn


# ----------------------------------------------------------------------------
# Encoder forward (mirrors Encoder.forward with conv_layers=None, mask=None).
# The final LayerNorm is fused into the last layer's kernel.
# ----------------------------------------------------------------------------
def encoder_forward(x, layer_params, final_norm, *, n_heads, tq=None,
                    output_attention=True):
    attns = []
    n = len(layer_params)
    for idx, p in enumerate(layer_params):
        fn = final_norm if (idx == n - 1 and final_norm is not None) else None
        x, attn = encoder_layer(x, p, n_heads, tq=tq,
                                output_attention=output_attention,
                                final_norm=fn)
        attns.append(attn)
    return x, attns


# ----------------------------------------------------------------------------
# Deterministic parameter construction (fused Q|K|V layout, bf16 weights).
# ----------------------------------------------------------------------------
def make_layer_params(key, d_model, d_ff, n_heads):
    ks = jax.random.split(key, 6)

    def w(k, shape):
        return 0.02 * jax.random.normal(k, shape, dtype=jnp.float32)

    d_head = d_model // n_heads
    scale = 1.0 / math.sqrt(d_head)

    # PyTorch nn.Linear stores (out, in); here weights are (in, out) with
    # Q|K|V concatenated on the output axis so the projection is one MXU
    # matmul.  The 1/sqrt(Dh) softmax scale is folded into the Q columns (and
    # the Q bias) at construction time.
    wq = w(ks[0], (d_model, d_model)) * scale
    wk = w(ks[1], (d_model, d_model))
    wv = w(ks[2], (d_model, d_model))
    bq = jnp.zeros((d_model,), jnp.float32) * scale
    bk = jnp.zeros((d_model,), jnp.float32)
    bv = jnp.zeros((d_model,), jnp.float32)

    return {
        "wqkv": jnp.concatenate([wq, wk, wv], axis=1).astype(jnp.bfloat16),
        "bqkv": jnp.concatenate([bq, bk, bv])[None, :].astype(jnp.float32),
        "wo": w(ks[3], (d_model, d_model)).astype(jnp.bfloat16),
        "bo": jnp.zeros((1, d_model), jnp.float32),
        "ln1_g": jnp.ones((1, d_model), jnp.float32),
        "ln1_b": jnp.zeros((1, d_model), jnp.float32),
        "w_ff1": w(ks[4], (d_model, d_ff)).astype(jnp.bfloat16),
        "b_ff1": jnp.zeros((1, d_ff), jnp.float32),
        "w_ff2": w(ks[5], (d_ff, d_model)).astype(jnp.bfloat16),
        "b_ff2": jnp.zeros((1, d_model), jnp.float32),
        "ln2_g": jnp.ones((1, d_model), jnp.float32),
        "ln2_b": jnp.zeros((1, d_model), jnp.float32),
    }


if __name__ == "__main__":
    B, L, D, H, D_FF, N_LAYERS, TQ = 2, 16, 32, 4, 64, 2, 8

    root = jax.random.PRNGKey(0)
    k_x, *k_layers = jax.random.split(root, 1 + N_LAYERS)

    x = jax.random.normal(k_x, (B, L, D), dtype=jnp.float32)
    layer_params = [make_layer_params(k, D, D_FF, H) for k in k_layers]
    final_norm = {"g": jnp.ones((1, D), jnp.float32),
                  "b": jnp.zeros((1, D), jnp.float32)}

    # Path 1: output_attention=True (attention maps returned, stored bf16).
    fwd = jax.jit(functools.partial(
        encoder_forward, n_heads=H, tq=TQ, output_attention=True))
    out, attns = fwd(x, layer_params, final_norm)
    out = jax.block_until_ready(out)
    attns = [jax.block_until_ready(a) for a in attns]

    assert out.shape == (B, L, D)
    assert len(attns) == N_LAYERS and attns[0].shape == (B, H, L, L)
    assert bool(jnp.all(jnp.isfinite(out)))
    row_sums = jnp.sum(attns[0].astype(jnp.float32), axis=-1)
    assert bool(jnp.allclose(row_sums, 1.0, atol=2e-2))

    # Path 2: output_attention=False (no (B,H,L,L) HBM writeback at all).
    fwd_noattn = jax.jit(functools.partial(
        encoder_forward, n_heads=H, tq=TQ, output_attention=False))
    out2, attns2 = fwd_noattn(x, layer_params, final_norm)
    out2 = jax.block_until_ready(out2)
    assert all(a is None for a in attns2)
    assert bool(jnp.allclose(out, out2, atol=1e-3, rtol=1e-3))

    print("KERNEL_OK")
</pallas_src>

<mosaic_0001>
module attributes {stable_mosaic.version = 11 : i64} {
  func.func @_qkv_proj_kernel(%arg0: i32, %arg1: i32, %arg2: memref<1x8x32xf32, #tpu.memory_space<vmem>>, %arg3: memref<32x96xbf16, #tpu.memory_space<vmem>>, %arg4: memref<1x96xf32, #tpu.memory_space<vmem>>, %arg5: memref<1x8x32xbf16, #tpu.memory_space<vmem>>, %arg6: memref<1x8x64xbf16, #tpu.memory_space<vmem>>) attributes {dimension_semantics = [#tpu.dimension_semantics<parallel>, #tpu.dimension_semantics<parallel>], iteration_bounds = array<i64: 2, 2>, scalar_prefetch = 0 : i64, scratch_operands = 0 : i64, tpu.core_type = #tpu.core_type<tc>, window_params = [{transform_indices = @transform_0, window_bounds = array<i64: 1, 8, 32>}, {pipeline_mode = #tpu.pipeline_mode<synchronous>, transform_indices = @transform_1, window_bounds = array<i64: 32, 96>}, {pipeline_mode = #tpu.pipeline_mode<synchronous>, transform_indices = @transform_2, window_bounds = array<i64: 1, 96>}, {transform_indices = @transform_3, window_bounds = array<i64: 1, 8, 32>}, {transform_indices = @transform_4, window_bounds = array<i64: 1, 8, 64>}]} {
    %c0 = arith.constant 0 : index
    %c0_0 = arith.constant 0 : index
    %c0_1 = arith.constant 0 : index
    %0 = vector.load %arg2[%c0, %c0_0, %c0_1] : memref<1x8x32xf32, #tpu.memory_space<vmem>>, vector<1x8x32xf32>
    %1 = vector.shape_cast %0 : vector<1x8x32xf32> to vector<8x32xf32>
    %2 = arith.truncf %1 : vector<8x32xf32> to vector<8x32xbf16>
    %c0_2 = arith.constant 0 : index
    %c0_3 = arith.constant 0 : index
    %3 = vector.load %arg3[%c0_2, %c0_3] : memref<32x96xbf16, #tpu.memory_space<vmem>>, vector<32x96xbf16>
    %cst = arith.constant dense<0.000000e+00> : vector<8x96xf32>
    %4 = tpu.matmul %2, %3, %cst {dimension_numbers = #tpu.dot_dimension_numbers<[1], [0], [0], [1], [0, 0, 1, 1], [], []>} : vector<8x32xbf16>, vector<32x96xbf16>, vector<8x96xf32> -> vector<8x96xf32>
    %c0_4 = arith.constant 0 : index
    %c0_5 = arith.constant 0 : index
    %5 = vector.load %arg4[%c0_4, %c0_5] : memref<1x96xf32, #tpu.memory_space<vmem>>, vector<1x96xf32>
    %6 = vector.broadcast %5 : vector<1x96xf32> to vector<8x96xf32>
    %7 = arith.addf %4, %6 : vector<8x96xf32>
    %8 = arith.truncf %7 : vector<8x96xf32> to vector<8x96xbf16>
    %9 = vector.extract_strided_slice %8 {offsets = [0, 0], sizes = [8, 32], strides = [1, 1]} : vector<8x96xbf16> to vector<8x32xbf16>
    %c0_6 = arith.constant 0 : index
    %c0_7 = arith.constant 0 : index
    %c0_8 = arith.constant 0 : index
    %10 = vector.load %arg5[%c0_6, %c0_7, %c0_8] : memref<1x8x32xbf16, #tpu.memory_space<vmem>>, vector<1x8x32xbf16>
    %11 = vector.shape_cast %10 : vector<1x8x32xbf16> to vector<8x32xbf16>
    %12 = vector.shape_cast %9 : vector<8x32xbf16> to vector<1x8x32xbf16>
    tpu.vector_store %arg5[%c0_6, %c0_7, %c0_8], %12 {strides = array<i32>} : memref<1x8x32xbf16, #tpu.memory_space<vmem>>, vector<1x8x32xbf16>,
    %13 = vector.extract_strided_slice %8 {offsets = [0, 32], sizes = [8, 64], strides = [1, 1]} : vector<8x96xbf16> to vector<8x64xbf16>
    %c0_9 = arith.constant 0 : index
    %c0_10 = arith.constant 0 : index
    %c0_11 = arith.constant 0 : index
    %14 = vector.load %arg6[%c0_9, %c0_10, %c0_11] : memref<1x8x64xbf16, #tpu.memory_space<vmem>>, vector<1x8x64xbf16>
    %15 = vector.shape_cast %14 : vector<1x8x64xbf16> to vector<8x64xbf16>
    %16 = vector.shape_cast %13 : vector<8x64xbf16> to vector<1x8x64xbf16>
    tpu.vector_store %arg6[%c0_9, %c0_10, %c0_11], %16 {strides = array<i32>} : memref<1x8x64xbf16, #tpu.memory_space<vmem>>, vector<1x8x64xbf16>,
    return
  }
  func.func @transform_0(%arg0: i32, %arg1: i32) -> (i32, i32, i32) {
    %c0_i32 = arith.constant 0 : i32
    %c0_i32_0 = arith.constant 0 : i32
    return %arg0, %arg1, %c0_i32 : i32, i32, i32
  }
  func.func @transform_1(%arg0: i32, %arg1: i32) -> (i32, i32) {
    %c0_i32 = arith.constant 0 : i32
    %c0_i32_0 = arith.constant 0 : i32
    %c0_i32_1 = arith.constant 0 : i32
    return %c0_i32, %c0_i32_0 : i32, i32
  }
  func.func @transform_2(%arg0: i32, %arg1: i32) -> (i32, i32) {
    %c0_i32 = arith.constant 0 : i32
    %c0_i32_0 = arith.constant 0 : i32
    %c0_i32_1 = arith.constant 0 : i32
    return %c0_i32, %c0_i32_0 : i32, i32
  }
  func.func @transform_3(%arg0: i32, %arg1: i32) -> (i32, i32, i32) {
    %c0_i32 = arith.constant 0 : i32
    %c0_i32_0 = arith.constant 0 : i32
    return %arg0, %arg1, %c0_i32 : i32, i32, i32
  }
  func.func @transform_4(%arg0: i32, %arg1: i32) -> (i32, i32, i32) {
    %c0_i32 = arith.constant 0 : i32
    %c0_i32_0 = arith.constant 0 : i32
    return %arg0, %arg1, %c0_i32 : i32, i32, i32
  }
}

module attributes {stable_mosaic.version = 11 : i64} {
  func.func @_attn_ffn_kernel(%arg0: i32, %arg1: i32, %arg2: memref<1x8x32xbf16, #tpu.memory_space<vmem>>, %arg3: memref<1x16x64xbf16, #tpu.memory_space<vmem>>, %arg4: memref<1x8x32xf32, #tpu.memory_space<vmem>>, %arg5: memref<32x32xbf16, #tpu.memory_space<vmem>>, %arg6: memref<1x32xf32, #tpu.memory_space<vmem>>, %arg7: memref<1x32xf32, #tpu.memory_space<vmem>>, %arg8: memref<1x32xf32, #tpu.memory_space<vmem>>, %arg9: memref<32x64xbf16, #tpu.memory_space<vmem>>, %arg10: memref<1x64xf32, #tpu.memory_space<vmem>>, %arg11: memref<64x32xbf16, #tpu.memory_space<vmem>>, %arg12: memref<1x32xf32, #tpu.memory_space<vmem>>, %arg13: memref<1x32xf32, #tpu.memory_space<vmem>>, %arg14: memref<1x32xf32, #tpu.memory_space<vmem>>, %arg15: memref<1x32xf32, #tpu.memory_space<vmem>>, %arg16: memref<1x32xf32, #tpu.memory_space<vmem>>, %arg17: memref<1x8x32xf32, #tpu.memory_space<vmem>>, %arg18: memref<1x4x8x16xbf16, #tpu.memory_space<vmem>>, %arg19: memref<8x32xf32, #tpu.memory_space<vmem>>) attributes {dimension_semantics = [#tpu.dimension_semantics<parallel>, #tpu.dimension_semantics<parallel>], iteration_bounds = array<i64: 2, 2>, scalar_prefetch = 0 : i64, scratch_operands = 1 : i64, tpu.core_type = #tpu.core_type<tc>, window_params = [{transform_indices = @transform_0, window_bounds = array<i64: 1, 8, 32>}, {transform_indices = @transform_1, window_bounds = array<i64: 1, 16, 64>}, {transform_indices = @transform_2, window_bounds = array<i64: 1, 8, 32>}, {pipeline_mode = #tpu.pipeline_mode<synchronous>, transform_indices = @transform_3, window_bounds = array<i64: 32, 32>}, {pipeline_mode = #tpu.pipeline_mode<synchronous>, transform_indices = @transform_4, window_bounds = array<i64: 1, 32>}, {pipeline_mode = #tpu.pipeline_mode<synchronous>, transform_indices = @transform_5, window_bounds = array<i64: 1, 32>}, {pipeline_mode = #tpu.pipeline_mode<synchronous>, transform_indices = @transform_6, window_bounds = array<i64: 1, 32>}, {pipeline_mode = #tpu.pipeline_mode<synchronous>, transform_indices = @transform_7, window_bounds = array<i64: 32, 64>}, {pipeline_mode = #tpu.pipeline_mode<synchronous>, transform_indices = @transform_8, window_bounds = array<i64: 1, 64>}, {pipeline_mode = #tpu.pipeline_mode<synchronous>, transform_indices = @transform_9, window_bounds = array<i64: 64, 32>}, {pipeline_mode = #tpu.pipeline_mode<synchronous>, transform_indices = @transform_10, window_bounds = array<i64: 1, 32>}, {pipeline_mode = #tpu.pipeline_mode<synchronous>, transform_indices = @transform_11, window_bounds = array<i64: 1, 32>}, {pipeline_mode = #tpu.pipeline_mode<synchronous>, transform_indices = @transform_12, window_bounds = array<i64: 1, 32>}, {pipeline_mode = #tpu.pipeline_mode<synchronous>, transform_indices = @transform_13, window_bounds = array<i64: 1, 32>}, {pipeline_mode = #tpu.pipeline_mode<synchronous>, transform_indices = @transform_14, window_bounds = array<i64: 1, 32>}, {transform_indices = @transform_15, window_bounds = array<i64: 1, 8, 32>}, {transform_indices = @transform_16, window_bounds = array<i64: 1, 4, 8, 16>}]} {
    %c0 = arith.constant 0 : index
    %c0_0 = arith.constant 0 : index
    %c0_1 = arith.constant 0 : index
    %0 = vector.load %arg2[%c0, %c0_0, %c0_1] : memref<1x8x32xbf16, #tpu.memory_space<vmem>>, vector<1x8x32xbf16>
    %1 = vector.shape_cast %0 : vector<1x8x32xbf16> to vector<8x32xbf16>
    %c0_2 = arith.constant 0 : index
    %c0_3 = arith.constant 0 : index
    %c0_4 = arith.constant 0 : index
    %2 = vector.load %arg3[%c0_2, %c0_3, %c0_4] : memref<1x16x64xbf16, #tpu.memory_space<vmem>>, vector<1x16x64xbf16>
    %3 = vector.shape_cast %2 : vector<1x16x64xbf16> to vector<16x64xbf16>
    %c0_5 = arith.constant 0 : index
    %c0_6 = arith.constant 0 : index
    %c0_7 = arith.constant 0 : index
    %4 = vector.load %arg4[%c0_5, %c0_6, %c0_7] : memref<1x8x32xf32, #tpu.memory_space<vmem>>, vector<1x8x32xf32>
    %5 = vector.shape_cast %4 : vector<1x8x32xf32> to vector<8x32xf32>
    %6 = vector.extract_strided_slice %1 {offsets = [0, 0], sizes = [8, 8], strides = [1, 1]} : vector<8x32xbf16> to vector<8x8xbf16>
    %7 = vector.extract_strided_slice %3 {offsets = [0, 0], sizes = [16, 8], strides = [1, 1]} : vector<16x64xbf16> to vector<16x8xbf16>
    %8 = vector.extract_strided_slice %3 {offsets = [0, 32], sizes = [16, 8], strides = [1, 1]} : vector<16x64xbf16> to vector<16x8xbf16>
    %cst = arith.constant dense<0.000000e+00> : vector<8x16xf32>
    %9 = tpu.matmul %6, %7, %cst {dimension_numbers = #tpu.dot_dimension_numbers<[1], [1], [0], [0], [0, 0, 1, 0], [], []>} : vector<8x8xbf16>, vector<16x8xbf16>, vector<8x16xf32> -> vector<8x16xf32>
    %cst_8 = arith.constant dense<0xFF800000> : vector<8xf32>
    %10 = vector.multi_reduction <maximumf>, %9, %cst_8 [1] : vector<8x16xf32> to vector<8xf32>
    %11 = vector.shape_cast %10 : vector<8xf32> to vector<8x1xf32>
    %12 = vector.broadcast %11 : vector<8x1xf32> to vector<8x16xf32>
    %13 = arith.subf %9, %12 : vector<8x16xf32>
    %14 = math.exp %13 : vector<8x16xf32>
    %cst_9 = arith.constant dense<0.000000e+00> : vector<8xf32>
    %15 = vector.multi_reduction <add>, %14, %cst_9 [1] : vector<8x16xf32> to vector<8xf32>
    %16 = vector.shape_cast %15 : vector<8xf32> to vector<8x1xf32>
    %17 = tpu.reciprocal %16 {approx = true} : vector<8x1xf32> -> vector<8x1xf32>
    %18 = arith.mulf %16, %17 : vector<8x1xf32>
    %cst_10 = arith.constant 2.000000e+00 : f32
    %19 = vector.broadcast %cst_10 : f32 to vector<8x1xf32>
    %20 = arith.subf %19, %18 : vector<8x1xf32>
    %21 = arith.mulf %17, %20 : vector<8x1xf32>
    %22 = vector.broadcast %21 : vector<8x1xf32> to vector<8x16xf32>
    %23 = arith.mulf %14, %22 : vector<8x16xf32>
    %24 = arith.truncf %23 : vector<8x16xf32> to vector<8x16xbf16>
    %c0_11 = arith.constant 0 : index
    %c0_12 = arith.constant 0 : index
    %c0_13 = arith.constant 0 : index
    %c0_14 = arith.constant 0 : index
    %25 = vector.load %arg18[%c0_11, %c0_12, %c0_13, %c0_14] : memref<1x4x8x16xbf16, #tpu.memory_space<vmem>>, vector<1x1x8x16xbf16>
    %26 = vector.shape_cast %25 : vector<1x1x8x16xbf16> to vector<8x16xbf16>
    %27 = vector.shape_cast %24 : vector<8x16xbf16> to vector<1x1x8x16xbf16>
    tpu.vector_store %arg18[%c0_11, %c0_12, %c0_13, %c0_14], %27 {strides = array<i32>} : memref<1x4x8x16xbf16, #tpu.memory_space<vmem>>, vector<1x1x8x16xbf16>,
    %28 = arith.truncf %23 : vector<8x16xf32> to vector<8x16xbf16>
    %cst_15 = arith.constant dense<0.000000e+00> : vector<8x8xf32>
    %29 = tpu.matmul %28, %8, %cst_15 {dimension_numbers = #tpu.dot_dimension_numbers<[1], [0], [0], [1], [0, 0, 1, 1], [], []>} : vector<8x16xbf16>, vector<16x8xbf16>, vector<8x8xf32> -> vector<8x8xf32>
    %c0_16 = arith.constant 0 : index
    %c0_17 = arith.constant 0 : index
    %30 = vector.load %arg19[%c0_16, %c0_17] : memref<8x32xf32, #tpu.memory_space<vmem>>, vector<8x8xf32>
    tpu.vector_store %arg19[%c0_16, %c0_17], %29 {strides = array<i32>} : memref<8x32xf32, #tpu.memory_space<vmem>>, vector<8x8xf32>,
    %31 = vector.extract_strided_slice %1 {offsets = [0, 8], sizes = [8, 8], strides = [1, 1]} : vector<8x32xbf16> to vector<8x8xbf16>
    %32 = vector.extract_strided_slice %3 {offsets = [0, 8], sizes = [16, 8], strides = [1, 1]} : vector<16x64xbf16> to vector<16x8xbf16>
    %33 = vector.extract_strided_slice %3 {offsets = [0, 40], sizes = [16, 8], strides = [1, 1]} : vector<16x64xbf16> to vector<16x8xbf16>
    %cst_18 = arith.constant dense<0.000000e+00> : vector<8x16xf32>
    %34 = tpu.matmul %31, %32, %cst_18 {dimension_numbers = #tpu.dot_dimension_numbers<[1], [1], [0], [0], [0, 0, 1, 0], [], []>} : vector<8x8xbf16>, vector<16x8xbf16>, vector<8x16xf32> -> vector<8x16xf32>
    %cst_19 = arith.constant dense<0xFF800000> : vector<8xf32>
    %35 = vector.multi_reduction <maximumf>, %34, %cst_19 [1] : vector<8x16xf32> to vector<8xf32>
    %36 = vector.shape_cast %35 : vector<8xf32> to vector<8x1xf32>
    %37 = vector.broadcast %36 : vector<8x1xf32> to vector<8x16xf32>
    %38 = arith.subf %34, %37 : vector<8x16xf32>
    %39 = math.exp %38 : vector<8x16xf32>
    %cst_20 = arith.constant dense<0.000000e+00> : vector<8xf32>
    %40 = vector.multi_reduction <add>, %39, %cst_20 [1] : vector<8x16xf32> to vector<8xf32>
    %41 = vector.shape_cast %40 : vector<8xf32> to vector<8x1xf32>
    %42 = tpu.reciprocal %41 {approx = true} : vector<8x1xf32> -> vector<8x1xf32>
    %43 = arith.mulf %41, %42 : vector<8x1xf32>
    %cst_21 = arith.constant 2.000000e+00 : f32
    %44 = vector.broadcast %cst_21 : f32 to vector<8x1xf32>
    %45 = arith.subf %44, %43 : vector<8x1xf32>
    %46 = arith.mulf %42, %45 : vector<8x1xf32>
    %47 = vector.broadcast %46 : vector<8x1xf32> to vector<8x16xf32>
    %48 = arith.mulf %39, %47 : vector<8x16xf32>
    %49 = arith.truncf %48 : vector<8x16xf32> to vector<8x16xbf16>
    %c0_22 = arith.constant 0 : index
    %c1 = arith.constant 1 : index
    %c0_23 = arith.constant 0 : index
    %c0_24 = arith.constant 0 : index
    %50 = vector.load %arg18[%c0_22, %c1, %c0_23, %c0_24] : memref<1x4x8x16xbf16, #tpu.memory_space<vmem>>, vector<1x1x8x16xbf16>
    %51 = vector.shape_cast %50 : vector<1x1x8x16xbf16> to vector<8x16xbf16>
    %52 = vector.shape_cast %49 : vector<8x16xbf16> to vector<1x1x8x16xbf16>
    tpu.vector_store %arg18[%c0_22, %c1, %c0_23, %c0_24], %52 {strides = array<i32>} : memref<1x4x8x16xbf16, #tpu.memory_space<vmem>>, vector<1x1x8x16xbf16>,
    %53 = arith.truncf %48 : vector<8x16xf32> to vector<8x16xbf16>
    %cst_25 = arith.constant dense<0.000000e+00> : vector<8x8xf32>
    %54 = tpu.matmul %53, %33, %cst_25 {dimension_numbers = #tpu.dot_dimension_numbers<[1], [0], [0], [1], [0, 0, 1, 1], [], []>} : vector<8x16xbf16>, vector<16x8xbf16>, vector<8x8xf32> -> vector<8x8xf32>
    %c0_26 = arith.constant 0 : index
    %c8 = arith.constant 8 : index
    %55 = vector.load %arg19[%c0_26, %c8] : memref<8x32xf32, #tpu.memory_space<vmem>>, vector<8x8xf32>
    tpu.vector_store %arg19[%c0_26, %c8], %54 {strides = array<i32>} : memref<8x32xf32, #tpu.memory_space<vmem>>, vector<8x8xf32>,
    %56 = vector.extract_strided_slice %1 {offsets = [0, 16], sizes = [8, 8], strides = [1, 1]} : vector<8x32xbf16> to vector<8x8xbf16>
    %57 = vector.extract_strided_slice %3 {offsets = [0, 16], sizes = [16, 8], strides = [1, 1]} : vector<16x64xbf16> to vector<16x8xbf16>
    %58 = vector.extract_strided_slice %3 {offsets = [0, 48], sizes = [16, 8], strides = [1, 1]} : vector<16x64xbf16> to vector<16x8xbf16>
    %cst_27 = arith.constant dense<0.000000e+00> : vector<8x16xf32>
    %59 = tpu.matmul %56, %57, %cst_27 {dimension_numbers = #tpu.dot_dimension_numbers<[1], [1], [0], [0], [0, 0, 1, 0], [], []>} : vector<8x8xbf16>, vector<16x8xbf16>, vector<8x16xf32> -> vector<8x16xf32>
    %cst_28 = arith.constant dense<0xFF800000> : vector<8xf32>
    %60 = vector.multi_reduction <maximumf>, %59, %cst_28 [1] : vector<8x16xf32> to vector<8xf32>
    %61 = vector.shape_cast %60 : vector<8xf32> to vector<8x1xf32>
    %62 = vector.broadcast %61 : vector<8x1xf32> to vector<8x16xf32>
    %63 = arith.subf %59, %62 : vector<8x16xf32>
    %64 = math.exp %63 : vector<8x16xf32>
    %cst_29 = arith.constant dense<0.000000e+00> : vector<8xf32>
    %65 = vector.multi_reduction <add>, %64, %cst_29 [1] : vector<8x16xf32> to vector<8xf32>
    %66 = vector.shape_cast %65 : vector<8xf32> to vector<8x1xf32>
    %67 = tpu.reciprocal %66 {approx = true} : vector<8x1xf32> -> vector<8x1xf32>
    %68 = arith.mulf %66, %67 : vector<8x1xf32>
    %cst_30 = arith.constant 2.000000e+00 : f32
    %69 = vector.broadcast %cst_30 : f32 to vector<8x1xf32>
    %70 = arith.subf %69, %68 : vector<8x1xf32>
    %71 = arith.mulf %67, %70 : vector<8x1xf32>
    %72 = vector.broadcast %71 : vector<8x1xf32> to vector<8x16xf32>
    %73 = arith.mulf %64, %72 : vector<8x16xf32>
    %74 = arith.truncf %73 : vector<8x16xf32> to vector<8x16xbf16>
    %c0_31 = arith.constant 0 : index
    %c2 = arith.constant 2 : index
    %c0_32 = arith.constant 0 : index
    %c0_33 = arith.constant 0 : index
    %75 = vector.load %arg18[%c0_31, %c2, %c0_32, %c0_33] : memref<1x4x8x16xbf16, #tpu.memory_space<vmem>>, vector<1x1x8x16xbf16>
    %76 = vector.shape_cast %75 : vector<1x1x8x16xbf16> to vector<8x16xbf16>
    %77 = vector.shape_cast %74 : vector<8x16xbf16> to vector<1x1x8x16xbf16>
    tpu.vector_store %arg18[%c0_31, %c2, %c0_32, %c0_33], %77 {strides = array<i32>} : memref<1x4x8x16xbf16, #tpu.memory_space<vmem>>, vector<1x1x8x16xbf16>,
    %78 = arith.truncf %73 : vector<8x16xf32> to vector<8x16xbf16>
    %cst_34 = arith.constant dense<0.000000e+00> : vector<8x8xf32>
    %79 = tpu.matmul %78, %58, %cst_34 {dimension_numbers = #tpu.dot_dimension_numbers<[1], [0], [0], [1], [0, 0, 1, 1], [], []>} : vector<8x16xbf16>, vector<16x8xbf16>, vector<8x8xf32> -> vector<8x8xf32>
    %c0_35 = arith.constant 0 : index
    %c16 = arith.constant 16 : index
    %80 = vector.load %arg19[%c0_35, %c16] : memref<8x32xf32, #tpu.memory_space<vmem>>, vector<8x8xf32>
    tpu.vector_store %arg19[%c0_35, %c16], %79 {strides = array<i32>} : memref<8x32xf32, #tpu.memory_space<vmem>>, vector<8x8xf32>,
    %81 = vector.extract_strided_slice %1 {offsets = [0, 24], sizes = [8, 8], strides = [1, 1]} : vector<8x32xbf16> to vector<8x8xbf16>
    %82 = vector.extract_strided_slice %3 {offsets = [0, 24], sizes = [16, 8], strides = [1, 1]} : vector<16x64xbf16> to vector<16x8xbf16>
    %83 = vector.extract_strided_slice %3 {offsets = [0, 56], sizes = [16, 8], strides = [1, 1]} : vector<16x64xbf16> to vector<16x8xbf16>
    %cst_36 = arith.constant dense<0.000000e+00> : vector<8x16xf32>
    %84 = tpu.matmul %81, %82, %cst_36 {dimension_numbers = #tpu.dot_dimension_numbers<[1], [1], [0], [0], [0, 0, 1, 0], [], []>} : vector<8x8xbf16>, vector<16x8xbf16>, vector<8x16xf32> -> vector<8x16xf32>
    %cst_37 = arith.constant dense<0xFF800000> : vector<8xf32>
    %85 = vector.multi_reduction <maximumf>, %84, %cst_37 [1] : vector<8x16xf32> to vector<8xf32>
    %86 = vector.shape_cast %85 : vector<8xf32> to vector<8x1xf32>
    %87 = vector.broadcast %86 : vector<8x1xf32> to vector<8x16xf32>
    %88 = arith.subf %84, %87 : vector<8x16xf32>
    %89 = math.exp %88 : vector<8x16xf32>
    %cst_38 = arith.constant dense<0.000000e+00> : vector<8xf32>
    %90 = vector.multi_reduction <add>, %89, %cst_38 [1] : vector<8x16xf32> to vector<8xf32>
    %91 = vector.shape_cast %90 : vector<8xf32> to vector<8x1xf32>
    %92 = tpu.reciprocal %91 {approx = true} : vector<8x1xf32> -> vector<8x1xf32>
    %93 = arith.mulf %91, %92 : vector<8x1xf32>
    %cst_39 = arith.constant 2.000000e+00 : f32
    %94 = vector.broadcast %cst_39 : f32 to vector<8x1xf32>
    %95 = arith.subf %94, %93 : vector<8x1xf32>
    %96 = arith.mulf %92, %95 : vector<8x1xf32>
    %97 = vector.broadcast %96 : vector<8x1xf32> to vector<8x16xf32>
    %98 = arith.mulf %89, %97 : vector<8x16xf32>
    %99 = arith.truncf %98 : vector<8x16xf32> to vector<8x16xbf16>
    %c0_40 = arith.constant 0 : index
    %c3 = arith.constant 3 : index
    %c0_41 = arith.constant 0 : index
    %c0_42 = arith.constant 0 : index
    %100 = vector.load %arg18[%c0_40, %c3, %c0_41, %c0_42] : memref<1x4x8x16xbf16, #tpu.memory_space<vmem>>, vector<1x1x8x16xbf16>
    %101 = vector.shape_cast %100 : vector<1x1x8x16xbf16> to vector<8x16xbf16>
    %102 = vector.shape_cast %99 : vector<8x16xbf16> to vector<1x1x8x16xbf16>
    tpu.vector_store %arg18[%c0_40, %c3, %c0_41, %c0_42], %102 {strides = array<i32>} : memref<1x4x8x16xbf16, #tpu.memory_space<vmem>>, vector<1x1x8x16xbf16>,
    %103 = arith.truncf %98 : vector<8x16xf32> to vector<8x16xbf16>
    %cst_43 = arith.constant dense<0.000000e+00> : vector<8x8xf32>
    %104 = tpu.matmul %103, %83, %cst_43 {dimension_numbers = #tpu.dot_dimension_numbers<[1], [0], [0], [1], [0, 0, 1, 1], [], []>} : vector<8x16xbf16>, vector<16x8xbf16>, vector<8x8xf32> -> vector<8x8xf32>
    %c0_44 = arith.constant 0 : index
    %c24 = arith.constant 24 : index
    %105 = vector.load %arg19[%c0_44, %c24] : memref<8x32xf32, #tpu.memory_space<vmem>>, vector<8x8xf32>
    tpu.vector_store %arg19[%c0_44, %c24], %104 {strides = array<i32>} : memref<8x32xf32, #tpu.memory_space<vmem>>, vector<8x8xf32>,
    %c0_45 = arith.constant 0 : index
    %c0_46 = arith.constant 0 : index
    %106 = vector.load %arg19[%c0_45, %c0_46] : memref<8x32xf32, #tpu.memory_space<vmem>>, vector<8x32xf32>
    %107 = arith.truncf %106 : vector<8x32xf32> to vector<8x32xbf16>
    %c0_47 = arith.constant 0 : index
    %c0_48 = arith.constant 0 : index
    %108 = vector.load %arg5[%c0_47, %c0_48] : memref<32x32xbf16, #tpu.memory_space<vmem>>, vector<32x32xbf16>
    %cst_49 = arith.constant dense<0.000000e+00> : vector<8x32xf32>
    %109 = tpu.matmul %107, %108, %cst_49 {dimension_numbers = #tpu.dot_dimension_numbers<[1], [0], [0], [1], [0, 0, 1, 1], [], []>} : vector<8x32xbf16>, vector<32x32xbf16>, vector<8x32xf32> -> vector<8x32xf32>
    %c0_50 = arith.constant 0 : index
    %c0_51 = arith.constant 0 : index
    %110 = vector.load %arg6[%c0_50, %c0_51] : memref<1x32xf32, #tpu.memory_space<vmem>>, vector<1x32xf32>
    %111 = vector.broadcast %110 : vector<1x32xf32> to vector<8x32xf32>
    %112 = arith.addf %109, %111 : vector<8x32xf32>
    %113 = arith.addf %5, %112 : vector<8x32xf32>
    %cst_52 = arith.constant dense<0.000000e+00> : vector<8xf32>
    %114 = vector.multi_reduction <add>, %113, %cst_52 [1] : vector<8x32xf32> to vector<8xf32>
    %115 = vector.shape_cast %114 : vector<8xf32> to vector<8x1xf32>
    %cst_53 = arith.constant 3.200000e+01 : f32
    %116 = vector.broadcast %cst_53 : f32 to vector<8x1xf32>
    %117 = arith.divf %115, %116 : vector<8x1xf32>
    %118 = vector.broadcast %117 : vector<8x1xf32> to vector<8x32xf32>
    %119 = arith.subf %113, %118 : vector<8x32xf32>
    %120 = arith.mulf %119, %119 : vector<8x32xf32>
    %cst_54 = arith.constant dense<0.000000e+00> : vector<8xf32>
    %121 = vector.multi_reduction <add>, %120, %cst_54 [1] : vector<8x32xf32> to vector<8xf32>
    %122 = vector.shape_cast %121 : vector<8xf32> to vector<8x1xf32>
    %cst_55 = arith.constant 3.200000e+01 : f32
    %123 = vector.broadcast %cst_55 : f32 to vector<8x1xf32>
    %124 = arith.divf %122, %123 : vector<8x1xf32>
    %125 = vector.broadcast %117 : vector<8x1xf32> to vector<8x32xf32>
    %126 = arith.subf %113, %125 : vector<8x32xf32>
    %cst_56 = arith.constant 9.99999974E-6 : f32
    %127 = vector.broadcast %cst_56 : f32 to vector<8x1xf32>
    %128 = arith.addf %124, %127 : vector<8x1xf32>
    %129 = math.rsqrt %128 : vector<8x1xf32>
    %130 = vector.broadcast %129 : vector<8x1xf32> to vector<8x32xf32>
    %131 = arith.mulf %126, %130 : vector<8x32xf32>
    %c0_57 = arith.constant 0 : index
    %c0_58 = arith.constant 0 : index
    %132 = vector.load %arg7[%c0_57, %c0_58] : memref<1x32xf32, #tpu.memory_space<vmem>>, vector<1x32xf32>
    %133 = vector.broadcast %132 : vector<1x32xf32> to vector<8x32xf32>
    %134 = arith.mulf %131, %133 : vector<8x32xf32>
    %c0_59 = arith.constant 0 : index
    %c0_60 = arith.constant 0 : index
    %135 = vector.load %arg8[%c0_59, %c0_60] : memref<1x32xf32, #tpu.memory_space<vmem>>, vector<1x32xf32>
    %136 = vector.broadcast %135 : vector<1x32xf32> to vector<8x32xf32>
    %137 = arith.addf %134, %136 : vector<8x32xf32>
    %138 = arith.truncf %137 : vector<8x32xf32> to vector<8x32xbf16>
    %c0_61 = arith.constant 0 : index
    %c0_62 = arith.constant 0 : index
    %139 = vector.load %arg9[%c0_61, %c0_62] : memref<32x64xbf16, #tpu.memory_space<vmem>>, vector<32x64xbf16>
    %cst_63 = arith.constant dense<0.000000e+00> : vector<8x64xf32>
    %140 = tpu.matmul %138, %139, %cst_63 {dimension_numbers = #tpu.dot_dimension_numbers<[1], [0], [0], [1], [0, 0, 1, 1], [], []>} : vector<8x32xbf16>, vector<32x64xbf16>, vector<8x64xf32> -> vector<8x64xf32>
    %c0_64 = arith.constant 0 : index
    %c0_65 = arith.constant 0 : index
    %141 = vector.load %arg10[%c0_64, %c0_65] : memref<1x64xf32, #tpu.memory_space<vmem>>, vector<1x64xf32>
    %142 = vector.broadcast %141 : vector<1x64xf32> to vector<8x64xf32>
    %143 = arith.addf %140, %142 : vector<8x64xf32>
    %cst_66 = arith.constant 0.000000e+00 : f32
    %144 = vector.broadcast %cst_66 : f32 to vector<8x64xf32>
    %145 = arith.maximumf %143, %144 : vector<8x64xf32>
    %146 = arith.truncf %145 : vector<8x64xf32> to vector<8x64xbf16>
    %c0_67 = arith.constant 0 : index
    %c0_68 = arith.constant 0 : index
    %147 = vector.load %arg11[%c0_67, %c0_68] : memref<64x32xbf16, #tpu.memory_space<vmem>>, vector<64x32xbf16>
    %cst_69 = arith.constant dense<0.000000e+00> : vector<8x32xf32>
    %148 = tpu.matmul %146, %147, %cst_69 {dimension_numbers = #tpu.dot_dimension_numbers<[1], [0], [0], [1], [0, 0, 1, 1], [], []>} : vector<8x64xbf16>, vector<64x32xbf16>, vector<8x32xf32> -> vector<8x32xf32>
    %c0_70 = arith.constant 0 : index
    %c0_71 = arith.constant 0 : index
    %149 = vector.load %arg12[%c0_70, %c0_71] : memref<1x32xf32, #tpu.memory_space<vmem>>, vector<1x32xf32>
    %150 = vector.broadcast %149 : vector<1x32xf32> to vector<8x32xf32>
    %151 = arith.addf %148, %150 : vector<8x32xf32>
    %152 = arith.addf %137, %151 : vector<8x32xf32>
    %cst_72 = arith.constant dense<0.000000e+00> : vector<8xf32>
    %153 = vector.multi_reduction <add>, %152, %cst_72 [1] : vector<8x32xf32> to vector<8xf32>
    %154 = vector.shape_cast %153 : vector<8xf32> to vector<8x1xf32>
    %cst_73 = arith.constant 3.200000e+01 : f32
    %155 = vector.broadcast %cst_73 : f32 to vector<8x1xf32>
    %156 = arith.divf %154, %155 : vector<8x1xf32>
    %157 = vector.broadcast %156 : vector<8x1xf32> to vector<8x32xf32>
    %158 = arith.subf %152, %157 : vector<8x32xf32>
    %159 = arith.mulf %158, %158 : vector<8x32xf32>
    %cst_74 = arith.constant dense<0.000000e+00> : vector<8xf32>
    %160 = vector.multi_reduction <add>, %159, %cst_74 [1] : vector<8x32xf32> to vector<8xf32>
    %161 = vector.shape_cast %160 : vector<8xf32> to vector<8x1xf32>
    %cst_75 = arith.constant 3.200000e+01 : f32
    %162 = vector.broadcast %cst_75 : f32 to vector<8x1xf32>
    %163 = arith.divf %161, %162 : vector<8x1xf32>
    %164 = vector.broadcast %156 : vector<8x1xf32> to vector<8x32xf32>
    %165 = arith.subf %152, %164 : vector<8x32xf32>
    %cst_76 = arith.constant 9.99999974E-6 : f32
    %166 = vector.broadcast %cst_76 : f32 to vector<8x1xf32>
    %167 = arith.addf %163, %166 : vector<8x1xf32>
    %168 = math.rsqrt %167 : vector<8x1xf32>
    %169 = vector.broadcast %168 : vector<8x1xf32> to vector<8x32xf32>
    %170 = arith.mulf %165, %169 : vector<8x32xf32>
    %c0_77 = arith.constant 0 : index
    %c0_78 = arith.constant 0 : index
    %171 = vector.load %arg13[%c0_77, %c0_78] : memref<1x32xf32, #tpu.memory_space<vmem>>, vector<1x32xf32>
    %172 = vector.broadcast %171 : vector<1x32xf32> to vector<8x32xf32>
    %173 = arith.mulf %170, %172 : vector<8x32xf32>
    %c0_79 = arith.constant 0 : index
    %c0_80 = arith.constant 0 : index
    %174 = vector.load %arg14[%c0_79, %c0_80] : memref<1x32xf32, #tpu.memory_space<vmem>>, vector<1x32xf32>
    %175 = vector.broadcast %174 : vector<1x32xf32> to vector<8x32xf32>
    %176 = arith.addf %173, %175 : vector<8x32xf32>
    %c0_81 = arith.constant 0 : index
    %c0_82 = arith.constant 0 : index
    %c0_83 = arith.constant 0 : index
    %177 = vector.load %arg17[%c0_81, %c0_82, %c0_83] : memref<1x8x32xf32, #tpu.memory_space<vmem>>, vector<1x8x32xf32>
    %178 = vector.shape_cast %177 : vector<1x8x32xf32> to vector<8x32xf32>
    %179 = vector.shape_cast %176 : vector<8x32xf32> to vector<1x8x32xf32>
    tpu.vector_store %arg17[%c0_81, %c0_82, %c0_83], %179 {strides = array<i32>} : memref<1x8x32xf32, #tpu.memory_space<vmem>>, vector<1x8x32xf32>,
    return
  }
  func.func @transform_0(%arg0: i32, %arg1: i32) -> (i32, i32, i32) {
    %c0_i32 = arith.constant 0 : i32
    %c0_i32_0 = arith.constant 0 : i32
    return %arg0, %arg1, %c0_i32 : i32, i32, i32
  }
  func.func @transform_1(%arg0: i32, %arg1: i32) -> (i32, i32, i32) {
    %c0_i32 = arith.constant 0 : i32
    %c0_i32_0 = arith.constant 0 : i32
    %c0_i32_1 = arith.constant 0 : i32
    return %arg0, %c0_i32, %c0_i32_0 : i32, i32, i32
  }
  func.func @transform_2(%arg0: i32, %arg1: i32) -> (i32, i32, i32) {
    %c0_i32 = arith.constant 0 : i32
    %c0_i32_0 = arith.constant 0 : i32
    return %arg0, %arg1, %c0_i32 : i32, i32, i32
  }
  func.func @transform_3(%arg0: i32, %arg1: i32) -> (i32, i32) {
    %c0_i32 = arith.constant 0 : i32
    %c0_i32_0 = arith.constant 0 : i32
    %c0_i32_1 = arith.constant 0 : i32
    return %c0_i32, %c0_i32_0 : i32, i32
  }
  func.func @transform_4(%arg0: i32, %arg1: i32) -> (i32, i32) {
    %c0_i32 = arith.constant 0 : i32
    %c0_i32_0 = arith.constant 0 : i32
    %c0_i32_1 = arith.constant 0 : i32
    return %c0_i32, %c0_i32_0 : i32, i32
  }
  func.func @transform_5(%arg0: i32, %arg1: i32) -> (i32, i32) {
    %c0_i32 = arith.constant 0 : i32
    %c0_i32_0 = arith.constant 0 : i32
    %c0_i32_1 = arith.constant 0 : i32
    return %c0_i32, %c0_i32_0 : i32, i32
  }
  func.func @transform_6(%arg0: i32, %arg1: i32) -> (i32, i32) {
    %c0_i32 = arith.constant 0 : i32
    %c0_i32_0 = arith.constant 0 : i32
    %c0_i32_1 = arith.constant 0 : i32
    return %c0_i32, %c0_i32_0 : i32, i32
  }
  func.func @transform_7(%arg0: i32, %arg1: i32) -> (i32, i32) {
    %c0_i32 = arith.constant 0 : i32
    %c0_i32_0 = arith.constant 0 : i32
    %c0_i32_1 = arith.constant 0 : i32
    return %c0_i32, %c0_i32_0 : i32, i32
  }
  func.func @transform_8(%arg0: i32, %arg1: i32) -> (i32, i32) {
    %c0_i32 = arith.constant 0 : i32
    %c0_i32_0 = arith.constant 0 : i32
    %c0_i32_1 = arith.constant 0 : i32
    return %c0_i32, %c0_i32_0 : i32, i32
  }
  func.func @transform_9(%arg0: i32, %arg1: i32) -> (i32, i32) {
    %c0_i32 = arith.constant 0 : i32
    %c0_i32_0 = arith.constant 0 : i32
    %c0_i32_1 = arith.constant 0 : i32
    return %c0_i32, %c0_i32_0 : i32, i32
  }
  func.func @transform_10(%arg0: i32, %arg1: i32) -> (i32, i32) {
    %c0_i32 = arith.constant 0 : i32
    %c0_i32_0 = arith.constant 0 : i32
    %c0_i32_1 = arith.constant 0 : i32
    return %c0_i32, %c0_i32_0 : i32, i32
  }
  func.func @transform_11(%arg0: i32, %arg1: i32) -> (i32, i32) {
    %c0_i32 = arith.constant 0 : i32
    %c0_i32_0 = arith.constant 0 : i32
    %c0_i32_1 = arith.constant 0 : i32
    return %c0_i32, %c0_i32_0 : i32, i32
  }
  func.func @transform_12(%arg0: i32, %arg1: i32) -> (i32, i32) {
    %c0_i32 = arith.constant 0 : i32
    %c0_i32_0 = arith.constant 0 : i32
    %c0_i32_1 = arith.constant 0 : i32
    return %c0_i32, %c0_i32_0 : i32, i32
  }
  func.func @transform_13(%arg0: i32, %arg1: i32) -> (i32, i32) {
    %c0_i32 = arith.constant 0 : i32
    %c0_i32_0 = arith.constant 0 : i32
    %c0_i32_1 = arith.constant 0 : i32
    return %c0_i32, %c0_i32_0 : i32, i32
  }
  func.func @transform_14(%arg0: i32, %arg1: i32) -> (i32, i32) {
    %c0_i32 = arith.constant 0 : i32
    %c0_i32_0 = arith.constant 0 : i32
    %c0_i32_1 = arith.constant 0 : i32
    return %c0_i32, %c0_i32_0 : i32, i32
  }
  func.func @transform_15(%arg0: i32, %arg1: i32) -> (i32, i32, i32) {
    %c0_i32 = arith.constant 0 : i32
    %c0_i32_0 = arith.constant 0 : i32
    return %arg0, %arg1, %c0_i32 : i32, i32, i32
  }
  func.func @transform_16(%arg0: i32, %arg1: i32) -> (i32, i32, i32, i32) {
    %c0_i32 = arith.constant 0 : i32
    %c0_i32_0 = arith.constant 0 : i32
    %c0_i32_1 = arith.constant 0 : i32
    return %arg0, %c0_i32, %arg1, %c0_i32_0 : i32, i32, i32, i32
  }
}

module attributes {stable_mosaic.version = 11 : i64} {
  func.func @_attn_ffn_kernel(%arg0: i32, %arg1: i32, %arg2: memref<1x8x32xbf16, #tpu.memory_space<vmem>>, %arg3: memref<1x16x64xbf16, #tpu.memory_space<vmem>>, %arg4: memref<1x8x32xf32, #tpu.memory_space<vmem>>, %arg5: memref<32x32xbf16, #tpu.memory_space<vmem>>, %arg6: memref<1x32xf32, #tpu.memory_space<vmem>>, %arg7: memref<1x32xf32, #tpu.memory_space<vmem>>, %arg8: memref<1x32xf32, #tpu.memory_space<vmem>>, %arg9: memref<32x64xbf16, #tpu.memory_space<vmem>>, %arg10: memref<1x64xf32, #tpu.memory_space<vmem>>, %arg11: memref<64x32xbf16, #tpu.memory_space<vmem>>, %arg12: memref<1x32xf32, #tpu.memory_space<vmem>>, %arg13: memref<1x32xf32, #tpu.memory_space<vmem>>, %arg14: memref<1x32xf32, #tpu.memory_space<vmem>>, %arg15: memref<1x32xf32, #tpu.memory_space<vmem>>, %arg16: memref<1x32xf32, #tpu.memory_space<vmem>>, %arg17: memref<1x8x32xf32, #tpu.memory_space<vmem>>, %arg18: memref<1x4x8x16xbf16, #tpu.memory_space<vmem>>, %arg19: memref<8x32xf32, #tpu.memory_space<vmem>>) attributes {dimension_semantics = [#tpu.dimension_semantics<parallel>, #tpu.dimension_semantics<parallel>], iteration_bounds = array<i64: 2, 2>, scalar_prefetch = 0 : i64, scratch_operands = 1 : i64, tpu.core_type = #tpu.core_type<tc>, window_params = [{transform_indices = @transform_0, window_bounds = array<i64: 1, 8, 32>}, {transform_indices = @transform_1, window_bounds = array<i64: 1, 16, 64>}, {transform_indices = @transform_2, window_bounds = array<i64: 1, 8, 32>}, {pipeline_mode = #tpu.pipeline_mode<synchronous>, transform_indices = @transform_3, window_bounds = array<i64: 32, 32>}, {pipeline_mode = #tpu.pipeline_mode<synchronous>, transform_indices = @transform_4, window_bounds = array<i64: 1, 32>}, {pipeline_mode = #tpu.pipeline_mode<synchronous>, transform_indices = @transform_5, window_bounds = array<i64: 1, 32>}, {pipeline_mode = #tpu.pipeline_mode<synchronous>, transform_indices = @transform_6, window_bounds = array<i64: 1, 32>}, {pipeline_mode = #tpu.pipeline_mode<synchronous>, transform_indices = @transform_7, window_bounds = array<i64: 32, 64>}, {pipeline_mode = #tpu.pipeline_mode<synchronous>, transform_indices = @transform_8, window_bounds = array<i64: 1, 64>}, {pipeline_mode = #tpu.pipeline_mode<synchronous>, transform_indices = @transform_9, window_bounds = array<i64: 64, 32>}, {pipeline_mode = #tpu.pipeline_mode<synchronous>, transform_indices = @transform_10, window_bounds = array<i64: 1, 32>}, {pipeline_mode = #tpu.pipeline_mode<synchronous>, transform_indices = @transform_11, window_bounds = array<i64: 1, 32>}, {pipeline_mode = #tpu.pipeline_mode<synchronous>, transform_indices = @transform_12, window_bounds = array<i64: 1, 32>}, {pipeline_mode = #tpu.pipeline_mode<synchronous>, transform_indices = @transform_13, window_bounds = array<i64: 1, 32>}, {pipeline_mode = #tpu.pipeline_mode<synchronous>, transform_indices = @transform_14, window_bounds = array<i64: 1, 32>}, {transform_indices = @transform_15, window_bounds = array<i64: 1, 8, 32>}, {transform_indices = @transform_16, window_bounds = array<i64: 1, 4, 8, 16>}]} {
    %c0 = arith.constant 0 : index
    %c0_0 = arith.constant 0 : index
    %c0_1 = arith.constant 0 : index
    %0 = vector.load %arg2[%c0, %c0_0, %c0_1] : memref<1x8x32xbf16, #tpu.memory_space<vmem>>, vector<1x8x32xbf16>
    %1 = vector.shape_cast %0 : vector<1x8x32xbf16> to vector<8x32xbf16>
    %c0_2 = arith.constant 0 : index
    %c0_3 = arith.constant 0 : index
    %c0_4 = arith.constant 0 : index
    %2 = vector.load %arg3[%c0_2, %c0_3, %c0_4] : memref<1x16x64xbf16, #tpu.memory_space<vmem>>, vector<1x16x64xbf16>
    %3 = vector.shape_cast %2 : vector<1x16x64xbf16> to vector<16x64xbf16>
    %c0_5 = arith.constant 0 : index
    %c0_6 = arith.constant 0 : index
    %c0_7 = arith.constant 0 : index
    %4 = vector.load %arg4[%c0_5, %c0_6, %c0_7] : memref<1x8x32xf32, #tpu.memory_space<vmem>>, vector<1x8x32xf32>
    %5 = vector.shape_cast %4 : vector<1x8x32xf32> to vector<8x32xf32>
    %6 = vector.extract_strided_slice %1 {offsets = [0, 0], sizes = [8, 8], strides = [1, 1]} : vector<8x32xbf16> to vector<8x8xbf16>
    %7 = vector.extract_strided_slice %3 {offsets = [0, 0], sizes = [16, 8], strides = [1, 1]} : vector<16x64xbf16> to vector<16x8xbf16>
    %8 = vector.extract_strided_slice %3 {offsets = [0, 32], sizes = [16, 8], strides = [1, 1]} : vector<16x64xbf16> to vector<16x8xbf16>
    %cst = arith.constant dense<0.000000e+00> : vector<8x16xf32>
    %9 = tpu.matmul %6, %7, %cst {dimension_numbers = #tpu.dot_dimension_numbers<[1], [1], [0], [0], [0, 0, 1, 0], [], []>} : vector<8x8xbf16>, vector<16x8xbf16>, vector<8x16xf32> -> vector<8x16xf32>
    %cst_8 = arith.constant dense<0xFF800000> : vector<8xf32>
    %10 = vector.multi_reduction <maximumf>, %9, %cst_8 [1] : vector<8x16xf32> to vector<8xf32>
    %11 = vector.shape_cast %10 : vector<8xf32> to vector<8x1xf32>
    %12 = vector.broadcast %11 : vector<8x1xf32> to vector<8x16xf32>
    %13 = arith.subf %9, %12 : vector<8x16xf32>
    %14 = math.exp %13 : vector<8x16xf32>
    %cst_9 = arith.constant dense<0.000000e+00> : vector<8xf32>
    %15 = vector.multi_reduction <add>, %14, %cst_9 [1] : vector<8x16xf32> to vector<8xf32>
    %16 = vector.shape_cast %15 : vector<8xf32> to vector<8x1xf32>
    %17 = tpu.reciprocal %16 {approx = true} : vector<8x1xf32> -> vector<8x1xf32>
    %18 = arith.mulf %16, %17 : vector<8x1xf32>
    %cst_10 = arith.constant 2.000000e+00 : f32
    %19 = vector.broadcast %cst_10 : f32 to vector<8x1xf32>
    %20 = arith.subf %19, %18 : vector<8x1xf32>
    %21 = arith.mulf %17, %20 : vector<8x1xf32>
    %22 = vector.broadcast %21 : vector<8x1xf32> to vector<8x16xf32>
    %23 = arith.mulf %14, %22 : vector<8x16xf32>
    %24 = arith.truncf %23 : vector<8x16xf32> to vector<8x16xbf16>
    %c0_11 = arith.constant 0 : index
    %c0_12 = arith.constant 0 : index
    %c0_13 = arith.constant 0 : index
    %c0_14 = arith.constant 0 : index
    %25 = vector.load %arg18[%c0_11, %c0_12, %c0_13, %c0_14] : memref<1x4x8x16xbf16, #tpu.memory_space<vmem>>, vector<1x1x8x16xbf16>
    %26 = vector.shape_cast %25 : vector<1x1x8x16xbf16> to vector<8x16xbf16>
    %27 = vector.shape_cast %24 : vector<8x16xbf16> to vector<1x1x8x16xbf16>
    tpu.vector_store %arg18[%c0_11, %c0_12, %c0_13, %c0_14], %27 {strides = array<i32>} : memref<1x4x8x16xbf16, #tpu.memory_space<vmem>>, vector<1x1x8x16xbf16>,
    %28 = arith.truncf %23 : vector<8x16xf32> to vector<8x16xbf16>
    %cst_15 = arith.constant dense<0.000000e+00> : vector<8x8xf32>
    %29 = tpu.matmul %28, %8, %cst_15 {dimension_numbers = #tpu.dot_dimension_numbers<[1], [0], [0], [1], [0, 0, 1, 1], [], []>} : vector<8x16xbf16>, vector<16x8xbf16>, vector<8x8xf32> -> vector<8x8xf32>
    %c0_16 = arith.constant 0 : index
    %c0_17 = arith.constant 0 : index
    %30 = vector.load %arg19[%c0_16, %c0_17] : memref<8x32xf32, #tpu.memory_space<vmem>>, vector<8x8xf32>
    tpu.vector_store %arg19[%c0_16, %c0_17], %29 {strides = array<i32>} : memref<8x32xf32, #tpu.memory_space<vmem>>, vector<8x8xf32>,
    %31 = vector.extract_strided_slice %1 {offsets = [0, 8], sizes = [8, 8], strides = [1, 1]} : vector<8x32xbf16> to vector<8x8xbf16>
    %32 = vector.extract_strided_slice %3 {offsets = [0, 8], sizes = [16, 8], strides = [1, 1]} : vector<16x64xbf16> to vector<16x8xbf16>
    %33 = vector.extract_strided_slice %3 {offsets = [0, 40], sizes = [16, 8], strides = [1, 1]} : vector<16x64xbf16> to vector<16x8xbf16>
    %cst_18 = arith.constant dense<0.000000e+00> : vector<8x16xf32>
    %34 = tpu.matmul %31, %32, %cst_18 {dimension_numbers = #tpu.dot_dimension_numbers<[1], [1], [0], [0], [0, 0, 1, 0], [], []>} : vector<8x8xbf16>, vector<16x8xbf16>, vector<8x16xf32> -> vector<8x16xf32>
    %cst_19 = arith.constant dense<0xFF800000> : vector<8xf32>
    %35 = vector.multi_reduction <maximumf>, %34, %cst_19 [1] : vector<8x16xf32> to vector<8xf32>
    %36 = vector.shape_cast %35 : vector<8xf32> to vector<8x1xf32>
    %37 = vector.broadcast %36 : vector<8x1xf32> to vector<8x16xf32>
    %38 = arith.subf %34, %37 : vector<8x16xf32>
    %39 = math.exp %38 : vector<8x16xf32>
    %cst_20 = arith.constant dense<0.000000e+00> : vector<8xf32>
    %40 = vector.multi_reduction <add>, %39, %cst_20 [1] : vector<8x16xf32> to vector<8xf32>
    %41 = vector.shape_cast %40 : vector<8xf32> to vector<8x1xf32>
    %42 = tpu.reciprocal %41 {approx = true} : vector<8x1xf32> -> vector<8x1xf32>
    %43 = arith.mulf %41, %42 : vector<8x1xf32>
    %cst_21 = arith.constant 2.000000e+00 : f32
    %44 = vector.broadcast %cst_21 : f32 to vector<8x1xf32>
    %45 = arith.subf %44, %43 : vector<8x1xf32>
    %46 = arith.mulf %42, %45 : vector<8x1xf32>
    %47 = vector.broadcast %46 : vector<8x1xf32> to vector<8x16xf32>
    %48 = arith.mulf %39, %47 : vector<8x16xf32>
    %49 = arith.truncf %48 : vector<8x16xf32> to vector<8x16xbf16>
    %c0_22 = arith.constant 0 : index
    %c1 = arith.constant 1 : index
    %c0_23 = arith.constant 0 : index
    %c0_24 = arith.constant 0 : index
    %50 = vector.load %arg18[%c0_22, %c1, %c0_23, %c0_24] : memref<1x4x8x16xbf16, #tpu.memory_space<vmem>>, vector<1x1x8x16xbf16>
    %51 = vector.shape_cast %50 : vector<1x1x8x16xbf16> to vector<8x16xbf16>
    %52 = vector.shape_cast %49 : vector<8x16xbf16> to vector<1x1x8x16xbf16>
    tpu.vector_store %arg18[%c0_22, %c1, %c0_23, %c0_24], %52 {strides = array<i32>} : memref<1x4x8x16xbf16, #tpu.memory_space<vmem>>, vector<1x1x8x16xbf16>,
    %53 = arith.truncf %48 : vector<8x16xf32> to vector<8x16xbf16>
    %cst_25 = arith.constant dense<0.000000e+00> : vector<8x8xf32>
    %54 = tpu.matmul %53, %33, %cst_25 {dimension_numbers = #tpu.dot_dimension_numbers<[1], [0], [0], [1], [0, 0, 1, 1], [], []>} : vector<8x16xbf16>, vector<16x8xbf16>, vector<8x8xf32> -> vector<8x8xf32>
    %c0_26 = arith.constant 0 : index
    %c8 = arith.constant 8 : index
    %55 = vector.load %arg19[%c0_26, %c8] : memref<8x32xf32, #tpu.memory_space<vmem>>, vector<8x8xf32>
    tpu.vector_store %arg19[%c0_26, %c8], %54 {strides = array<i32>} : memref<8x32xf32, #tpu.memory_space<vmem>>, vector<8x8xf32>,
    %56 = vector.extract_strided_slice %1 {offsets = [0, 16], sizes = [8, 8], strides = [1, 1]} : vector<8x32xbf16> to vector<8x8xbf16>
    %57 = vector.extract_strided_slice %3 {offsets = [0, 16], sizes = [16, 8], strides = [1, 1]} : vector<16x64xbf16> to vector<16x8xbf16>
    %58 = vector.extract_strided_slice %3 {offsets = [0, 48], sizes = [16, 8], strides = [1, 1]} : vector<16x64xbf16> to vector<16x8xbf16>
    %cst_27 = arith.constant dense<0.000000e+00> : vector<8x16xf32>
    %59 = tpu.matmul %56, %57, %cst_27 {dimension_numbers = #tpu.dot_dimension_numbers<[1], [1], [0], [0], [0, 0, 1, 0], [], []>} : vector<8x8xbf16>, vector<16x8xbf16>, vector<8x16xf32> -> vector<8x16xf32>
    %cst_28 = arith.constant dense<0xFF800000> : vector<8xf32>
    %60 = vector.multi_reduction <maximumf>, %59, %cst_28 [1] : vector<8x16xf32> to vector<8xf32>
    %61 = vector.shape_cast %60 : vector<8xf32> to vector<8x1xf32>
    %62 = vector.broadcast %61 : vector<8x1xf32> to vector<8x16xf32>
    %63 = arith.subf %59, %62 : vector<8x16xf32>
    %64 = math.exp %63 : vector<8x16xf32>
    %cst_29 = arith.constant dense<0.000000e+00> : vector<8xf32>
    %65 = vector.multi_reduction <add>, %64, %cst_29 [1] : vector<8x16xf32> to vector<8xf32>
    %66 = vector.shape_cast %65 : vector<8xf32> to vector<8x1xf32>
    %67 = tpu.reciprocal %66 {approx = true} : vector<8x1xf32> -> vector<8x1xf32>
    %68 = arith.mulf %66, %67 : vector<8x1xf32>
    %cst_30 = arith.constant 2.000000e+00 : f32
    %69 = vector.broadcast %cst_30 : f32 to vector<8x1xf32>
    %70 = arith.subf %69, %68 : vector<8x1xf32>
    %71 = arith.mulf %67, %70 : vector<8x1xf32>
    %72 = vector.broadcast %71 : vector<8x1xf32> to vector<8x16xf32>
    %73 = arith.mulf %64, %72 : vector<8x16xf32>
    %74 = arith.truncf %73 : vector<8x16xf32> to vector<8x16xbf16>
    %c0_31 = arith.constant 0 : index
    %c2 = arith.constant 2 : index
    %c0_32 = arith.constant 0 : index
    %c0_33 = arith.constant 0 : index
    %75 = vector.load %arg18[%c0_31, %c2, %c0_32, %c0_33] : memref<1x4x8x16xbf16, #tpu.memory_space<vmem>>, vector<1x1x8x16xbf16>
    %76 = vector.shape_cast %75 : vector<1x1x8x16xbf16> to vector<8x16xbf16>
    %77 = vector.shape_cast %74 : vector<8x16xbf16> to vector<1x1x8x16xbf16>
    tpu.vector_store %arg18[%c0_31, %c2, %c0_32, %c0_33], %77 {strides = array<i32>} : memref<1x4x8x16xbf16, #tpu.memory_space<vmem>>, vector<1x1x8x16xbf16>,
    %78 = arith.truncf %73 : vector<8x16xf32> to vector<8x16xbf16>
    %cst_34 = arith.constant dense<0.000000e+00> : vector<8x8xf32>
    %79 = tpu.matmul %78, %58, %cst_34 {dimension_numbers = #tpu.dot_dimension_numbers<[1], [0], [0], [1], [0, 0, 1, 1], [], []>} : vector<8x16xbf16>, vector<16x8xbf16>, vector<8x8xf32> -> vector<8x8xf32>
    %c0_35 = arith.constant 0 : index
    %c16 = arith.constant 16 : index
    %80 = vector.load %arg19[%c0_35, %c16] : memref<8x32xf32, #tpu.memory_space<vmem>>, vector<8x8xf32>
    tpu.vector_store %arg19[%c0_35, %c16], %79 {strides = array<i32>} : memref<8x32xf32, #tpu.memory_space<vmem>>, vector<8x8xf32>,
    %81 = vector.extract_strided_slice %1 {offsets = [0, 24], sizes = [8, 8], strides = [1, 1]} : vector<8x32xbf16> to vector<8x8xbf16>
    %82 = vector.extract_strided_slice %3 {offsets = [0, 24], sizes = [16, 8], strides = [1, 1]} : vector<16x64xbf16> to vector<16x8xbf16>
    %83 = vector.extract_strided_slice %3 {offsets = [0, 56], sizes = [16, 8], strides = [1, 1]} : vector<16x64xbf16> to vector<16x8xbf16>
    %cst_36 = arith.constant dense<0.000000e+00> : vector<8x16xf32>
    %84 = tpu.matmul %81, %82, %cst_36 {dimension_numbers = #tpu.dot_dimension_numbers<[1], [1], [0], [0], [0, 0, 1, 0], [], []>} : vector<8x8xbf16>, vector<16x8xbf16>, vector<8x16xf32> -> vector<8x16xf32>
    %cst_37 = arith.constant dense<0xFF800000> : vector<8xf32>
    %85 = vector.multi_reduction <maximumf>, %84, %cst_37 [1] : vector<8x16xf32> to vector<8xf32>
    %86 = vector.shape_cast %85 : vector<8xf32> to vector<8x1xf32>
    %87 = vector.broadcast %86 : vector<8x1xf32> to vector<8x16xf32>
    %88 = arith.subf %84, %87 : vector<8x16xf32>
    %89 = math.exp %88 : vector<8x16xf32>
    %cst_38 = arith.constant dense<0.000000e+00> : vector<8xf32>
    %90 = vector.multi_reduction <add>, %89, %cst_38 [1] : vector<8x16xf32> to vector<8xf32>
    %91 = vector.shape_cast %90 : vector<8xf32> to vector<8x1xf32>
    %92 = tpu.reciprocal %91 {approx = true} : vector<8x1xf32> -> vector<8x1xf32>
    %93 = arith.mulf %91, %92 : vector<8x1xf32>
    %cst_39 = arith.constant 2.000000e+00 : f32
    %94 = vector.broadcast %cst_39 : f32 to vector<8x1xf32>
    %95 = arith.subf %94, %93 : vector<8x1xf32>
    %96 = arith.mulf %92, %95 : vector<8x1xf32>
    %97 = vector.broadcast %96 : vector<8x1xf32> to vector<8x16xf32>
    %98 = arith.mulf %89, %97 : vector<8x16xf32>
    %99 = arith.truncf %98 : vector<8x16xf32> to vector<8x16xbf16>
    %c0_40 = arith.constant 0 : index
    %c3 = arith.constant 3 : index
    %c0_41 = arith.constant 0 : index
    %c0_42 = arith.constant 0 : index
    %100 = vector.load %arg18[%c0_40, %c3, %c0_41, %c0_42] : memref<1x4x8x16xbf16, #tpu.memory_space<vmem>>, vector<1x1x8x16xbf16>
    %101 = vector.shape_cast %100 : vector<1x1x8x16xbf16> to vector<8x16xbf16>
    %102 = vector.shape_cast %99 : vector<8x16xbf16> to vector<1x1x8x16xbf16>
    tpu.vector_store %arg18[%c0_40, %c3, %c0_41, %c0_42], %102 {strides = array<i32>} : memref<1x4x8x16xbf16, #tpu.memory_space<vmem>>, vector<1x1x8x16xbf16>,
    %103 = arith.truncf %98 : vector<8x16xf32> to vector<8x16xbf16>
    %cst_43 = arith.constant dense<0.000000e+00> : vector<8x8xf32>
    %104 = tpu.matmul %103, %83, %cst_43 {dimension_numbers = #tpu.dot_dimension_numbers<[1], [0], [0], [1], [0, 0, 1, 1], [], []>} : vector<8x16xbf16>, vector<16x8xbf16>, vector<8x8xf32> -> vector<8x8xf32>
    %c0_44 = arith.constant 0 : index
    %c24 = arith.constant 24 : index
    %105 = vector.load %arg19[%c0_44, %c24] : memref<8x32xf32, #tpu.memory_space<vmem>>, vector<8x8xf32>
    tpu.vector_store %arg19[%c0_44, %c24], %104 {strides = array<i32>} : memref<8x32xf32, #tpu.memory_space<vmem>>, vector<8x8xf32>,
    %c0_45 = arith.constant 0 : index
    %c0_46 = arith.constant 0 : index
    %106 = vector.load %arg19[%c0_45, %c0_46] : memref<8x32xf32, #tpu.memory_space<vmem>>, vector<8x32xf32>
    %107 = arith.truncf %106 : vector<8x32xf32> to vector<8x32xbf16>
    %c0_47 = arith.constant 0 : index
    %c0_48 = arith.constant 0 : index
    %108 = vector.load %arg5[%c0_47, %c0_48] : memref<32x32xbf16, #tpu.memory_space<vmem>>, vector<32x32xbf16>
    %cst_49 = arith.constant dense<0.000000e+00> : vector<8x32xf32>
    %109 = tpu.matmul %107, %108, %cst_49 {dimension_numbers = #tpu.dot_dimension_numbers<[1], [0], [0], [1], [0, 0, 1, 1], [], []>} : vector<8x32xbf16>, vector<32x32xbf16>, vector<8x32xf32> -> vector<8x32xf32>
    %c0_50 = arith.constant 0 : index
    %c0_51 = arith.constant 0 : index
    %110 = vector.load %arg6[%c0_50, %c0_51] : memref<1x32xf32, #tpu.memory_space<vmem>>, vector<1x32xf32>
    %111 = vector.broadcast %110 : vector<1x32xf32> to vector<8x32xf32>
    %112 = arith.addf %109, %111 : vector<8x32xf32>
    %113 = arith.addf %5, %112 : vector<8x32xf32>
    %cst_52 = arith.constant dense<0.000000e+00> : vector<8xf32>
    %114 = vector.multi_reduction <add>, %113, %cst_52 [1] : vector<8x32xf32> to vector<8xf32>
    %115 = vector.shape_cast %114 : vector<8xf32> to vector<8x1xf32>
    %cst_53 = arith.constant 3.200000e+01 : f32
    %116 = vector.broadcast %cst_53 : f32 to vector<8x1xf32>
    %117 = arith.divf %115, %116 : vector<8x1xf32>
    %118 = vector.broadcast %117 : vector<8x1xf32> to vector<8x32xf32>
    %119 = arith.subf %113, %118 : vector<8x32xf32>
    %120 = arith.mulf %119, %119 : vector<8x32xf32>
    %cst_54 = arith.constant dense<0.000000e+00> : vector<8xf32>
    %121 = vector.multi_reduction <add>, %120, %cst_54 [1] : vector<8x32xf32> to vector<8xf32>
    %122 = vector.shape_cast %121 : vector<8xf32> to vector<8x1xf32>
    %cst_55 = arith.constant 3.200000e+01 : f32
    %123 = vector.broadcast %cst_55 : f32 to vector<8x1xf32>
    %124 = arith.divf %122, %123 : vector<8x1xf32>
    %125 = vector.broadcast %117 : vector<8x1xf32> to vector<8x32xf32>
    %126 = arith.subf %113, %125 : vector<8x32xf32>
    %cst_56 = arith.constant 9.99999974E-6 : f32
    %127 = vector.broadcast %cst_56 : f32 to vector<8x1xf32>
    %128 = arith.addf %124, %127 : vector<8x1xf32>
    %129 = math.rsqrt %128 : vector<8x1xf32>
    %130 = vector.broadcast %129 : vector<8x1xf32> to vector<8x32xf32>
    %131 = arith.mulf %126, %130 : vector<8x32xf32>
    %c0_57 = arith.constant 0 : index
    %c0_58 = arith.constant 0 : index
    %132 = vector.load %arg7[%c0_57, %c0_58] : memref<1x32xf32, #tpu.memory_space<vmem>>, vector<1x32xf32>
    %133 = vector.broadcast %132 : vector<1x32xf32> to vector<8x32xf32>
    %134 = arith.mulf %131, %133 : vector<8x32xf32>
    %c0_59 = arith.constant 0 : index
    %c0_60 = arith.constant 0 : index
    %135 = vector.load %arg8[%c0_59, %c0_60] : memref<1x32xf32, #tpu.memory_space<vmem>>, vector<1x32xf32>
    %136 = vector.broadcast %135 : vector<1x32xf32> to vector<8x32xf32>
    %137 = arith.addf %134, %136 : vector<8x32xf32>
    %138 = arith.truncf %137 : vector<8x32xf32> to vector<8x32xbf16>
    %c0_61 = arith.constant 0 : index
    %c0_62 = arith.constant 0 : index
    %139 = vector.load %arg9[%c0_61, %c0_62] : memref<32x64xbf16, #tpu.memory_space<vmem>>, vector<32x64xbf16>
    %cst_63 = arith.constant dense<0.000000e+00> : vector<8x64xf32>
    %140 = tpu.matmul %138, %139, %cst_63 {dimension_numbers = #tpu.dot_dimension_numbers<[1], [0], [0], [1], [0, 0, 1, 1], [], []>} : vector<8x32xbf16>, vector<32x64xbf16>, vector<8x64xf32> -> vector<8x64xf32>
    %c0_64 = arith.constant 0 : index
    %c0_65 = arith.constant 0 : index
    %141 = vector.load %arg10[%c0_64, %c0_65] : memref<1x64xf32, #tpu.memory_space<vmem>>, vector<1x64xf32>
    %142 = vector.broadcast %141 : vector<1x64xf32> to vector<8x64xf32>
    %143 = arith.addf %140, %142 : vector<8x64xf32>
    %cst_66 = arith.constant 0.000000e+00 : f32
    %144 = vector.broadcast %cst_66 : f32 to vector<8x64xf32>
    %145 = arith.maximumf %143, %144 : vector<8x64xf32>
    %146 = arith.truncf %145 : vector<8x64xf32> to vector<8x64xbf16>
    %c0_67 = arith.constant 0 : index
    %c0_68 = arith.constant 0 : index
    %147 = vector.load %arg11[%c0_67, %c0_68] : memref<64x32xbf16, #tpu.memory_space<vmem>>, vector<64x32xbf16>
    %cst_69 = arith.constant dense<0.000000e+00> : vector<8x32xf32>
    %148 = tpu.matmul %146, %147, %cst_69 {dimension_numbers = #tpu.dot_dimension_numbers<[1], [0], [0], [1], [0, 0, 1, 1], [], []>} : vector<8x64xbf16>, vector<64x32xbf16>, vector<8x32xf32> -> vector<8x32xf32>
    %c0_70 = arith.constant 0 : index
    %c0_71 = arith.constant 0 : index
    %149 = vector.load %arg12[%c0_70, %c0_71] : memref<1x32xf32, #tpu.memory_space<vmem>>, vector<1x32xf32>
    %150 = vector.broadcast %149 : vector<1x32xf32> to vector<8x32xf32>
    %151 = arith.addf %148, %150 : vector<8x32xf32>
    %152 = arith.addf %137, %151 : vector<8x32xf32>
    %cst_72 = arith.constant dense<0.000000e+00> : vector<8xf32>
    %153 = vector.multi_reduction <add>, %152, %cst_72 [1] : vector<8x32xf32> to vector<8xf32>
    %154 = vector.shape_cast %153 : vector<8xf32> to vector<8x1xf32>
    %cst_73 = arith.constant 3.200000e+01 : f32
    %155 = vector.broadcast %cst_73 : f32 to vector<8x1xf32>
    %156 = arith.divf %154, %155 : vector<8x1xf32>
    %157 = vector.broadcast %156 : vector<8x1xf32> to vector<8x32xf32>
    %158 = arith.subf %152, %157 : vector<8x32xf32>
    %159 = arith.mulf %158, %158 : vector<8x32xf32>
    %cst_74 = arith.constant dense<0.000000e+00> : vector<8xf32>
    %160 = vector.multi_reduction <add>, %159, %cst_74 [1] : vector<8x32xf32> to vector<8xf32>
    %161 = vector.shape_cast %160 : vector<8xf32> to vector<8x1xf32>
    %cst_75 = arith.constant 3.200000e+01 : f32
    %162 = vector.broadcast %cst_75 : f32 to vector<8x1xf32>
    %163 = arith.divf %161, %162 : vector<8x1xf32>
    %164 = vector.broadcast %156 : vector<8x1xf32> to vector<8x32xf32>
    %165 = arith.subf %152, %164 : vector<8x32xf32>
    %cst_76 = arith.constant 9.99999974E-6 : f32
    %166 = vector.broadcast %cst_76 : f32 to vector<8x1xf32>
    %167 = arith.addf %163, %166 : vector<8x1xf32>
    %168 = math.rsqrt %167 : vector<8x1xf32>
    %169 = vector.broadcast %168 : vector<8x1xf32> to vector<8x32xf32>
    %170 = arith.mulf %165, %169 : vector<8x32xf32>
    %c0_77 = arith.constant 0 : index
    %c0_78 = arith.constant 0 : index
    %171 = vector.load %arg13[%c0_77, %c0_78] : memref<1x32xf32, #tpu.memory_space<vmem>>, vector<1x32xf32>
    %172 = vector.broadcast %171 : vector<1x32xf32> to vector<8x32xf32>
    %173 = arith.mulf %170, %172 : vector<8x32xf32>
    %c0_79 = arith.constant 0 : index
    %c0_80 = arith.constant 0 : index
    %174 = vector.load %arg14[%c0_79, %c0_80] : memref<1x32xf32, #tpu.memory_space<vmem>>, vector<1x32xf32>
    %175 = vector.broadcast %174 : vector<1x32xf32> to vector<8x32xf32>
    %176 = arith.addf %173, %175 : vector<8x32xf32>
    %cst_81 = arith.constant dense<0.000000e+00> : vector<8xf32>
    %177 = vector.multi_reduction <add>, %176, %cst_81 [1] : vector<8x32xf32> to vector<8xf32>
    %178 = vector.shape_cast %177 : vector<8xf32> to vector<8x1xf32>
    %cst_82 = arith.constant 3.200000e+01 : f32
    %179 = vector.broadcast %cst_82 : f32 to vector<8x1xf32>
    %180 = arith.divf %178, %179 : vector<8x1xf32>
    %181 = vector.broadcast %180 : vector<8x1xf32> to vector<8x32xf32>
    %182 = arith.subf %176, %181 : vector<8x32xf32>
    %183 = arith.mulf %182, %182 : vector<8x32xf32>
    %cst_83 = arith.constant dense<0.000000e+00> : vector<8xf32>
    %184 = vector.multi_reduction <add>, %183, %cst_83 [1] : vector<8x32xf32> to vector<8xf32>
    %185 = vector.shape_cast %184 : vector<8xf32> to vector<8x1xf32>
    %cst_84 = arith.constant 3.200000e+01 : f32
    %186 = vector.broadcast %cst_84 : f32 to vector<8x1xf32>
    %187 = arith.divf %185, %186 : vector<8x1xf32>
    %188 = vector.broadcast %180 : vector<8x1xf32> to vector<8x32xf32>
    %189 = arith.subf %176, %188 : vector<8x32xf32>
    %cst_85 = arith.constant 9.99999974E-6 : f32
    %190 = vector.broadcast %cst_85 : f32 to vector<8x1xf32>
    %191 = arith.addf %187, %190 : vector<8x1xf32>
    %192 = math.rsqrt %191 : vector<8x1xf32>
    %193 = vector.broadcast %192 : vector<8x1xf32> to vector<8x32xf32>
    %194 = arith.mulf %189, %193 : vector<8x32xf32>
    %c0_86 = arith.constant 0 : index
    %c0_87 = arith.constant 0 : index
    %195 = vector.load %arg15[%c0_86, %c0_87] : memref<1x32xf32, #tpu.memory_space<vmem>>, vector<1x32xf32>
    %196 = vector.broadcast %195 : vector<1x32xf32> to vector<8x32xf32>
    %197 = arith.mulf %194, %196 : vector<8x32xf32>
    %c0_88 = arith.constant 0 : index
    %c0_89 = arith.constant 0 : index
    %198 = vector.load %arg16[%c0_88, %c0_89] : memref<1x32xf32, #tpu.memory_space<vmem>>, vector<1x32xf32>
    %199 = vector.broadcast %198 : vector<1x32xf32> to vector<8x32xf32>
    %200 = arith.addf %197, %199 : vector<8x32xf32>
    %c0_90 = arith.constant 0 : index
    %c0_91 = arith.constant 0 : index
    %c0_92 = arith.constant 0 : index
    %201 = vector.load %arg17[%c0_90, %c0_91, %c0_92] : memref<1x8x32xf32, #tpu.memory_space<vmem>>, vector<1x8x32xf32>
    %202 = vector.shape_cast %201 : vector<1x8x32xf32> to vector<8x32xf32>
    %203 = vector.shape_cast %200 : vector<8x32xf32> to vector<1x8x32xf32>
    tpu.vector_store %arg17[%c0_90, %c0_91, %c0_92], %203 {strides = array<i32>} : memref<1x8x32xf32, #tpu.memory_space<vmem>>, vector<1x8x32xf32>,
    return
  }
  func.func @transform_0(%arg0: i32, %arg1: i32) -> (i32, i32, i32) {
    %c0_i32 = arith.constant 0 : i32
    %c0_i32_0 = arith.constant 0 : i32
    return %arg0, %arg1, %c0_i32 : i32, i32, i32
  }
  func.func @transform_1(%arg0: i32, %arg1: i32) -> (i32, i32, i32) {
    %c0_i32 = arith.constant 0 : i32
    %c0_i32_0 = arith.constant 0 : i32
    %c0_i32_1 = arith.constant 0 : i32
    return %arg0, %c0_i32, %c0_i32_0 : i32, i32, i32
  }
  func.func @transform_2(%arg0: i32, %arg1: i32) -> (i32, i32, i32) {
    %c0_i32 = arith.constant 0 : i32
    %c0_i32_0 = arith.constant 0 : i32
    return %arg0, %arg1, %c0_i32 : i32, i32, i32
  }
  func.func @transform_3(%arg0: i32, %arg1: i32) -> (i32, i32) {
    %c0_i32 = arith.constant 0 : i32
    %c0_i32_0 = arith.constant 0 : i32
    %c0_i32_1 = arith.constant 0 : i32
    return %c0_i32, %c0_i32_0 : i32, i32
  }
  func.func @transform_4(%arg0: i32, %arg1: i32) -> (i32, i32) {
    %c0_i32 = arith.constant 0 : i32
    %c0_i32_0 = arith.constant 0 : i32
    %c0_i32_1 = arith.constant 0 : i32
    return %c0_i32, %c0_i32_0 : i32, i32
  }
  func.func @transform_5(%arg0: i32, %arg1: i32) -> (i32, i32) {
    %c0_i32 = arith.constant 0 : i32
    %c0_i32_0 = arith.constant 0 : i32
    %c0_i32_1 = arith.constant 0 : i32
    return %c0_i32, %c0_i32_0 : i32, i32
  }
  func.func @transform_6(%arg0: i32, %arg1: i32) -> (i32, i32) {
    %c0_i32 = arith.constant 0 : i32
    %c0_i32_0 = arith.constant 0 : i32
    %c0_i32_1 = arith.constant 0 : i32
    return %c0_i32, %c0_i32_0 : i32, i32
  }
  func.func @transform_7(%arg0: i32, %arg1: i32) -> (i32, i32) {
    %c0_i32 = arith.constant 0 : i32
    %c0_i32_0 = arith.constant 0 : i32
    %c0_i32_1 = arith.constant 0 : i32
    return %c0_i32, %c0_i32_0 : i32, i32
  }
  func.func @transform_8(%arg0: i32, %arg1: i32) -> (i32, i32) {
    %c0_i32 = arith.constant 0 : i32
    %c0_i32_0 = arith.constant 0 : i32
    %c0_i32_1 = arith.constant 0 : i32
    return %c0_i32, %c0_i32_0 : i32, i32
  }
  func.func @transform_9(%arg0: i32, %arg1: i32) -> (i32, i32) {
    %c0_i32 = arith.constant 0 : i32
    %c0_i32_0 = arith.constant 0 : i32
    %c0_i32_1 = arith.constant 0 : i32
    return %c0_i32, %c0_i32_0 : i32, i32
  }
  func.func @transform_10(%arg0: i32, %arg1: i32) -> (i32, i32) {
    %c0_i32 = arith.constant 0 : i32
    %c0_i32_0 = arith.constant 0 : i32
    %c0_i32_1 = arith.constant 0 : i32
    return %c0_i32, %c0_i32_0 : i32, i32
  }
  func.func @transform_11(%arg0: i32, %arg1: i32) -> (i32, i32) {
    %c0_i32 = arith.constant 0 : i32
    %c0_i32_0 = arith.constant 0 : i32
    %c0_i32_1 = arith.constant 0 : i32
    return %c0_i32, %c0_i32_0 : i32, i32
  }
  func.func @transform_12(%arg0: i32, %arg1: i32) -> (i32, i32) {
    %c0_i32 = arith.constant 0 : i32
    %c0_i32_0 = arith.constant 0 : i32
    %c0_i32_1 = arith.constant 0 : i32
    return %c0_i32, %c0_i32_0 : i32, i32
  }
  func.func @transform_13(%arg0: i32, %arg1: i32) -> (i32, i32) {
    %c0_i32 = arith.constant 0 : i32
    %c0_i32_0 = arith.constant 0 : i32
    %c0_i32_1 = arith.constant 0 : i32
    return %c0_i32, %c0_i32_0 : i32, i32
  }
  func.func @transform_14(%arg0: i32, %arg1: i32) -> (i32, i32) {
    %c0_i32 = arith.constant 0 : i32
    %c0_i32_0 = arith.constant 0 : i32
    %c0_i32_1 = arith.constant 0 : i32
    return %c0_i32, %c0_i32_0 : i32, i32
  }
  func.func @transform_15(%arg0: i32, %arg1: i32) -> (i32, i32, i32) {
    %c0_i32 = arith.constant 0 : i32
    %c0_i32_0 = arith.constant 0 : i32
    return %arg0, %arg1, %c0_i32 : i32, i32, i32
  }
  func.func @transform_16(%arg0: i32, %arg1: i32) -> (i32, i32, i32, i32) {
    %c0_i32 = arith.constant 0 : i32
    %c0_i32_0 = arith.constant 0 : i32
    %c0_i32_1 = arith.constant 0 : i32
    return %arg0, %c0_i32, %arg1, %c0_i32_0 : i32, i32, i32, i32
  }
}

</mosaic_0001>

<bundles_post_ra>
// kernel: encoder_forward.4
= control target key start
LH: loop header
LB: loop body
LE: loop exit
PB: predicated region body
PF: predicated region fallthrough
CT: control target
= control target key end

     0   :  { %s1245_s0 = inlined_call_operand.hbm [shape: f32[2,16,32], index: 0, kind: input, shape index: {}]   ;;  %s1246_s1 = inlined_call_operand.hbm [shape: bf16[32,96], index: 1, kind: input, shape index: {}]   ;;  %s1247_s2 = inlined_call_operand.hbm [shape: f32[1,96], index: 2, kind: input, shape index: {}]   ;;  %s1248_s3 = inlined_call_operand.hbm [shape: bf16[2,16,32], index: 3, kind: output, shape index: {0}]   ;;  %s1249_s4 = inlined_call_operand.hbm [shape: bf16[2,16,64], index: 4, kind: output, shape index: {1}]  }
   0x1   :  { %1258 = sst [smem:[#allocation18_spill]] %s1246_s1 }
   0x2   :  { %1259 = sst [smem:[#allocation19_spill]] %s1247_s2 }
   0x3   :  { %10 = vsyncpa [#allocation3], 0 }
   0x4   :  { %12 = vsyncpa [#allocation3 + $0x1], 0 }
   0x5   :  { %13 = vsyncpa [#allocation6], 0 }
   0x6   :  { %14 = vsyncpa [#allocation4], 0 }
   0x7   :  { %16 = vsyncpa [#allocation4 + $0x1], 0 }
   0x8   :  { %17 = vsyncpa [#allocation10], 0 }
   0x9   :  { %19 = vsyncpa [#allocation10 + $0x1], 0  ;;  %s934_s15 = smov 0   ;;  %s936_s16 = smov 0  }
   0xa   :  { %s938_s17 = smov 0   ;;  %s940_s18 = smov 0  }
   0xb   :  { %s942_s19 = smov 0   ;;  %s944_s20 = smov 0  }
   0xc   :  { %s946_s21 = smov 0   ;;  %s948_s22 = smov 0  }
   0xd LB: > { %1260 = sst [smem:[#allocation15_spill]] %s869_s15  ;;  %s1254_s23 = sadd.s32 4294967295, %s897_s22   ;;  %s897_s22 = sphi %s948_s22, %s25_s22   ;;  %s893_s21 = sphi %s946_s21, %s1287_s21   ;;  %s889_s20 = sphi %s944_s20, %s1286_s20   ;;  %s885_s19 = sphi %s942_s19, %s1285_s19   ;;  %s881_s18 = sphi %s940_s18, %s1284_s18   ;;  %s877_s17 = sphi %s938_s17, %s1283_s17   ;;  %s873_s16 = sphi %s936_s16, %s1282_s16   ;;  %s869_s15 = sphi %s934_s15, %s1281_s15  }
   0xe   : > { %s527_s24 = sadd.s32 4294967294, %s897_s22   ;;  %p59_p0 = scmp.ne.s32.totalorder %s873_s16, %s869_s15 }
   0xf   : > { %p980_p1 = scmp.eq.s32.totalorder %s1254_s23, 0  ;;  %p133_p2 = scmp.eq.s32.totalorder %s527_s24, 3 }
  0x10   : > { %p528_p4 = scmp.ge.s32.totalorder %s897_s22, 1  ;;  %p168_p6 = scmp.lt.s32.totalorder %s897_s22, 5 }
  0x11   : > { %s1261_s25 = scalar_select %p980_p1, 1, 0 }
  0x12   : > { %p986_p3 = por %p980_p1, %p59_p0  ;;  %p991_p5 = por %p133_p2, %p59_p0 }
  0x13   : > { %p996_p7 = pnand %p528_p4, %p168_p6  ;;  %s899_s29 = smov [#allocation5]  }
  0x14   : > { %s1262_s26 = scalar_select %p986_p3, 1, 0 }
  0x15   : > { %s1263_s27 = scalar_select %p991_p5, 1, 0 }
  0x16   : > { %s1265_s28 = scalar_select %p996_p7, 1, 0 }
  0x17   : > { %1264 = sst [smem:[#allocation16_spill]] %s1263_s27  ;;  %s180_s30 = sshll.u32 %s899_s29, 4  ;;  %s181_s30 = int_to_ptr.vmem [resolvable:$true] %s180_s30 }
  0x18   : > { %p580_p8 = pneg %p996_p7  ;;  %s900_s6 = smov [#allocation7]  }
  0x19   : > { %s194_s7 = sshll.u32 %s900_s6, 4  ;;  %s1267_s1 = sld [smem:[#allocation18_spill]]  ;;  %s1008_s7 = int_to_ptr.vmem [resolvable:$true] %s194_s7 }
  0x1a   : > { %p1004_p9 = pnand %p580_p8, %p980_p1 }
  0x1c   : > { %p679_p11 = pneg %p1004_p9 }
  0x1f   : > { %s677_s10 = scalar_lea.hbm %s1267_s1, 256 }
  0x20   : > { %p678_p10 = scmp.ne.s32.totalorder %s1267_s1, %s677_s10  ;;  %p684_p0 = scmp.lt.u32.totalorder %s677_s10, %s1267_s1 }
  0x22   : > { %p680_p12 = pnand %p679_p11, %p678_p10 }
  0x24   : > { %p681_p13 = pneg %p680_p12 }
  0x26   : > { %p686_p2 = pnand %p684_p0, %p681_p13 }
  0x28   : > { %689 = shalt.err (!%p686_p2)
}
  0x29   : > { %s690_s24 = scalar_lea.vmem %s181_s30, 256  ;;  %p698_p5 = scmp.lt.s32.totalorder %s181_s30, %s181_s30 }
  0x2a   : > { %p691_p4 = scmp.ne.s32.totalorder %s181_s30, %s690_s24  ;;  %p699_p1 = scmp.lt.s32.totalorder %s690_s24, %s690_s24 }
  0x2c   : > { %p693_p6 = pnand %p691_p4, %p679_p11  ;;  %p700_p3 = por %p699_p1, %p698_p5 }
  0x2e   : > { %p694_p8 = pneg %p693_p6 }
  0x30   : > { %p701_p7 = pnand %p700_p3, %p694_p8 }
  0x32   : > { %704 = shalt.err (!%p701_p7)
}
  0x33   : > { %s901_s29 = smov 64   ;;  %s902_s6 = smov 4  }
  0x34   : > { %583 = dma.hbm_to_vmem [thread:$0]  (!%p1004_p9), %s1267_s1, 256, %s181_s30, [#allocation6], %s901_s29, %s901_s29, %s902_s6  }
  0x35   : > { %s1268_s2 = sld [smem:[#allocation19_spill]] }
  0x3b   : > { %s705_s12 = scalar_lea.hbm %s1268_s2, 16 }
  0x3c   : > { %p706_p10 = scmp.ne.s32.totalorder %s1268_s2, %s705_s12  ;;  %p712_p5 = scmp.lt.u32.totalorder %s705_s12, %s1268_s2 }
  0x3e   : > { %p708_p1 = pnand %p706_p10, %p679_p11 }
  0x40   : > { %p709_p3 = pneg %p708_p1 }
  0x42   : > { %p714_p7 = pnand %p712_p5, %p709_p3 }
  0x44   : > { %717 = shalt.err (!%p714_p7)
}
  0x45   : > { %s718_s30 = scalar_lea.vmem %s1008_s7, 16  ;;  %s725_s29 = scalar_lea.vmem %s1008_s7, 32 }
  0x46   : > { %p719_p12 = scmp.ne.s32.totalorder %s1008_s7, %s718_s30  ;;  %p726_p2 = scmp.lt.s32.totalorder %s1008_s7, %s1008_s7 }
  0x47   : > { %p727_p4 = scmp.lt.s32.totalorder %s725_s29, %s718_s30 }
  0x48   : > { %p721_p13 = pnand %p719_p12, %p679_p11 }
  0x49   : > { %p728_p6 = por %p727_p4, %p726_p2 }
  0x4a   : > { %p722_p0 = pneg %p721_p13 }
  0x4c   : > { %p729_p8 = pnand %p728_p6, %p722_p0 }
  0x4e   : > { %732 = shalt.err (!%p729_p8)
}
  0x4f   : > { %586 = dma.hbm_to_vmem [thread:$0]  (!%p1004_p9), %s1268_s2, 16, %s1008_s7, [#allocation6]  }
  0x50   : > { %s1269_s8 = sadd.s32 4294967295, %s897_s22   ;;  %s34_s9 = sadd.s32 1, %s889_s20 }
  0x51   : > { %p127_p11 = scmp.eq.s32.totalorder %s1269_s8, 3  ;;  %p35_p10 = scmp.ge.s32.totalorder %s34_s9, 2 }
  0x52   : > { %s37_s5 = sadd.s32 1, %s893_s21  ;;  %p53_p1 = scmp.ne.s32.totalorder %s877_s17, %s873_s16 }
  0x53   : > { %p54_p3 = scmp.eq.s32.totalorder %s897_s22, 0  ;;  %s1289_s9 = smov (%p35_p10, %s34_s9), 0 }
  0x54   : > { %1270 = sst [smem:[#allocation17_spill]] %s1289_s9  ;;  %s1291_s5 = smov (!%p35_p10, %s37_s5), %s893_s21 }
  0x55   : > { %s42_s10 = ssub.s32 %s889_s20, %s1289_s9  ;;  %s46_s11 = sadd.s32 1, %s877_s17 }
  0x56   : > { %p39_p5 = scmp.ge.s32.totalorder %s1291_s5, 2  ;;  %p1071_p9 = por %p127_p11, %p53_p1 }
  0x57   : > { %p1075_p7 = por %p54_p3, %p53_p1  ;;  %s205_s13 = sand.u32 1, %s877_s17  }
  0x58   : > { %s1293_s5 = smov (%p39_p5, %s1291_s5), 0  ;;  %p600_p12 = scmp.lt.s32.totalorder %s897_s22, 4 }
  0x59   : > { %s532_s14 = sshll.u32 %s205_s13, 3  ;;  %s41_s24 = ssub.s32 %s893_s21, %s1293_s5 }
  0x5a   : > { %s43_s30 = sor.u32 %s42_s10, %s41_s24  ;;  %s533_s29 = sshll.u32 %s893_s21, 1 }
  0x5b   : > { %p44_p13 = scmp.eq.s32.totalorder %s43_s30, 0  ;;  %s214_s23 = sadd.s32 %s889_s20, %s533_s29 }
  0x5c   : > { %s534_s6 = sshll.u32 %s214_s23, 7  ;;  %s209_s8 = scalar_lea.vmem [#allocation2], %s532_s14 }
  0x5d   : > { %s218_s1 = sshll.u32 %s209_s8, 4  ;;  %s1093_s15 = scalar_lea.hbm %s1245_s0, %s534_s6  ;;  %s1095_s1 = int_to_ptr.vmem [resolvable:$true] %s218_s1 }
  0x5e   : > { %s1088_s2 = scalar_select %p44_p13, %s877_s17, %s46_s11  }
  0x5f   : > { %p1101_p0 = pnand %p600_p12, %p1075_p7  ;;  %s206_s11 = scalar_lea.sflag [#allocation3], %s205_s13 }
  0x60   : > { %s733_s14 = scalar_lea.hbm %s1093_s15, 128  ;;  %s738_s12 = scalar_lea.hbm %s1245_s0, 512 }
  0x61   : > { %p734_p2 = scmp.ne.s32.totalorder %s1093_s15, %s733_s14  ;;  %p735_p4 = pneg %p1101_p0 }
  0x62   : > { %p739_p11 = scmp.lt.u32.totalorder %s1093_s15, %s1245_s0  ;;  %p740_p10 = scmp.lt.u32.totalorder %s738_s12, %s733_s14 }
  0x63   : > { %p736_p6 = pnand %p735_p4, %p734_p2  ;;  %p742_p3 = scmp.lt.u32.totalorder %s733_s14, %s1093_s15 }
  0x64   : > { %p741_p1 = por %p740_p10, %p739_p11 }
  0x65   : > { %p737_p8 = pneg %p736_p6 }
  0x66   : > { %p743_p5 = por %p742_p3, %p741_p1 }
  0x68   : > { %p744_p7 = pnand %p743_p5, %p737_p8 }
  0x6a   : > { %747 = shalt.err (!%p744_p7)
}
  0x6b   : > { %s748_s13 = scalar_lea.vmem %s1095_s1, 128  ;;  %s903_s29 = smov [#allocation2]  }
  0x6c   : > { %p749_p12 = scmp.ne.s32.totalorder %s1095_s1, %s748_s13  ;;  %s753_s23 = sshll.u32 %s903_s29, 4  ;;  %s754_s23 = int_to_ptr.vmem [resolvable:$false] %s753_s23 }
  0x6d   : > { %s755_s6 = scalar_lea.vmem %s754_s23, 256  ;;  %p756_p6 = scmp.lt.s32.totalorder %s1095_s1, %s754_s23 }
  0x6e   : > { %p751_p13 = pnand %p749_p12, %p735_p4  ;;  %p757_p11 = scmp.lt.s32.totalorder %s755_s6, %s748_s13 }
  0x70   : > { %p752_p2 = pneg %p751_p13  ;;  %p758_p10 = por %p757_p11, %p756_p6 }
  0x72   : > { %p759_p1 = pnand %p758_p10, %p752_p2 }
  0x74   : > { %762 = shalt.err (!%p759_p1)
}
  0x75   : > { %590 = dma.hbm_to_vmem [thread:$0]  (!%p1101_p0), %s1093_s15, 128, %s1095_s1, %s206_s11  }
  0x76   : > { %p1274_p8 = scmp.ne.s32.totalorder %s1265_s28, 0 }
  0x77   : > { %s1133_s8 = sand.u32 (!%p1274_p8), 1, %s873_s16   ;;  %p1275_p4 = scmp.ne.s32.totalorder (!%p1274_p8), %s1262_s26, 0 }
  0x78   : > { %227 = sbr.rel (%p1274_p8) target bundleno = 485 (0x1e5), region = 32  ;;  %s536_s14 = sshll.u32 (!%p1274_p8), %s1133_s8, 3 }
  0x79   : > { %s230_s27 = scalar_lea.sflag (!%p1274_p8), [#allocation3], %s1133_s8  ;;  %s233_s9 = scalar_lea.vmem (!%p1274_p8), [#allocation2], %s536_s14 }
  0x7f   : > { %852 = dma.done.wait (%p1275_p4), %s230_s27, 128  }
  0x80   : > { %854 = vsyncadd (%p1275_p4), %s230_s27, 4294967168  ;;  %p1276_p3 = scmp.ne.s32.totalorder %s1261_s25, 0 }
  0x82   : > { %856 = dma.done.wait (%p1276_p3), [#allocation6], 272  }
  0x83   : > { %858 = vsyncadd (%p1276_p3), [#allocation6], 4294967024  ;;  %v904_v0 = vmov 0.0   ;;  %vm905_vm0 = vmmov 0   ;;  %v675_v1 = vld [vmem:[#allocation5] sm:$0xff]   ;;  %v676_v2 = vld [vmem:[#allocation5 + $0x8] sm:$0xff]  }
  0x84   : > { %558 = vmatprep.subr.bf16.mxu0 %v904_v0  ;;  %562 = vmatprep.mubr.msk.bf16.mxu0 %vm905_vm0, %v904_v0  ;;  %v272_v3 = vld [vmem:[%s233_s9] sm:$0xff]  ;;  %vm297_vm1 = vcmask 261120   ;;  %s548_s1 = sshll.u32 %s885_s19, 1  ;;  %s539_s15 = sshll.u32 %s1133_s8, 2  ;;  %vm342_vm2 = vcmask 257024  }
  0x85   : > { %559 = vmatpush3.bf16.msra.mxu0 %v675_v1  ;;  %v273_v4 = vpack.c.bf16 %v272_v3, %v272_v3  ;;  %s1148_s25 = sadd.s32 %s881_s18, %s548_s1  ;;  %v541_v5 = vld [vmem:[#allocation7] ss:$0 sm:$0xff]  ;;  %s263_s28 = scalar_lea.vmem [#allocation8], %s539_s15 }
  0x86   : > { %560 = vmatprep.subr.bf16.mxu0 %v904_v0  ;;  %s549_s26 = sshll.u32 %s1148_s25, 6  ;;  %s373_s10 = sshll.u32 %s263_s28, 4  ;;  %s1160_s10 = int_to_ptr.vmem [resolvable:$true] %s373_s10 }
  0x87   : > { %s1158_s11 = scalar_lea.hbm %s1248_s3, %s549_s26  ;;  %s906_s12 = smov 96  }
  0x88   : > { %s353_s24 = scalar_lea.sflag [#allocation4], %s1133_s8  ;;  %s763_s30 = scalar_lea.vmem %s1160_s10, 64 }
  0x89   : > { %561 = vmatpush3.bf16.msra.mxu0 %v676_v2  ;;  %p764_p0 = scmp.ne.s32.totalorder %s1160_s10, %s763_s30  ;;  %s907_s13 = smov [#allocation8]  }
  0x8a   : > { %s767_s29 = sshll.u32 %s907_s13, 4  ;;  %s768_s29 = int_to_ptr.vmem [resolvable:$false] %s767_s29 }
  0x8b   : > { %p765_p5 = pnand %p764_p0, %p1071_p9  ;;  %s769_s23 = scalar_lea.vmem %s768_s29, 128 }
  0x8c   : > { %563 = vmatmul.mubr.msk.bf16.vlgmr.msra.gmra.mrb[0].mxu0 %vm297_vm1, %v273_v4  ;;  %p770_p12 = scmp.lt.s32.totalorder %s1160_s10, %s768_s29  ;;  %p771_p13 = scmp.lt.s32.totalorder %s769_s23, %s763_s30 }
  0x8d   : > { %p766_p7 = pneg %p765_p5 }
  0x8e   : > { %p772_p2 = por %p771_p13, %p770_p12 }
  0x90   : > { %p773_p6 = pnand %p772_p2, %p766_p7 }
 0x15f   : > { %v335_v6 = vpop.f32.mrb[0].mxu0 }
 0x160   : > { %v336_v7 = vadd.f32 %v541_v5, %v335_v6  ;;  %v564_v8 = vpop.f32.mrb[1].mxu0 }
 0x161   : > { %v338_v9 = vpop.f32.mrb[2].mxu0 }
 0x162   : > { %v341_v10 = vpack.c.bf16 %v336_v7, %v336_v7  ;;  %v565_v11 = vpop.f32.mrb[3].mxu0 }
 0x164   : > { %347 = vrot.lane.b32.xlu0 %v341_v10, %s906_s12  ;;  %343 = vst.msk [vmem:[%s263_s28] sm:$0xf] %vm342_vm2, %v341_v10 }
 0x165   : > { %776 = shalt.err (!%p773_p6)
}
 0x166   : > { %s777_s6 = scalar_lea.hbm %s1158_s11, 64  ;;  %s781_s9 = scalar_lea.hbm %s1248_s3, 256 }
 0x167   : > { %p778_p11 = scmp.ne.s32.totalorder %s1158_s11, %s777_s6  ;;  %p782_p8 = scmp.lt.u32.totalorder %s1158_s11, %s1248_s3 }
 0x168   : > { %p783_p4 = scmp.lt.u32.totalorder %s781_s9, %s777_s6  ;;  %p785_p0 = scmp.lt.u32.totalorder %s777_s6, %s1158_s11 }
 0x169   : > { %p779_p10 = pnand %p778_p11, %p1071_p9 }
 0x16a   : > { %p784_p3 = por %p783_p4, %p782_p8 }
 0x16b   : > { %p780_p1 = pneg %p779_p10 }
 0x16c   : > { %p786_p5 = por %p785_p0, %p784_p3 }
 0x16e   : > { %p787_p7 = pnand %p786_p5, %p780_p1 }
 0x170   : > { %790 = shalt.err (!%p787_p7)
}
 0x171   : > { %576 = dma.vmem_to_hbm [thread:$0]  (%p1071_p9), %s1160_s10, 64, %s1158_s11, %s353_s24   ;;  %vm350_vm3 = vcmask 519168  }
 0x172   : > { %s270_s19 = scalar_lea.vmem [#allocation9], %s539_s15  ;;  %s1191_s13 = scalar_lea.hbm %s1249_s4, %s549_s26 }
 0x173   : > { %s388_s18 = sshll.u32 %s270_s19, 4  ;;  %s358_s29 = scalar_lea.sflag [#allocation10], %s1133_s8  ;;  %s1193_s18 = int_to_ptr.vmem [resolvable:$true] %s388_s18 }
 0x174   : > { %s791_s23 = scalar_lea.vmem %s1193_s18, 64  ;;  %s908_s15 = smov [#allocation9]  }
 0x175   : > { %p792_p12 = scmp.ne.s32.totalorder %s1193_s18, %s791_s23  ;;  %s795_s25 = sshll.u32 %s908_s15, 4  ;;  %s796_s25 = int_to_ptr.vmem [resolvable:$false] %s795_s25 }
 0x176   : > { %s797_s10 = scalar_lea.vmem %s796_s25, 128  ;;  %p798_p6 = scmp.lt.s32.totalorder %s1193_s18, %s796_s25 }
 0x177   : > { %p793_p13 = pnand %p792_p12, %p1071_p9  ;;  %p799_p11 = scmp.lt.s32.totalorder %s797_s10, %s791_s23 }
 0x179   : > { %p794_p2 = pneg %p793_p13  ;;  %p800_p10 = por %p799_p11, %p798_p6 }
 0x17b   : > { %p801_p1 = pnand %p800_p10, %p794_p2 }
 0x1d6   : > { %v348_v12 = vpop.permute.xlu0 %347 }
 0x1d7   : > { %351 = vst.msk [vmem:[%s270_s19] sm:$0xf] %vm350_vm3, %v348_v12 }
 0x1d8   : > { %804 = shalt.err (!%p801_p1)
}
 0x1d9   : > { %s805_s8 = scalar_lea.hbm %s1191_s13, 64  ;;  %s809_s24 = scalar_lea.hbm %s1249_s4, 256 }
 0x1da   : > { %p806_p8 = scmp.ne.s32.totalorder %s1191_s13, %s805_s8  ;;  %p810_p0 = scmp.lt.u32.totalorder %s1191_s13, %s1249_s4 }
 0x1db   : > { %p811_p5 = scmp.lt.u32.totalorder %s809_s24, %s805_s8  ;;  %p813_p12 = scmp.lt.u32.totalorder %s805_s8, %s1191_s13 }
 0x1dc   : > { %p807_p4 = pnand %p806_p8, %p1071_p9 }
 0x1dd   : > { %p812_p7 = por %p811_p5, %p810_p0 }
 0x1de   : > { %p808_p3 = pneg %p807_p4 }
 0x1df   : > { %p814_p13 = por %p813_p12, %p812_p7 }
 0x1e1   : > { %p815_p2 = pnand %p814_p13, %p808_p3 }
 0x1e3   : > { %818 = shalt.err (!%p815_p2)
}
 0x1e4   : > { %577 = dma.vmem_to_hbm [thread:$0]  (%p1071_p9), %s1193_s18, 64, %s1191_s13, %s358_s29  }
 0x1e5 PF: > { %s1277_s27 = sld [smem:[#allocation15_spill]]  ;;  %s1278_s9 = sld [smem:[#allocation16_spill]] }
 0x1e6   : > { %p603_p6 = scmp.ge.s32.totalorder %s897_s22, 2 }
 0x1eb   : > { %s400_s1 = sand.u32 1, %s1277_s27   ;;  %p1279_p11 = scmp.ne.s32.totalorder %s1278_s9, 0 }
 0x1ec   : > { %s401_s28 = scalar_lea.sflag [#allocation4], %s400_s1 }
 0x1ed   : > { %p592_p10 = pnand %p603_p6, %p1279_p11 }
 0x1ef   : > { %860 = dma.done.wait (!%p592_p10), %s401_s28, 64  }
 0x1f0   : > { %862 = vsyncadd (!%p592_p10), %s401_s28, 4294967232  ;;  %s410_s19 = scalar_lea.sflag [#allocation10], %s400_s1 }
 0x1f1   : > { %864 = dma.done.wait (!%p592_p10), %s410_s19, 64  }
 0x1f2   : > { %866 = vsyncadd (!%p592_p10), %s410_s19, 4294967232  ;;  %s25_s22 = sadd.s32 1, %s897_s22   ;;  %s1280_s7 = sld [smem:[#allocation17_spill]] }
 0x1f3   : > { %p22_p1 = scmp.ge.s32.totalorder %s25_s22, 6   ;;  %s1281_s15 = smov %s873_s16 }
 0x1f4   : > { %s1282_s16 = smov %s877_s17  ;;  %s1283_s17 = smov %s1088_s2 }
 0x1f5   : > { %s1284_s18 = smov %s889_s20  ;;  %s1285_s19 = smov %s893_s21 }
 0x1f6   : > { %s1287_s21 = smov %s1293_s5  ;;  %24 = sbr.rel (!%p22_p1) target bundleno = 13 (0xd), region = 102 }
 0x1f8   : > { %s1286_s20 = smov %s1280_s7 }
 0x1fd   :  { %415 = vsyncpa [#allocation3], 1 }
 0x1fe   :  { %417 = vsyncpa [#allocation3 + $0x1], 1 }
 0x1ff   :  { %418 = vsyncpa [#allocation6], 1 }
 0x200   :  { %419 = vsyncpa [#allocation4], 1 }
 0x201   :  { %421 = vsyncpa [#allocation4 + $0x1], 1 }
 0x202   :  { %422 = vsyncpa [#allocation10], 1 }
 0x203   :  { %424 = vsyncpa [#allocation10 + $0x1], 1 }

// kernel: encoder_forward.5
= control target key start
LH: loop header
LB: loop body
LE: loop exit
PB: predicated region body
PF: predicated region fallthrough
CT: control target
= control target key end

     0   :  { %s3846_s0 = inlined_call_operand.hbm [shape: bf16[2,16,32], index: 0, kind: input, shape index: {}]   ;;  %s3847_s1 = inlined_call_operand.hbm [shape: bf16[2,16,64], index: 1, kind: input, shape index: {}]   ;;  %s3848_s2 = inlined_call_operand.hbm [shape: f32[2,16,32], index: 2, kind: input, shape index: {}]   ;;  %s3849_s3 = inlined_call_operand.hbm [shape: bf16[32,32], index: 3, kind: input, shape index: {}]   ;;  %s3850_s4 = inlined_call_operand.hbm [shape: f32[1,32], index: 4, kind: input, shape index: {}]   ;;  %s3851_s5 = inlined_call_operand.hbm [shape: f32[1,32], index: 5, kind: input, shape index: {}]   ;;  %s3852_s6 = inlined_call_operand.hbm [shape: f32[1,32], index: 6, kind: input, shape index: {}]   ;;  %s3853_s7 = inlined_call_operand.hbm [shape: bf16[32,64], index: 7, kind: input, shape index: {}]   ;;  %s3854_s8 = inlined_call_operand.hbm [shape: f32[1,64], index: 8, kind: input, shape index: {}]   ;;  %s3855_s9 = inlined_call_operand.hbm [shape: bf16[64,32], index: 9, kind: input, shape index: {}]   ;;  %s3856_s10 = inlined_call_operand.hbm [shape: f32[1,32], index: 10, kind: input, shape index: {}]   ;;  %s3857_s11 = inlined_call_operand.hbm [shape: f32[1,32], index: 11, kind: input, shape index: {}]   ;;  %s3858_s12 = inlined_call_operand.hbm [shape: f32[1,32], index: 12, kind: input, shape index: {}]   ;;  %s3859_s13 = inlined_call_operand.hbm [shape: f32[1,32], index: 13, kind: input, shape index: {}]   ;;  %s3860_s14 = inlined_call_operand.hbm [shape: f32[1,32], index: 14, kind: input, shape index: {}]   ;;  %s3861_s15 = inlined_call_operand.hbm [shape: f32[2,16,32], index: 15, kind: output, shape index: {0}]   ;;  %s3862_s16 = inlined_call_operand.hbm [shape: bf16[2,4,16,16], index: 16, kind: output, shape index: {1}]  }
   0x1   :  { %3890 = sst [smem:[#allocation48_spill]] %s3846_s0 }
   0x2   :  { %3891 = sst [smem:[#allocation49_spill]] %s3847_s1 }
   0x3   :  { %3892 = sst [smem:[#allocation50_spill]] %s3848_s2 }
   0x4   :  { %3893 = sst [smem:[#allocation51_spill]] %s3849_s3 }
   0x5   :  { %3894 = sst [smem:[#allocation52_spill]] %s3850_s4 }
   0x6   :  { %3895 = sst [smem:[#allocation53_spill]] %s3851_s5 }
   0x7   :  { %3896 = sst [smem:[#allocation54_spill]] %s3852_s6 }
   0x8   :  { %3897 = sst [smem:[#allocation55_spill]] %s3853_s7 }
   0x9   :  { %3898 = sst [smem:[#allocation56_spill]] %s3854_s8 }
   0xa   :  { %3899 = sst [smem:[#allocation57_spill]] %s3855_s9 }
   0xb   :  { %3900 = sst [smem:[#allocation58_spill]] %s3856_s10 }
   0xc   :  { %3901 = sst [smem:[#allocation59_spill]] %s3857_s11 }
   0xd   :  { %3902 = sst [smem:[#allocation60_spill]] %s3858_s12 }
   0xe   :  { %3903 = sst [smem:[#allocation61_spill]] %s3860_s14 }
   0xf   :  { %3904 = sst [smem:[#allocation62_spill]] %s3861_s15 }
  0x10   :  { %3905 = sst [smem:[#allocation63_spill]] %s3862_s16 }
  0x11   :  { %22 = vsyncpa [#allocation4], 0 }
  0x12   :  { %24 = vsyncpa [#allocation4 + $0x1], 0 }
  0x13   :  { %25 = vsyncpa [#allocation7], 0 }
  0x14   :  { %27 = vsyncpa [#allocation7 + $0x1], 0 }
  0x15   :  { %28 = vsyncpa [#allocation10], 0 }
  0x16   :  { %29 = vsyncpa [#allocation13], 0 }
  0x17   :  { %30 = vsyncpa [#allocation16], 0 }
  0x18   :  { %31 = vsyncpa [#allocation19], 0 }
  0x19   :  { %32 = vsyncpa [#allocation22], 0 }
  0x1a   :  { %33 = vsyncpa [#allocation25], 0 }
  0x1b   :  { %34 = vsyncpa [#allocation5], 0 }
  0x1c   :  { %36 = vsyncpa [#allocation5 + $0x1], 0 }
  0x1d   :  { %37 = vsyncpa [#allocation29], 0 }
  0x1e   :  { %39 = vsyncpa [#allocation29 + $0x1], 0  ;;  %s3087_s21 = smov 0   ;;  %s3089_s22 = smov 0  }
  0x1f   :  { %s3091_s23 = smov 0   ;;  %s3093_s24 = smov 0  }
  0x20   :  { %s3095_s25 = smov 0   ;;  %s3097_s26 = smov 0  }
  0x21   :  { %s3099_s27 = smov 0   ;;  %s3101_s28 = smov 0  }
  0x22   :  { %s3103_s29 = smov 0   ;;  %s3105_s30 = smov 0  }
  0x23   :  { %s3107_s0 = smov 0  }
  0x24 LB: > { %3906 = sst [smem:[#allocation41_spill]] %s2938_s24  ;;  %s3143_s17 = sadd.s32 4294967295, %s2966_s0   ;;  %s2966_s0 = sphi %s3107_s0, %s45_s0   ;;  %s2962_s30 = sphi %s3105_s30, %s3987_s30   ;;  %s2958_s29 = sphi %s3103_s29, %s3986_s29   ;;  %s2954_s28 = sphi %s3101_s28, %s3985_s28   ;;  %s2950_s27 = sphi %s3099_s27, %s3978_s27   ;;  %s2946_s26 = sphi %s3097_s26, %s3984_s26   ;;  %s2942_s25 = sphi %s3095_s25, %s3983_s25   ;;  %s2938_s24 = sphi %s3093_s24, %s3976_s24   ;;  %s2934_s23 = sphi %s3091_s23, %s3982_s23   ;;  %s2930_s22 = sphi %s3089_s22, %s3981_s22   ;;  %s2926_s21 = sphi %s3087_s21, %s3980_s21  }
  0x25   : > { %3907 = sst [smem:[#allocation42_spill]] %s2942_s25  ;;  %p1885_p0 = scmp.ge.s32.totalorder %s2966_s0, 1 }
  0x26   : > { %3908 = sst [smem:[#allocation43_spill]] %s2946_s26  ;;  %p3877_p1 = scmp.eq.s32.totalorder %s3143_s17, 0 }
  0x27   : > { %3909 = sst [smem:[#allocation44_spill]] %s2950_s27  ;;  %p452_p2 = scmp.lt.s32.totalorder %s2966_s0, 5 }
  0x28   : > { %3910 = sst [smem:[#allocation45_spill]] %s2954_s28  ;;  %s2968_s19 = smov [#allocation9]  }
  0x29   : > { %3911 = sst [smem:[#allocation46_spill]] %s2958_s29  ;;  %p3148_p3 = pnand %p1885_p0, %p452_p2 }
  0x2a   : > { %s464_s20 = sshll.u32 %s2968_s19, 4  ;;  %s2969_s16 = smov [#allocation12]   ;;  %s3152_s20 = int_to_ptr.vmem [resolvable:$true] %s464_s20 }
  0x2b   : > { %s3912_s18 = scalar_select %p3148_p3, 1, 0 }
  0x2c   : > { %p2127_p4 = pneg %p3148_p3  ;;  %s489_s27 = sshll.u32 %s2969_s16, 4  ;;  %s3162_s27 = int_to_ptr.vmem [resolvable:$true] %s489_s27 }
  0x2d   : > { %3913 = sst [smem:[#allocation47_spill]] %s3912_s18  ;;  %s2970_s28 = smov [#allocation15]  }
  0x2e   : > { %p3158_p5 = pnand %p2127_p4, %p3877_p1  ;;  %s3164_s2 = sshll.u32 %s2970_s28, 4  ;;  %s511_s2 = int_to_ptr.vmem [resolvable:$true] %s3164_s2 }
  0x2f   : > { %s3915_s3 = sld [smem:[#allocation51_spill]] }
  0x30   : > { %s3914_s15 = scalar_select %p3158_p5, 1, 0 }
  0x31   : > { %p3174_p7 = pneg %p3158_p5 }
  0x35   : > { %s2354_s19 = scalar_lea.hbm %s3915_s3, 256 }
  0x36   : > { %p2355_p6 = scmp.ne.s32.totalorder %s3915_s3, %s2354_s19  ;;  %p2361_p10 = scmp.lt.u32.totalorder %s2354_s19, %s3915_s3 }
  0x38   : > { %p2357_p8 = pnand %p3174_p7, %p2355_p6 }
  0x3a   : > { %p2358_p9 = pneg %p2357_p8 }
  0x3c   : > { %p2363_p11 = pnand %p2361_p10, %p2358_p9 }
  0x3e   : > { %2366 = shalt.err (!%p2363_p11)
}
  0x3f   : > { %s2367_s24 = scalar_lea.vmem %s3152_s20, 256  ;;  %p2375_p2 = scmp.lt.s32.totalorder %s3152_s20, %s3152_s20 }
  0x40   : > { %p2368_p12 = scmp.ne.s32.totalorder %s3152_s20, %s2367_s24  ;;  %p2376_p4 = scmp.lt.s32.totalorder %s2367_s24, %s2367_s24 }
  0x42   : > { %p2370_p13 = pnand %p2368_p12, %p3174_p7  ;;  %p2377_p6 = por %p2376_p4, %p2375_p2 }
  0x44   : > { %p2371_p0 = pneg %p2370_p13 }
  0x46   : > { %p2378_p8 = pnand %p2377_p6, %p2371_p0 }
  0x48   : > { %2381 = shalt.err (!%p2378_p8)
}
  0x49   : > { %s2971_s25 = smov 64   ;;  %s2972_s26 = smov 4  }
  0x4a   : > { %2130 = dma.hbm_to_vmem [thread:$0]  (!%p3158_p5), %s3915_s3, 256, %s3152_s20, [#allocation10], %s2971_s25, %s2971_s25, %s2972_s26  }
  0x4b   : > { %s3917_s5 = sld [smem:[#allocation53_spill]] }
  0x51   : > { %s2382_s24 = scalar_lea.hbm %s3917_s5, 16 }
  0x52   : > { %p2383_p9 = scmp.ne.s32.totalorder %s3917_s5, %s2382_s24  ;;  %p2389_p12 = scmp.lt.u32.totalorder %s2382_s24, %s3917_s5 }
  0x54   : > { %p2385_p10 = pnand %p2383_p9, %p3174_p7 }
  0x56   : > { %p2386_p11 = pneg %p2385_p10 }
  0x58   : > { %p2391_p13 = pnand %p2389_p12, %p2386_p11 }
  0x5a   : > { %2394 = shalt.err (!%p2391_p13)
}
  0x5b   : > { %s2395_s20 = scalar_lea.vmem %s3162_s27, 16  ;;  %s2402_s12 = scalar_lea.vmem %s3162_s27, 32 }
  0x5c   : > { %p2396_p0 = scmp.ne.s32.totalorder %s3162_s27, %s2395_s20  ;;  %p2403_p6 = scmp.lt.s32.totalorder %s3162_s27, %s3162_s27 }
  0x5d   : > { %p2404_p8 = scmp.lt.s32.totalorder %s2402_s12, %s2395_s20 }
  0x5e   : > { %p2398_p2 = pnand %p2396_p0, %p3174_p7 }
  0x5f   : > { %p2405_p9 = por %p2404_p8, %p2403_p6 }
  0x60   : > { %p2399_p4 = pneg %p2398_p2 }
  0x62   : > { %p2406_p10 = pnand %p2405_p9, %p2399_p4 }
  0x64   : > { %2409 = shalt.err (!%p2406_p10)
}
  0x65   : > { %2136 = dma.hbm_to_vmem [thread:$0]  (!%p3158_p5), %s3917_s5, 16, %s3162_s27, [#allocation13]  }
  0x66   : > { %s3918_s7 = sld [smem:[#allocation55_spill]] }
  0x6c   : > { %s2410_s19 = scalar_lea.hbm %s3918_s7, 256 }
  0x6d   : > { %p2411_p11 = scmp.ne.s32.totalorder %s3918_s7, %s2410_s19  ;;  %p2417_p0 = scmp.lt.u32.totalorder %s2410_s19, %s3918_s7 }
  0x6f   : > { %p2413_p12 = pnand %p2411_p11, %p3174_p7 }
  0x71   : > { %p2414_p13 = pneg %p2413_p12 }
  0x73   : > { %p2419_p2 = pnand %p2417_p0, %p2414_p13 }
  0x75   : > { %2422 = shalt.err (!%p2419_p2)
}
  0x76   : > { %s2423_s12 = scalar_lea.vmem %s511_s2, 256  ;;  %p2431_p9 = scmp.lt.s32.totalorder %s511_s2, %s511_s2 }
  0x77   : > { %p2424_p4 = scmp.ne.s32.totalorder %s511_s2, %s2423_s12  ;;  %p2432_p10 = scmp.lt.s32.totalorder %s2423_s12, %s2423_s12 }
  0x79   : > { %p2426_p6 = pnand %p2424_p4, %p3174_p7  ;;  %p2433_p1 = por %p2432_p10, %p2431_p9 }
  0x7b   : > { %p2427_p8 = pneg %p2426_p6 }
  0x7d   : > { %p2434_p3 = pnand %p2433_p1, %p2427_p8 }
  0x7f   : > { %2437 = shalt.err (!%p2434_p3)
}
  0x80   : > { %2142 = dma.hbm_to_vmem [thread:$0]  (!%p3158_p5), %s3918_s7, 256, %s511_s2, [#allocation16], %s2971_s25, %s2971_s25, %s2972_s26  }
  0x81   : > { %s2973_s10 = smov [#allocation18]   ;;  %s2974_s18 = smov [#allocation21]  }
  0x82   : > { %s534_s14 = sshll.u32 %s2973_s10, 4  ;;  %s559_s19 = sshll.u32 %s2974_s18, 4  ;;  %s535_s14 = int_to_ptr.vmem [resolvable:$true] %s534_s14  ;;  %s560_s19 = int_to_ptr.vmem [resolvable:$true] %s559_s19 }
  0x83   : > { %s3919_s9 = sld [smem:[#allocation57_spill]] }
  0x89   : > { %s2438_s24 = scalar_lea.hbm %s3919_s9, 512 }
  0x8a   : > { %p2439_p1 = scmp.ne.s32.totalorder %s3919_s9, %s2438_s24  ;;  %p2445_p12 = scmp.lt.u32.totalorder %s2438_s24, %s3919_s9 }
  0x8c   : > { %p2441_p3 = pnand %p2439_p1, %p3174_p7 }
  0x8e   : > { %p2442_p11 = pneg %p2441_p3 }
  0x90   : > { %p2447_p13 = pnand %p2445_p12, %p2442_p11 }
  0x92   : > { %2450 = shalt.err (!%p2447_p13)
}
  0x93   : > { %s2451_s2 = scalar_lea.vmem %s535_s14, 512  ;;  %p2459_p6 = scmp.lt.s32.totalorder %s535_s14, %s535_s14 }
  0x94   : > { %p2452_p0 = scmp.ne.s32.totalorder %s535_s14, %s2451_s2  ;;  %p2460_p8 = scmp.lt.s32.totalorder %s2451_s2, %s2451_s2 }
  0x96   : > { %p2454_p2 = pnand %p2452_p0, %p3174_p7  ;;  %p2461_p9 = por %p2460_p8, %p2459_p6 }
  0x98   : > { %p2455_p4 = pneg %p2454_p2 }
  0x9a   : > { %p2462_p10 = pnand %p2461_p9, %p2455_p4 }
  0x9c   : > { %2465 = shalt.err (!%p2462_p10)
}
  0x9d   : > { %2148 = dma.hbm_to_vmem [thread:$0]  (!%p3158_p5), %s3919_s9, 512, %s535_s14, [#allocation19], %s2971_s25, %s2971_s25, %s2972_s26  }
  0x9e   : > { %s3920_s11 = sld [smem:[#allocation59_spill]] }
  0xa4   : > { %s2466_s16 = scalar_lea.hbm %s3920_s11, 16 }
  0xa5   : > { %p2467_p1 = scmp.ne.s32.totalorder %s3920_s11, %s2466_s16  ;;  %p2473_p12 = scmp.lt.u32.totalorder %s2466_s16, %s3920_s11 }
  0xa7   : > { %p2469_p3 = pnand %p2467_p1, %p3174_p7 }
  0xa9   : > { %p2470_p11 = pneg %p2469_p3 }
  0xab   : > { %p2475_p13 = pnand %p2473_p12, %p2470_p11 }
  0xad   : > { %2478 = shalt.err (!%p2475_p13)
}
  0xae   : > { %s2479_s27 = scalar_lea.vmem %s560_s19, 16  ;;  %s2486_s14 = scalar_lea.vmem %s560_s19, 32 }
  0xaf   : > { %p2480_p0 = scmp.ne.s32.totalorder %s560_s19, %s2479_s27  ;;  %p2487_p6 = scmp.lt.s32.totalorder %s560_s19, %s560_s19 }
  0xb0   : > { %p2488_p8 = scmp.lt.s32.totalorder %s2486_s14, %s2479_s27 }
  0xb1   : > { %p2482_p2 = pnand %p2480_p0, %p3174_p7 }
  0xb2   : > { %p2489_p9 = por %p2488_p8, %p2487_p6 }
  0xb3   : > { %p2483_p4 = pneg %p2482_p2 }
  0xb5   : > { %p2490_p10 = pnand %p2489_p9, %p2483_p4 }
  0xb7   : > { %2493 = shalt.err (!%p2490_p10)
}
  0xb8   : > { %2154 = dma.hbm_to_vmem [thread:$0]  (!%p3158_p5), %s3920_s11, 16, %s560_s19, [#allocation22]  }
  0xb9   : > { %s2975_s8 = smov [#allocation24]   ;;  %s2494_s28 = scalar_lea.hbm %s3859_s13, 16 }
  0xba   : > { %s581_s10 = sshll.u32 %s2975_s8, 4  ;;  %p2495_p1 = scmp.ne.s32.totalorder %s3859_s13, %s2494_s28  ;;  %s582_s10 = int_to_ptr.vmem [resolvable:$true] %s581_s10 }
  0xbb   : > { %p2501_p12 = scmp.lt.u32.totalorder %s2494_s28, %s3859_s13 }
  0xbc   : > { %p2497_p3 = pnand %p2495_p1, %p3174_p7 }
  0xbe   : > { %p2498_p11 = pneg %p2497_p3 }
  0xc0   : > { %p2503_p13 = pnand %p2501_p12, %p2498_p11 }
  0xc2   : > { %2506 = shalt.err (!%p2503_p13)
}
  0xc3   : > { %s2507_s19 = scalar_lea.vmem %s582_s10, 16  ;;  %s2514_s14 = scalar_lea.vmem %s582_s10, 32 }
  0xc4   : > { %p2508_p0 = scmp.ne.s32.totalorder %s582_s10, %s2507_s19  ;;  %p2515_p6 = scmp.lt.s32.totalorder %s582_s10, %s582_s10 }
  0xc5   : > { %p2516_p8 = scmp.lt.s32.totalorder %s2514_s14, %s2507_s19 }
  0xc6   : > { %p2510_p2 = pnand %p2508_p0, %p3174_p7 }
  0xc7   : > { %p2517_p9 = por %p2516_p8, %p2515_p6 }
  0xc8   : > { %p2511_p4 = pneg %p2510_p2 }
  0xca   : > { %p2518_p10 = pnand %p2517_p9, %p2511_p4 }
  0xcc   : > { %2521 = shalt.err (!%p2518_p10)
}
  0xcd   : > { %2160 = dma.hbm_to_vmem [thread:$0]  (!%p3158_p5), %s3859_s13, 16, %s582_s10, [#allocation25]  }
  0xce   : > { %p3880_p1 = scmp.eq.s32.totalorder %s2966_s0, 0  ;;  %p99_p3 = scmp.ne.s32.totalorder %s2934_s23, %s2930_s22 }
  0xcf   : > { %p105_p11 = scmp.ne.s32.totalorder %s2930_s22, %s2926_s21  ;;  %p3879_p12 = scmp.lt.s32.totalorder %s2966_s0, 4 }
  0xd0   : > { %s623_s18 = sand.u32 1, %s2966_s0   ;;  %p101_p13 = por %p99_p3, %p3880_p1 }
  0xd1   : > { %p3921_p0 = scmp.eq.s32.totalorder %s3143_s17, 0  ;;  %s625_s28 = sand.u32 1, %s2934_s23  }
  0xd2   : > { %s1902_s24 = sshll.u32 %s625_s28, 3  ;;  %s1965_s20 = sshll.u32 %s2962_s30, 7 }
  0xd3   : > { %p3313_p2 = por %p105_p11, %p3921_p0  ;;  %s3923_s1 = sld [smem:[#allocation49_spill]] }
  0xd4   : > { %s627_s21 = scalar_lea.vmem [#allocation6], %s1902_s24  ;;  %p3326_p4 = pnand %p3879_p12, %p101_p13 }
  0xd5   : > { %s3922_s16 = scalar_select %p3313_p2, 1, 0 }
  0xd6   : > { %s634_s19 = sshll.u32 %s627_s21, 4  ;;  %s2976_s2 = smov [#allocation11]   ;;  %s3330_s19 = int_to_ptr.vmem [resolvable:$true] %s634_s19 }
  0xd7   : > { %s3332_s3 = sshll.u32 %s2976_s2, 4  ;;  %s3334_s28 = scalar_lea.sflag [#allocation7], %s623_s18  ;;  %s479_s3 = int_to_ptr.vmem [resolvable:$true] %s3332_s3 }
  0xd8   : > { %p2524_p8 = pneg %p3326_p4 }
  0xd9   : > { %s3322_s10 = scalar_lea.hbm %s3923_s1, %s1965_s20  ;;  %s2527_s27 = scalar_lea.hbm %s3923_s1, 256 }
  0xda   : > { %s2522_s20 = scalar_lea.hbm %s3322_s10, 128  ;;  %p2528_p3 = scmp.lt.u32.totalorder %s3322_s10, %s3923_s1 }
  0xdb   : > { %p2523_p6 = scmp.ne.s32.totalorder %s3322_s10, %s2522_s20  ;;  %p2529_p11 = scmp.lt.u32.totalorder %s2527_s27, %s2522_s20 }
  0xdc   : > { %p2531_p0 = scmp.lt.u32.totalorder %s2522_s20, %s3322_s10 }
  0xdd   : > { %p2525_p9 = pnand %p2524_p8, %p2523_p6  ;;  %p2530_p13 = por %p2529_p11, %p2528_p3 }
  0xdf   : > { %p2526_p10 = pneg %p2525_p9  ;;  %p2532_p12 = por %p2531_p0, %p2530_p13 }
  0xe1   : > { %p2533_p1 = pnand %p2532_p12, %p2526_p10 }
  0xe3   : > { %2536 = shalt.err (!%p2533_p1)
}
  0xe4   : > { %s2537_s18 = scalar_lea.vmem %s3330_s19, 128  ;;  %s2977_s2 = smov [#allocation6]  }
  0xe5   : > { %p2538_p6 = scmp.ne.s32.totalorder %s3330_s19, %s2537_s18  ;;  %s2542_s24 = sshll.u32 %s2977_s2, 4  ;;  %s2543_s24 = int_to_ptr.vmem [resolvable:$false] %s2542_s24 }
  0xe6   : > { %s2544_s8 = scalar_lea.vmem %s2543_s24, 256  ;;  %p2545_p5 = scmp.lt.s32.totalorder %s3330_s19, %s2543_s24 }
  0xe7   : > { %p2540_p9 = pnand %p2538_p6, %p2524_p8  ;;  %p2546_p3 = scmp.lt.s32.totalorder %s2544_s8, %s2537_s18 }
  0xe9   : > { %p2541_p2 = pneg %p2540_p9  ;;  %p2547_p11 = por %p2546_p3, %p2545_p5 }
  0xeb   : > { %p2548_p13 = pnand %p2547_p11, %p2541_p2 }
  0xed   : > { %2551 = shalt.err (!%p2548_p13)
}
  0xee   : > { %2170 = dma.hbm_to_vmem [thread:$0]  (!%p3326_p4), %s3322_s10, 128, %s3330_s19, %s3334_s28, %s2971_s25, %s2971_s25, %s2972_s26  }
  0xef   : > { %s3925_s4 = sld [smem:[#allocation52_spill]] }
  0xf5   : > { %s2552_s27 = scalar_lea.hbm %s3925_s4, 16 }
  0xf6   : > { %p2553_p5 = scmp.ne.s32.totalorder %s3925_s4, %s2552_s27  ;;  %p2559_p2 = scmp.lt.u32.totalorder %s2552_s27, %s3925_s4 }
  0xf8   : > { %p2555_p1 = pnand %p2553_p5, %p3174_p7 }
  0xfa   : > { %p2556_p12 = pneg %p2555_p1 }
  0xfc   : > { %p2561_p8 = pnand %p2559_p2, %p2556_p12 }
  0xfe   : > { %2564 = shalt.err (!%p2561_p8)
}
  0xff   : > { %s2565_s24 = scalar_lea.vmem %s479_s3, 16  ;;  %s2572_s25 = scalar_lea.vmem %s479_s3, 32 }
 0x100   : > { %p2566_p4 = scmp.ne.s32.totalorder %s479_s3, %s2565_s24  ;;  %p2573_p6 = scmp.lt.s32.totalorder %s479_s3, %s479_s3 }
 0x101   : > { %p2574_p9 = scmp.lt.s32.totalorder %s2572_s25, %s2565_s24 }
 0x102   : > { %p2568_p10 = pnand %p2566_p4, %p3174_p7 }
 0x103   : > { %p2575_p3 = por %p2574_p9, %p2573_p6 }
 0x104   : > { %p2569_p0 = pneg %p2568_p10 }
 0x106   : > { %p2576_p11 = pnand %p2575_p3, %p2569_p0 }
 0x108   : > { %2579 = shalt.err (!%p2576_p11)
}
 0x109   : > { %p3926_p13 = scmp.ne.s32.totalorder %s3914_s15, 0  ;;  %s2978_s19 = smov [#allocation14]  }
 0x10a   : > { %s500_s8 = sshll.u32 %s2978_s19, 4  ;;  %s2979_s20 = smov [#allocation17]   ;;  %s501_s8 = int_to_ptr.vmem [resolvable:$true] %s500_s8 }
 0x10b   : > { %2133 = dma.hbm_to_vmem [thread:$0]  (!%p3926_p13), %s3925_s4, 16, %s479_s3, [#allocation10]  }
 0x10c   : > { %s524_s12 = sshll.u32 %s2979_s20, 4  ;;  %s3927_s6 = sld [smem:[#allocation54_spill]]  ;;  %s525_s12 = int_to_ptr.vmem [resolvable:$true] %s524_s12 }
 0x112   : > { %s2580_s18 = scalar_lea.hbm %s3927_s6, 16 }
 0x113   : > { %p2581_p5 = scmp.ne.s32.totalorder %s3927_s6, %s2580_s18  ;;  %p2587_p2 = scmp.lt.u32.totalorder %s2580_s18, %s3927_s6 }
 0x115   : > { %p2583_p1 = pnand %p2581_p5, %p3174_p7 }
 0x117   : > { %p2584_p12 = pneg %p2583_p1 }
 0x119   : > { %p2589_p8 = pnand %p2587_p2, %p2584_p12 }
 0x11b   : > { %2592 = shalt.err (!%p2589_p8)
}
 0x11c   : > { %s2593_s3 = scalar_lea.vmem %s501_s8, 16  ;;  %s2600_s26 = scalar_lea.vmem %s501_s8, 32 }
 0x11d   : > { %p2594_p4 = scmp.ne.s32.totalorder %s501_s8, %s2593_s3  ;;  %p2601_p6 = scmp.lt.s32.totalorder %s501_s8, %s501_s8 }
 0x11e   : > { %p2602_p9 = scmp.lt.s32.totalorder %s2600_s26, %s2593_s3 }
 0x11f   : > { %p2596_p10 = pnand %p2594_p4, %p3174_p7 }
 0x120   : > { %p2603_p3 = por %p2602_p9, %p2601_p6 }
 0x121   : > { %p2597_p0 = pneg %p2596_p10 }
 0x123   : > { %p2604_p11 = pnand %p2603_p3, %p2597_p0 }
 0x125   : > { %2607 = shalt.err (!%p2604_p11)
}
 0x126   : > { %2139 = dma.hbm_to_vmem [thread:$0]  (!%p3926_p13), %s3927_s6, 16, %s501_s8, [#allocation13]  }
 0x127   : > { %s3928_s21 = sld [smem:[#allocation56_spill]] }
 0x12d   : > { %s3929_s18 = smov %s3928_s21  ;;  %s2608_s14 = scalar_lea.hbm %s3928_s21, 16 }
 0x12e   : > { %p2609_p5 = scmp.ne.s32.totalorder %s3929_s18, %s2608_s14  ;;  %p2615_p2 = scmp.lt.u32.totalorder %s2608_s14, %s3929_s18 }
 0x130   : > { %p2611_p1 = pnand %p2609_p5, %p3174_p7 }
 0x132   : > { %p2612_p12 = pneg %p2611_p1 }
 0x134   : > { %p2617_p8 = pnand %p2615_p2, %p2612_p12 }
 0x136   : > { %2620 = shalt.err (!%p2617_p8)
}
 0x137   : > { %s2621_s26 = scalar_lea.vmem %s525_s12, 16  ;;  %s2628_s8 = scalar_lea.vmem %s525_s12, 32 }
 0x138   : > { %p2622_p4 = scmp.ne.s32.totalorder %s525_s12, %s2621_s26  ;;  %p2629_p6 = scmp.lt.s32.totalorder %s525_s12, %s525_s12 }
 0x139   : > { %p2630_p9 = scmp.lt.s32.totalorder %s2628_s8, %s2621_s26 }
 0x13a   : > { %p2624_p10 = pnand %p2622_p4, %p3174_p7 }
 0x13b   : > { %p2631_p3 = por %p2630_p9, %p2629_p6 }
 0x13c   : > { %p2625_p0 = pneg %p2624_p10 }
 0x13e   : > { %p2632_p11 = pnand %p2631_p3, %p2625_p0 }
 0x140   : > { %2635 = shalt.err (!%p2632_p11)
}
 0x141   : > { %2145 = dma.hbm_to_vmem [thread:$0]  (!%p3926_p13), %s3929_s18, 16, %s525_s12, [#allocation16]  }
 0x142   : > { %s2980_s20 = smov [#allocation20]   ;;  %s2981_s21 = smov [#allocation23]  }
 0x143   : > { %s548_s27 = sshll.u32 %s2980_s20, 4  ;;  %s570_s14 = sshll.u32 %s2981_s21, 4  ;;  %s549_s27 = int_to_ptr.vmem [resolvable:$true] %s548_s27  ;;  %s571_s14 = int_to_ptr.vmem [resolvable:$true] %s570_s14 }
 0x144   : > { %s3930_s25 = sld [smem:[#allocation58_spill]] }
 0x14a   : > { %s3931_s3 = smov %s3930_s25  ;;  %s2636_s1 = scalar_lea.hbm %s3930_s25, 16 }
 0x14b   : > { %p2637_p5 = scmp.ne.s32.totalorder %s3931_s3, %s2636_s1  ;;  %p2643_p2 = scmp.lt.u32.totalorder %s2636_s1, %s3931_s3 }
 0x14d   : > { %p2639_p1 = pnand %p2637_p5, %p3174_p7 }
 0x14f   : > { %p2640_p12 = pneg %p2639_p1 }
 0x151   : > { %p2645_p8 = pnand %p2643_p2, %p2640_p12 }
 0x153   : > { %2648 = shalt.err (!%p2645_p8)
}
 0x154   : > { %s2649_s12 = scalar_lea.vmem %s549_s27, 16  ;;  %s2656_s19 = scalar_lea.vmem %s549_s27, 32 }
 0x155   : > { %p2650_p4 = scmp.ne.s32.totalorder %s549_s27, %s2649_s12  ;;  %p2657_p6 = scmp.lt.s32.totalorder %s549_s27, %s549_s27 }
 0x156   : > { %p2658_p9 = scmp.lt.s32.totalorder %s2656_s19, %s2649_s12 }
 0x157   : > { %p2652_p10 = pnand %p2650_p4, %p3174_p7 }
 0x158   : > { %p2659_p3 = por %p2658_p9, %p2657_p6 }
 0x159   : > { %p2653_p0 = pneg %p2652_p10 }
 0x15b   : > { %p2660_p11 = pnand %p2659_p3, %p2653_p0 }
 0x15d   : > { %2663 = shalt.err (!%p2660_p11)
}
 0x15e   : > { %2151 = dma.hbm_to_vmem [thread:$0]  (!%p3926_p13), %s3931_s3, 16, %s549_s27, [#allocation19]  }
 0x15f   : > { %s3932_s2 = sld [smem:[#allocation60_spill]] }
 0x165   : > { %s2664_s24 = scalar_lea.hbm %s3932_s2, 16 }
 0x166   : > { %p2665_p5 = scmp.ne.s32.totalorder %s3932_s2, %s2664_s24  ;;  %p2671_p2 = scmp.lt.u32.totalorder %s2664_s24, %s3932_s2 }
 0x168   : > { %p2667_p1 = pnand %p2665_p5, %p3174_p7 }
 0x16a   : > { %p2668_p12 = pneg %p2667_p1 }
 0x16c   : > { %p2673_p8 = pnand %p2671_p2, %p2668_p12 }
 0x16e   : > { %2676 = shalt.err (!%p2673_p8)
}
 0x16f   : > { %s2677_s12 = scalar_lea.vmem %s571_s14, 16  ;;  %s2684_s27 = scalar_lea.vmem %s571_s14, 32 }
 0x170   : > { %p2678_p4 = scmp.ne.s32.totalorder %s571_s14, %s2677_s12  ;;  %p2685_p6 = scmp.lt.s32.totalorder %s571_s14, %s571_s14 }
 0x171   : > { %p2686_p9 = scmp.lt.s32.totalorder %s2684_s27, %s2677_s12 }
 0x172   : > { %p2680_p10 = pnand %p2678_p4, %p3174_p7 }
 0x173   : > { %p2687_p3 = por %p2686_p9, %p2685_p6 }
 0x174   : > { %p2681_p0 = pneg %p2680_p10 }
 0x176   : > { %p2688_p11 = pnand %p2687_p3, %p2681_p0 }
 0x178   : > { %2691 = shalt.err (!%p2688_p11)
}
 0x179   : > { %2157 = dma.hbm_to_vmem [thread:$0]  (!%p3926_p13), %s3932_s2, 16, %s571_s14, [#allocation22]  }
 0x17a   : > { %s2982_s21 = smov [#allocation26]   ;;  %s3933_s25 = sld [smem:[#allocation61_spill]] }
 0x17b   : > { %s592_s1 = sshll.u32 %s2982_s21, 4  ;;  %s593_s1 = int_to_ptr.vmem [resolvable:$true] %s592_s1 }
 0x180   : > { %s3934_s8 = smov %s3933_s25  ;;  %s2692_s26 = scalar_lea.hbm %s3933_s25, 16 }
 0x181   : > { %p2693_p5 = scmp.ne.s32.totalorder %s3934_s8, %s2692_s26  ;;  %p2699_p2 = scmp.lt.u32.totalorder %s2692_s26, %s3934_s8 }
 0x183   : > { %p2695_p1 = pnand %p2693_p5, %p3174_p7 }
 0x185   : > { %p2696_p12 = pneg %p2695_p1 }
 0x187   : > { %p2701_p8 = pnand %p2699_p2, %p2696_p12 }
 0x189   : > { %2704 = shalt.err (!%p2701_p8)
}
 0x18a   : > { %s2705_s14 = scalar_lea.vmem %s593_s1, 16  ;;  %s2712_s19 = scalar_lea.vmem %s593_s1, 32 }
 0x18b   : > { %p2706_p4 = scmp.ne.s32.totalorder %s593_s1, %s2705_s14  ;;  %p2713_p6 = scmp.lt.s32.totalorder %s593_s1, %s593_s1 }
 0x18c   : > { %p2714_p9 = scmp.lt.s32.totalorder %s2712_s19, %s2705_s14 }
 0x18d   : > { %p2708_p10 = pnand %p2706_p4, %p3174_p7 }
 0x18e   : > { %p2715_p3 = por %p2714_p9, %p2713_p6 }
 0x18f   : > { %p2709_p0 = pneg %p2708_p10 }
 0x191   : > { %p2716_p11 = pnand %p2715_p3, %p2709_p0 }
 0x193   : > { %2719 = shalt.err (!%p2716_p11)
}
 0x194   : > { %s3935_s21 = sld [smem:[#allocation46_spill]]  ;;  %s3936_s4 = sld [smem:[#allocation43_spill]] }
 0x195   : > { %s3937_s24 = sld [smem:[#allocation42_spill]]  ;;  %s3938_s29 = sld [smem:[#allocation41_spill]] }
 0x196   : > { %2163 = dma.hbm_to_vmem [thread:$0]  (!%p3926_p13), %s3934_s8, 16, %s593_s1, [#allocation25]  }
 0x197   : > { %s1884_s25 = sadd.s32 4294967294, %s2966_s0   ;;  %s57_s15 = sadd.s32 1, %s2962_s30 }
 0x198   : > { %p3939_p1 = scmp.eq.s32.totalorder %s2966_s0, 0  ;;  %p411_p8 = scmp.eq.s32.totalorder %s3143_s17, 3 }
 0x199   : > { %p417_p4 = scmp.eq.s32.totalorder %s1884_s25, 3  ;;  %p3941_p10 = scmp.eq.s32.totalorder %s3143_s17, 0 }
 0x19a   : > { %s54_s26 = sadd.s32 1, %s3935_s21  ;;  %s66_s10 = sadd.s32 1, %s3936_s4 }
 0x19b   : > { %p55_p7 = scmp.ge.s32.totalorder %s54_s26, 2  ;;  %p73_p5 = scmp.ne.s32.totalorder %s3936_s4, %s3937_s24 }
 0x19c   : > { %p79_p2 = scmp.ne.s32.totalorder %s3937_s24, %s3938_s29  ;;  %s3513_s24 = sand.u32 1, %s3936_s4  }
 0x19d   : > { %s3989_s26 = smov (%p55_p7, %s54_s26), 0  ;;  %s3991_s15 = smov (!%p55_p7, %s57_s15), %s2962_s30 }
 0x19e   : > { %s62_s12 = ssub.s32 %s3935_s21, %s3989_s26  ;;  %p3487_p12 = por %p3939_p1, %p73_p5 }
 0x19f   : > { %p59_p13 = scmp.ge.s32.totalorder %s3991_s15, 2  ;;  %p3498_p0 = por %p3941_p10, %p79_p2 }
 0x1a0   : > { %p3502_p6 = por %p411_p8, %p73_p5  ;;  %p3508_p9 = por %p417_p4, %p79_p2 }
 0x1a1   : > { %s3993_s15 = smov (%p59_p13, %s3991_s15), 0  ;;  %s3945_s29 = sadd.s32 1, %s2934_s23 }
 0x1a2   : > { %s3942_s27 = scalar_select %p3498_p0, 1, 0 }
 0x1a3   : > { %s3943_s14 = scalar_select %p3502_p6, 1, 0 }
 0x1a4   : > { %s61_s19 = ssub.s32 %s2962_s30, %s3993_s15  ;;  %s1899_s2 = sshll.u32 %s3513_s24, 2 }
 0x1a5   : > { %s3944_s3 = scalar_select %p3508_p9, 1, 0 }
 0x1a6   : > { %s63_s20 = sor.u32 %s62_s12, %s61_s19  ;;  %p90_p3 = scmp.eq.s32.totalorder %s61_s19, 0 }
 0x1a7   : > { %p64_p11 = scmp.eq.s32.totalorder %s63_s20, 0  ;;  %s1900_s5 = sshll.u32 %s2962_s30, 1 }
 0x1a8   : > { %s3518_s25 = scalar_select %p90_p3, %s2934_s23, %s3945_s29  }
 0x1a9   : > { %s3995_s4 = smov (!%p64_p11, %s3936_s4), %s66_s10  ;;  %s3526_s6 = sadd.s32 %s3935_s21, %s1900_s5 }
 0x1aa   : > { %s607_s7 = scalar_lea.vmem [#allocation3], %s1899_s2  ;;  %s1901_s19 = sshll.u32 %s3526_s6, 6 }
 0x1ab   : > { %s616_s12 = sshll.u32 %s607_s7, 4  ;;  %s3946_s9 = sld [smem:[#allocation48_spill]]  ;;  %s3529_s12 = int_to_ptr.vmem [resolvable:$true] %s616_s12 }
 0x1ac   : > { %p3947_p7 = scmp.lt.s32.totalorder %s2966_s0, 4  ;;  %s1907_s7 = sshll.u32 %s3526_s6, 7 }
 0x1ad   : > { %s604_s21 = scalar_lea.sflag [#allocation4], %s3513_s24 }
 0x1ae   : > { %p3540_p5 = pnand %p3947_p7, %p3487_p12 }
 0x1b0   : > { %p2722_p13 = pneg %p3540_p5 }
 0x1b1   : > { %s3534_s11 = scalar_lea.hbm %s3946_s9, %s1901_s19  ;;  %s2725_s29 = scalar_lea.hbm %s3946_s9, 256 }
 0x1b2   : > { %s2720_s10 = scalar_lea.hbm %s3534_s11, 64  ;;  %p2726_p12 = scmp.lt.u32.totalorder %s3534_s11, %s3946_s9 }
 0x1b3   : > { %p2721_p1 = scmp.ne.s32.totalorder %s3534_s11, %s2720_s10  ;;  %p2727_p4 = scmp.lt.u32.totalorder %s2725_s29, %s2720_s10 }
 0x1b4   : > { %p2729_p3 = scmp.lt.u32.totalorder %s2720_s10, %s3534_s11 }
 0x1b5   : > { %p2723_p2 = pnand %p2722_p13, %p2721_p1  ;;  %p2728_p10 = por %p2727_p4, %p2726_p12 }
 0x1b7   : > { %p2724_p8 = pneg %p2723_p2  ;;  %p2730_p11 = por %p2729_p3, %p2728_p10 }
 0x1b9   : > { %p2731_p7 = pnand %p2730_p11, %p2724_p8 }
 0x1bb   : > { %2734 = shalt.err (!%p2731_p7)
}
 0x1bc   : > { %s2735_s2 = scalar_lea.vmem %s3529_s12, 64  ;;  %s2983_s8 = smov [#allocation3]  }
 0x1bd   : > { %p2736_p1 = scmp.ne.s32.totalorder %s3529_s12, %s2735_s2  ;;  %s2740_s1 = sshll.u32 %s2983_s8, 4  ;;  %s2741_s1 = int_to_ptr.vmem [resolvable:$false] %s2740_s1 }
 0x1be   : > { %s2742_s19 = scalar_lea.vmem %s2741_s1, 128  ;;  %p2743_p6 = scmp.lt.s32.totalorder %s3529_s12, %s2741_s1 }
 0x1bf   : > { %p2738_p2 = pnand %p2736_p1, %p2722_p13  ;;  %p2744_p12 = scmp.lt.s32.totalorder %s2742_s19, %s2735_s2 }
 0x1c1   : > { %p2739_p9 = pneg %p2738_p2  ;;  %p2745_p4 = por %p2744_p12, %p2743_p6 }
 0x1c3   : > { %p2746_p10 = pnand %p2745_p4, %p2739_p9 }
 0x1c5   : > { %2749 = shalt.err (!%p2746_p10)
}
 0x1c6   : > { %2167 = dma.hbm_to_vmem [thread:$0]  (!%p3540_p5), %s3534_s11, 64, %s3529_s12, %s604_s21  }
 0x1c7   : > { %s3949_s20 = sld [smem:[#allocation50_spill]]  ;;  %s3950_s9 = sshll.u32 %s3513_s24, 3 }
 0x1c8   : > { %s648_s2 = scalar_lea.vmem [#allocation8], %s3950_s9 }
 0x1c9   : > { %s657_s1 = sshll.u32 %s648_s2, 4  ;;  %s658_s1 = int_to_ptr.vmem [resolvable:$true] %s657_s1 }
 0x1cd   : > { %s3577_s8 = scalar_lea.hbm %s3949_s20, %s1907_s7  ;;  %s2755_s12 = scalar_lea.hbm %s3949_s20, 512 }
 0x1ce   : > { %s2750_s19 = scalar_lea.hbm %s3577_s8, 128  ;;  %p2756_p3 = scmp.lt.u32.totalorder %s3577_s8, %s3949_s20 }
 0x1cf   : > { %p2751_p6 = scmp.ne.s32.totalorder %s3577_s8, %s2750_s19  ;;  %p2757_p11 = scmp.lt.u32.totalorder %s2755_s12, %s2750_s19 }
 0x1d0   : > { %p2759_p1 = scmp.lt.u32.totalorder %s2750_s19, %s3577_s8 }
 0x1d1   : > { %p2753_p9 = pnand %p2751_p6, %p2722_p13  ;;  %p2758_p7 = por %p2757_p11, %p2756_p3 }
 0x1d3   : > { %p2754_p8 = pneg %p2753_p9  ;;  %p2760_p2 = por %p2759_p1, %p2758_p7 }
 0x1d5   : > { %p2761_p12 = pnand %p2760_p2, %p2754_p8 }
 0x1d7   : > { %2764 = shalt.err (!%p2761_p12)
}
 0x1d8   : > { %s2765_s9 = scalar_lea.vmem %s658_s1, 128  ;;  %s2984_s24 = smov [#allocation8]  }
 0x1d9   : > { %p2766_p4 = scmp.ne.s32.totalorder %s658_s1, %s2765_s9  ;;  %s2770_s10 = sshll.u32 %s2984_s24, 4  ;;  %s2771_s10 = int_to_ptr.vmem [resolvable:$false] %s2770_s10 }
 0x1da   : > { %s2772_s29 = scalar_lea.vmem %s2771_s10, 256  ;;  %p2773_p9 = scmp.lt.s32.totalorder %s658_s1, %s2771_s10 }
 0x1db   : > { %p2768_p10 = pnand %p2766_p4, %p2722_p13  ;;  %p2774_p0 = scmp.lt.s32.totalorder %s2772_s29, %s2765_s9 }
 0x1dd   : > { %p2769_p6 = pneg %p2768_p10  ;;  %p2775_p3 = por %p2774_p0, %p2773_p9 }
 0x1df   : > { %p2776_p11 = pnand %p2775_p3, %p2769_p6 }
 0x1e1   : > { %2779 = shalt.err (!%p2776_p11)
}
 0x1e2   : > { %2173 = dma.hbm_to_vmem [thread:$0]  (!%p3540_p5), %s3577_s8, 128, %s658_s1, %s3334_s28  }
 0x1e3   : > { %s3951_s2 = sld [smem:[#allocation47_spill]] }
 0x1e9   : > { %p3952_p8 = scmp.ne.s32.totalorder %s3951_s2, 0 }
 0x1ea   : > { %s3953_s19 = sld [smem:[#allocation42_spill]] (!%p3952_p8)  ;;  %p3954_p0 = scmp.ne.s32.totalorder (!%p3952_p8), %s3942_s27, 0 }
 0x1eb   : > { %666 = sbr.rel (%p3952_p8) target bundleno = 2834 (0xb12), region = 80 }
 0x1f0   : > { %s3604_s6 = sand.u32 (!%p3952_p8), 1, %s3953_s19  }
 0x1f1   : > { %s1909_s11 = sshll.u32 (!%p3952_p8), %s3604_s6, 2  ;;  %s669_s12 = scalar_lea.sflag (!%p3952_p8), [#allocation4], %s3604_s6 }
 0x1f2   : > { %s3608_s7 = scalar_lea.vmem [#allocation3], %s1909_s11 }
 0x1f3   : > { %2881 = dma.done.wait (%p3954_p0), %s669_s12, 64  }
 0x1f4   : > { %2883 = vsyncadd (%p3954_p0), %s669_s12, 4294967232  ;;  %s677_s28 = sand.u32 1, %s3143_s17   ;;  %s679_s5 = sand.u32 1, %s2930_s22  }
 0x1f5   : > { %s1910_s8 = sshll.u32 %s679_s5, 3  ;;  %s678_s1 = scalar_lea.sflag [#allocation7], %s677_s28 }
 0x1f6   : > { %s681_s21 = scalar_lea.vmem [#allocation6], %s1910_s8  ;;  %p3955_p5 = scmp.ne.s32.totalorder %s3922_s16, 0 }
 0x1f8   : > { %2885 = dma.done.wait (%p3955_p5), %s678_s1, 128  }
 0x1f9   : > { %2887 = vsyncadd (%p3955_p5), %s678_s1, 4294967168  ;;  %s1911_s9 = sshll.u32 %s3604_s6, 3 }
 0x1fa   : > { %s3623_s24 = scalar_lea.vmem [#allocation8], %s1911_s9 }
 0x1fb   : > { %2889 = dma.done.wait (%p3954_p0), %s678_s1, 128  }
 0x1fc   : > { %2891 = vsyncadd (%p3954_p0), %s678_s1, 4294967168  ;;  %p3956_p13 = scmp.eq.s32.totalorder %s3143_s17, 0 }
 0x1fe   : > { %2893 = dma.done.wait (%p3956_p13), [#allocation10], 272   ;;  %p3957_p7 = pmov %p3956_p13 }
 0x200   : > { %2895 = vsyncadd (%p3957_p7), [#allocation10], 4294967024  ;;  %p3958_p1 = pmov %p3957_p7 }
 0x202   : > { %2897 = dma.done.wait (%p3958_p1), [#allocation13], 32   ;;  %p3959_p2 = pmov %p3958_p1 }
 0x203   : > { %p3960_p12 = pmov %p3958_p1 }
 0x204   : > { %2899 = vsyncadd (%p3959_p2), [#allocation13], 4294967264 }
 0x205   : > { %2901 = dma.done.wait (%p3960_p12), [#allocation16], 272   ;;  %p3961_p4 = pmov %p3958_p1 }
 0x206   : > { %p3962_p10 = pmov %p3958_p1 }
 0x207   : > { %2903 = vsyncadd (%p3961_p4), [#allocation16], 4294967024 }
 0x208   : > { %2905 = dma.done.wait (%p3962_p10), [#allocation19], 528   ;;  %p3963_p6 = pmov %p3958_p1 }
 0x209   : > { %p3964_p9 = pmov %p3958_p1 }
 0x20a   : > { %2907 = vsyncadd (%p3963_p6), [#allocation19], 4294966768 }
 0x20b   : > { %2909 = dma.done.wait (%p3964_p9), [#allocation22], 32   ;;  %p3965_p3 = pmov %p3958_p1 }
 0x20c   : > { %p3966_p11 = pmov %p3958_p1 }
 0x20d   : > { %2911 = vsyncadd (%p3965_p3), [#allocation22], 4294967264 }
 0x20e   : > { %2913 = dma.done.wait (%p3966_p11), [#allocation25], 32   ;;  %p3967_p8 = pmov %p3958_p1 }
 0x20f   : > { %v2985_v0 = vmov 0.0   ;;  %vm2986_vm0 = vmmov 0   ;;  %vm812_vm1 = vcmask 64512   ;;  %v3659_v1 = vld [vmem:[%s681_s21] sm:$0xff]   ;;  %v803_v2 = vld [vmem:[%s3608_s7] sm:$0xf] }
 0x210   : > { %2915 = vsyncadd (%p3967_p8), [#allocation25], 4294967264  ;;  %1993 = vmatprep.subr.bf16.mxu0 %v2985_v0  ;;  %1995 = vmatprep.mubr.msk.bf16.mxu0 %vm2986_vm0, %v2985_v0  ;;  %s2987_s16 = smov 120   ;;  %v817_v3 = vsel %vm812_vm1, %v3659_v1, 0  ;;  %s2988_s17 = smov 112   ;;  %v1929_v4 = vcombine.low %v803_v2, %v803_v2  ;;  %vm859_vm2 = vcmask 130048  }
 0x211   : > { %2005 = vmatprep.subr.bf16.mxu1 %v2985_v0  ;;  %2007 = vmatprep.mubr.msk.bf16.mxu1 %vm2986_vm0, %v2985_v0  ;;  %s2989_s27 = smov 104   ;;  %s2990_s10 = smov 96   ;;  %vm875_vm3 = vcmask 125952   ;;  %vm1044_vm4 = vcmask 130112   ;;  %vm1163_vm5 = vcmask 195712   ;;  %vm1282_vm6 = vcmask 261312  }
 0x212   : > { %929 = vrot.lane.b32.xlu0 %v3659_v1, %s2987_s16  ;;  %1048 = vrot.lane.b32.xlu1 %v3659_v1, %s2988_s17  ;;  %s2991_s29 = smov 80   ;;  %s2992_s2 = smov 72   ;;  %vm1309_vm7 = vcmask 261120   ;;  %vm1492_vm8 = vcmask 523264  }
 0x213   : > { %1994 = vmatpush3.bf16.xpose.msra.mxu0 %v817_v3  ;;  %s2993_s19 = smov 88   ;;  %s1925_s11 = sshll.u32 %s3604_s6, 4 }
 0x214   : > { %1999 = vmatprep.subr.bf16.mxu0 %v2985_v0  ;;  %s3700_s12 = scalar_lea.vmem [#allocation28], %s1925_s11  ;;  %s2994_s7 = smov 8  }
 0x215   : > { %s2995_s28 = smov 16   ;;  %s2996_s5 = smov 24  }
 0x216   : > { %927 = vrot.lane.b32.xlu0 %v1929_v4, %s2987_s16  ;;  %1046 = vrot.lane.b32.xlu1 %v1929_v4, %s2988_s17  ;;  %s3968_s8 = sld [smem:[#allocation45_spill]]  ;;  %s3969_s1 = sld [smem:[#allocation44_spill]] }
 0x217   : > { %s1573_s11 = scalar_lea.sflag [#allocation29], %s3604_s6  ;;  %p3972_p5 = scmp.ne.s32.totalorder %s3943_s14, 0 }
 0x21a   : > { %1996 = vmatmul.mubr.msk.bf16.vlgmr.msra.gmra.mrb[0].mxu0 %vm812_vm1, %v803_v2  ;;  %1167 = vrot.lane.b32.xlu0 %v3659_v1, %s2989_s27 }
 0x21b   : > { %1165 = vrot.lane.b32.xlu1 %v1929_v4, %s2989_s27  ;;  %2001 = vmatprep.mubr.msk.bf16.mxu0 %vm2986_vm0, %v2985_v0 }
 0x21c   : > { %s1961_s21 = sshll.u32 %s3968_s8, 3 }
 0x21d   : > { %s1599_s16 = sadd.s32 %s3969_s1, %s1961_s21 }
 0x21e   : > { %s1962_s17 = sshll.u32 %s1599_s16, 6 }
 0x284   : > { %v930_v5 = vpop.permute.xlu0 %929  ;;  %v1049_v7 = vpop.permute.xlu1 %1048 }
 0x285   : > { %v935_v6 = vsel %vm812_vm1, %v930_v5, 0  ;;  %v1054_v9 = vsel %vm812_vm1, %v1049_v7, 0 }
 0x286   : > { %2006 = vmatpush3.bf16.xpose.msra.mxu1 %v935_v6 }
 0x287   : > { %2017 = vmatprep.subr.bf16.mxu1 %v2985_v0 }
 0x288   : > { %v928_v8 = vpop.permute.xlu0 %927  ;;  %v1047_v11 = vpop.permute.xlu1 %1046 }
 0x28c   : > { %v1168_v10 = vpop.permute.xlu0 %1167 }
 0x28d   : > { %2008 = vmatmul.mubr.msk.bf16.vlgmr.msra.gmra.mrb[0].mxu1 %vm812_vm1, %v928_v8  ;;  %v1173_v12 = vsel %vm812_vm1, %v1168_v10, 0  ;;  %v1166_v13 = vpop.permute.xlu1 %1165 }
 0x28e   : > { %2018 = vmatpush3.bf16.xpose.msra.mxu1 %v1054_v9  ;;  %2019 = vmatprep.mubr.msk.bf16.mxu1 %vm2986_vm0, %v2985_v0 }
 0x28f   : > { %2029 = vmatprep.subr.bf16.mxu1 %v2985_v0 }
 0x295   : > { %2020 = vmatmul.mubr.msk.bf16.vlgmr.msra.gmra.mrb[4].mxu1 %vm812_vm1, %v1047_v11 }
 0x296   : > { %2030 = vmatpush3.bf16.xpose.msra.mxu1 %v1173_v12  ;;  %2031 = vmatprep.mubr.msk.bf16.mxu1 %vm2986_vm0, %v2985_v0 }
 0x297   : > { %2041 = vmatprep.subr.bf16.mxu1 %v2985_v0 }
 0x29d   : > { %2032 = vmatmul.mubr.msk.bf16.vlgmr.msra.gmra.mrb[8].mxu1 %vm812_vm1, %v1166_v13 }
 0x29e   : > { %2045 = vmatprep.mubr.msk.bf16.mxu1 %vm2986_vm0, %v2985_v0 }
 0x2ed   : > { %v853_v14 = vpop.f32.mrb[0].mxu0 }
 0x2ee   : > { %v860_v15 = vsel %vm859_vm2, %v853_v14, -inf  ;;  %v1997_v16 = vpop.f32.mrb[1].mxu0 }
 0x2ef   : > { %861 = vmax.xlane.f32.xlu0 %v860_v15  ;;  %v856_v17 = vpop.f32.mrb[2].mxu0 }
 0x2f0   : > { %v1998_v18 = vpop.f32.mrb[3].mxu0 }
 0x360   : > { %v971_v19 = vpop.f32.mrb[0].mxu1 }
 0x361   : > { %v2009_v20 = vpop.f32.mrb[1].mxu1  ;;  %v977_v21 = vsel %vm859_vm2, %v971_v19, -inf }
 0x362   : > { %978 = vmax.xlane.f32.xlu1 %v977_v21  ;;  %v974_v22 = vpop.f32.mrb[2].mxu1 }
 0x363   : > { %v2010_v23 = vpop.f32.mrb[3].mxu1 }
 0x368   : > { %v1090_v24 = vpop.f32.mrb[4].mxu1 }
 0x369   : > { %v2021_v25 = vpop.f32.mrb[5].mxu1  ;;  %v1096_v26 = vsel %vm859_vm2, %v1090_v24, -inf }
 0x36a   : > { %v1093_v27 = vpop.f32.mrb[6].mxu1  ;;  %1097 = vmax.xlane.f32.xlu0 %v1096_v26 }
 0x36b   : > { %v2022_v28 = vpop.f32.mrb[7].mxu1 }
 0x370   : > { %v1209_v29 = vpop.f32.mrb[8].mxu1 }
 0x371   : > { %v2033_v30 = vpop.f32.mrb[9].mxu1  ;;  %v1215_v31 = vsel %vm859_vm2, %v1209_v29, -inf }
 0x372   : > { %v1212_v32 = vpop.f32.mrb[10].mxu1  ;;  %1216 = vmax.xlane.f32.xlu0 %v1215_v31  ;;  %v2326_v31 = vld [vmem:[#allocation9] sm:$0xff]  }
 0x373   : > { %v2034_v33 = vpop.f32.mrb[11].mxu1  ;;  %2042 = vmatpush3.bf16.msra.mxu1 %v2326_v31  ;;  %v2327_v32 = vld [vmem:[#allocation9 + $0x8] sm:$0xff]  }
 0x374   : > { %2043 = vmatprep.subr.bf16.mxu1 %v2985_v0 }
 0x377   : > { %2044 = vmatpush3.bf16.msra.mxu1 %v2327_v32 }
 0x378   : > { %2057 = vmatprep.subr.bf16.mxu1 %v2985_v0 }
 0x37c   : > { %v862_v34 = vpop.xlane.xlu0 %861 }
 0x37d   : > { %v863_v35 = vsub.f32 %v853_v14, %v862_v34 }
 0x37f   : > { %v864_v36 = vmul.f32 1.442695, %v863_v35 }
 0x381   : > { %2334 = vpow2.f32 %v864_v36 }
 0x38b   : > { %v2335_v37 = vpop.eup %2334 }
 0x38c   : > { %v866_v38 = vsel %vm859_vm2, %v2335_v37, 0.0 }
 0x38d   : > { %867 = vadd.xlane.f32.xlu1 %v866_v38 }
 0x39e   : > { %877 = vrot.lane.b32.xlu1 %v3659_v1, %s2990_s10 }
 0x3ef   : > { %v979_v39 = vpop.xlane.xlu1 %978 }
 0x3f0   : > { %v980_v40 = vsub.f32 %v971_v19, %v979_v39 }
 0x3f2   : > { %v981_v41 = vmul.f32 1.442695, %v980_v40 }
 0x3f4   : > { %2336 = vpow2.f32 %v981_v41 }
 0x3f7   : > { %v1098_v42 = vpop.xlane.xlu0 %1097 }
 0x3f8   : > { %v1099_v43 = vsub.f32 %v1090_v24, %v1098_v42 }
 0x3fa   : > { %v1100_v44 = vmul.f32 1.442695, %v1099_v43 }
 0x3fc   : > { %2338 = vpow2.f32 %v1100_v44 }
 0x3fe   : > { %v2337_v45 = vpop.eup %2336 }
 0x3ff   : > { %v1217_v46 = vpop.xlane.xlu0 %1216  ;;  %v983_v47 = vsel %vm859_vm2, %v2337_v45, 0.0 }
 0x400   : > { %v1218_v48 = vsub.f32 %v1209_v29, %v1217_v46  ;;  %984 = vadd.xlane.f32.xlu0 %v983_v47  ;;  %v1939_v46 = vld [vmem:[#allocation11] ss:$0 sm:$0xff] }
 0x402   : > { %v1219_v49 = vmul.f32 1.442695, %v1218_v48  ;;  %v806_v48 = vld [vmem:[%s3623_s24] sm:$0xff]  ;;  %s1602_s24 = sshll.u32 %s3700_s12, 4  ;;  %s3744_s24 = int_to_ptr.vmem [resolvable:$true] %s1602_s24 }
 0x404   : > { %2340 = vpow2.f32 %v1219_v49 }
 0x406   : > { %v2339_v50 = vpop.eup %2338 }
 0x407   : > { %v1102_v51 = vsel %vm859_vm2, %v2339_v50, 0.0 }
 0x408   : > { %1103 = vadd.xlane.f32.xlu1 %v1102_v51 }
 0x40e   : > { %v2341_v52 = vpop.eup %2340 }
 0x40f   : > { %v1221_v53 = vsel %vm859_vm2, %v2341_v52, 0.0 }
 0x410   : > { %1222 = vadd.xlane.f32.xlu0 %v1221_v53 }
 0x419   : > { %1113 = vrot.lane.b32.xlu1 %v3659_v1, %s2991_s29  ;;  %s3970_s29 = sld [smem:[#allocation63_spill]] }
 0x41a   : > { %v868_v54 = vpop.xlane.xlu1 %867 }
 0x41b   : > { %2342 = vrcp.f32 %v868_v54 }
 0x41d   : > { %1232 = vrot.lane.b32.xlu1 %v3659_v1, %s2992_s2 }
 0x41e   : > { %v878_v55 = vpop.permute.xlu1 %877 }
 0x41f   : > { %2000 = vmatpush3.bf16.msra.mxu0 %v878_v55  ;;  %s3971_s2 = smov %s3970_s29 }
 0x420   : > { %2011 = vmatprep.subr.bf16.mxu0 %v2985_v0 }
 0x425   : > { %v2343_v56 = vpop.eup %2342 }
 0x426   : > { %v870_v57 = vmul.f32 %v2343_v56, %v868_v54  ;;  %994 = vrot.lane.b32.xlu0 %v3659_v1, %s2993_s19  ;;  %s3749_s19 = scalar_lea.hbm %s3970_s29, %s1962_s17 }
 0x428   : > { %v871_v58 = vsub.f32 2.0, %v870_v57 }
 0x42a   : > { %v872_v59 = vmul.f32 %v2343_v56, %v871_v58 }
 0x42c   : > { %v873_v60 = vmul.f32 %v2335_v37, %v872_v59 }
 0x42e   : > { %v874_v61 = vpack.c.bf16 %v873_v60, %v873_v60  ;;  %v2328_v60 = vld [vmem:[#allocation15] sm:$0xff]  }
 0x430   : > { %876 = vst.msk [vmem:[%s3700_s12] sm:$0xf] %vm875_vm3, %v874_v61  ;;  %2002 = vmatmul.mubr.msk.bf16.vlgmr.msra.gmra.mrb[4].mxu0 %vm859_vm2, %v874_v61  ;;  %v2329_v61 = vld [vmem:[#allocation15 + $0x8] sm:$0xff]  }
 0x431   : > { %2013 = vmatprep.mubr.msk.bf16.mxu0 %vm2986_vm0, %v2985_v0 }
 0x48d   : > { %v985_v62 = vpop.xlane.xlu0 %984 }
 0x48e   : > { %2344 = vrcp.f32 %v985_v62 }
 0x495   : > { %v1104_v63 = vpop.xlane.xlu1 %1103 }
 0x496   : > { %2346 = vrcp.f32 %v1104_v63 }
 0x498   : > { %v2345_v1 = vpop.eup %2344 }
 0x499   : > { %v987_v2 = vmul.f32 %v2345_v1, %v985_v62  ;;  %v1114_v12 = vpop.permute.xlu1 %1113  ;;  %v2330_v62 = vld [vmem:[#allocation18] sm:$0xff]  }
 0x49b   : > { %v988_v3 = vsub.f32 2.0, %v987_v2 }
 0x49d   : > { %v989_v4 = vmul.f32 %v2345_v1, %v988_v3  ;;  %v1223_v5 = vpop.xlane.xlu0 %1222  ;;  %v1233_v19 = vpop.permute.xlu1 %1232 }
 0x49e   : > { %2348 = vrcp.f32 %v1223_v5 }
 0x49f   : > { %v990_v6 = vmul.f32 %v2337_v45, %v989_v4 }
 0x4a0   : > { %v2347_v7 = vpop.eup %2346 }
 0x4a1   : > { %v991_v8 = vpack.c.bf16 %v990_v6, %v990_v6  ;;  %v1106_v9 = vmul.f32 %v2347_v7, %v1104_v63  ;;  %v995_v10 = vpop.permute.xlu0 %994  ;;  %v2331_v63 = vld [vmem:[#allocation18 + $0x8] sm:$0xff]  }
 0x4a2   : > { %2012 = vmatpush3.bf16.msra.mxu0 %v995_v10 }
 0x4a3   : > { %1931 = vst.msk [vmem:[%s3700_s12 + $0x4] sm:$0xf] %vm875_vm3, %v991_v8  ;;  %v1107_v11 = vsub.f32 2.0, %v1106_v9  ;;  %2023 = vmatprep.subr.bf16.mxu0 %v2985_v0 }
 0x4a5   : > { %v1108_v13 = vmul.f32 %v2347_v7, %v1107_v11  ;;  %2014 = vmatmul.mubr.msk.bf16.vlgmr.msra.gmra.mrb[8].mxu0 %vm859_vm2, %v991_v8  ;;  %v1944_v7 = vld [vmem:[#allocation14] ss:$0 sm:$0xff]  ;;  %v2332_v11 = vld [vmem:[#allocation18 + $0x10] sm:$0xff]  }
 0x4a6   : > { %2024 = vmatpush3.bf16.msra.mxu0 %v1114_v12  ;;  %2025 = vmatprep.mubr.msk.bf16.mxu0 %vm2986_vm0, %v2985_v0  ;;  %v2333_v12 = vld [vmem:[#allocation18 + $0x18] sm:$0xff]  }
 0x4a7   : > { %v1109_v14 = vmul.f32 %v2339_v50, %v1108_v13  ;;  %2035 = vmatprep.subr.bf16.mxu0 %v2985_v0  ;;  %v1945_v13 = vld [vmem:[#allocation17] ss:$0 sm:$0xff] }
 0x4a8   : > { %v2349_v15 = vpop.eup %2348 }
 0x4a9   : > { %v1110_v16 = vpack.c.bf16 %v1109_v14, %v1109_v14  ;;  %v1225_v17 = vmul.f32 %v2349_v15, %v1223_v5  ;;  %v1943_v5 = vld [vmem:[#allocation12] ss:$0 sm:$0xff] }
 0x4ab   : > { %1934 = vst.msk [vmem:[%s3700_s12 + $0x8] sm:$0xf] %vm875_vm3, %v1110_v16  ;;  %v1226_v18 = vsub.f32 2.0, %v1225_v17 }
 0x4ad   : > { %v1227_v20 = vmul.f32 %v2349_v15, %v1226_v18  ;;  %2026 = vmatmul.mubr.msk.bf16.vlgmr.msra.gmra.mrb[12].mxu0 %vm859_vm2, %v1110_v16 }
 0x4ae   : > { %2036 = vmatpush3.bf16.msra.mxu0 %v1233_v19  ;;  %2037 = vmatprep.mubr.msk.bf16.mxu0 %vm2986_vm0, %v2985_v0 }
 0x4af   : > { %v1228_v21 = vmul.f32 %v2341_v52, %v1227_v20  ;;  %2049 = vmatprep.subr.bf16.mxu0 %v2985_v0 }
 0x4b1   : > { %v1229_v22 = vpack.c.bf16 %v1228_v21, %v1228_v21  ;;  %v1949_v21 = vld [vmem:[#allocation20] ss:$0 sm:$0xff] }
 0x4b3   : > { %1937 = vst.msk [vmem:[%s3700_s12 + $0xc] sm:$0xf] %vm875_vm3, %v1229_v22 }
 0x4b5   : > { %2038 = vmatmul.mubr.msk.bf16.vlgmr.msra.gmra.mrb[16].mxu0 %vm859_vm2, %v1229_v22 }
 0x4b6   : > { %2053 = vmatprep.mubr.msk.bf16.mxu0 %vm2986_vm0, %v2985_v0  ;;  %2050 = vmatpush3.bf16.msra.mxu0 %v2328_v60 }
 0x4b7   : > { %2051 = vmatprep.subr.bf16.mxu0 %v2985_v0 }
 0x4ba   : > { %2052 = vmatpush3.bf16.msra.mxu0 %v2329_v61 }
 0x503   : > { %v917_v23 = vpop.f32.mrb[4].mxu0 }
 0x504   : > { %923 = vst.msk [vmem:[#allocation2] sm:$0xff] %vm812_vm1, %v917_v23  ;;  %v2003_v24 = vpop.f32.mrb[5].mxu0 }
 0x505   : > { %v920_v25 = vpop.f32.mrb[6].mxu0 }
 0x506   : > { %v2004_v26 = vpop.f32.mrb[7].mxu0 }
 0x578   : > { %v1034_v27 = vpop.f32.mrb[8].mxu0 }
 0x579   : > { %1041 = vrot.lane.b32.xlu0 %v1034_v27, %s2994_s7  ;;  %v2015_v28 = vpop.f32.mrb[9].mxu0  ;;  %s2780_s7 = scalar_lea.vmem %s3744_s24, 256 }
 0x57a   : > { %v1037_v29 = vpop.f32.mrb[10].mxu0  ;;  %p2781_p0 = scmp.ne.s32.totalorder %s3744_s24, %s2780_s7 }
 0x57b   : > { %v2016_v30 = vpop.f32.mrb[11].mxu0 }
 0x57c   : > { %p2782_p13 = pnand %p2781_p0, %p3972_p5 }
 0x57e   : > { %p2783_p7 = pneg %p2782_p13 }
 0x580   : > { %v1153_v33 = vpop.f32.mrb[12].mxu0 }
 0x581   : > { %1160 = vrot.lane.b32.xlu1 %v1153_v33, %s2995_s28  ;;  %v2027_v34 = vpop.f32.mrb[13].mxu0  ;;  %s2997_s28 = smov [#allocation28]  }
 0x582   : > { %v1156_v35 = vpop.f32.mrb[14].mxu0  ;;  %s2784_s12 = sshll.u32 %s2997_s28, 4  ;;  %s2785_s12 = int_to_ptr.vmem [resolvable:$false] %s2784_s12 }
 0x583   : > { %v2028_v36 = vpop.f32.mrb[15].mxu0  ;;  %p2787_p1 = scmp.lt.s32.totalorder %s3744_s24, %s2785_s12 }
 0x588   : > { %v1272_v37 = vpop.f32.mrb[16].mxu0 }
 0x589   : > { %1279 = vrot.lane.b32.xlu0 %v1272_v37, %s2996_s5  ;;  %v2039_v38 = vpop.f32.mrb[17].mxu0  ;;  %s2786_s5 = scalar_lea.vmem %s2785_s12, 512 }
 0x58a   : > { %v1275_v39 = vpop.f32.mrb[18].mxu0  ;;  %p2788_p2 = scmp.lt.s32.totalorder %s2786_s5, %s2780_s7 }
 0x58b   : > { %v2040_v40 = vpop.f32.mrb[19].mxu0 }
 0x58c   : > { %p2789_p12 = por %p2788_p2, %p2787_p1 }
 0x58e   : > { %p2790_p4 = pnand %p2789_p12, %p2783_p7 }
 0x5eb   : > { %v1042_v41 = vpop.permute.xlu0 %1041 }
 0x5ec   : > { %1045 = vst.msk [vmem:[#allocation2] sm:$0xff] %vm1044_vm4, %v1042_v41 }
 0x5f3   : > { %v1161_v42 = vpop.permute.xlu1 %1160 }
 0x5f4   : > { %1164 = vst.msk [vmem:[#allocation2] sm:$0xff] %vm1163_vm5, %v1161_v42 }
 0x5fb   : > { %v1280_v43 = vpop.permute.xlu0 %1279 }
 0x5fc   : > { %1283 = vst.msk [vmem:[#allocation2] sm:$0xff] %vm1282_vm6, %v1280_v43 }
 0x603   : > { %v1284_v44 = vld [vmem:[#allocation2] sm:$0xff] }
 0x604   : > { %v1285_v45 = vpack.c.bf16 %v1284_v44, %v1284_v44 }
 0x606   : > { %2046 = vmatmul.mubr.msk.bf16.vlgmr.msra.gmra.mrb[12].mxu1 %vm1309_vm7, %v1285_v45 }
 0x607   : > { %2065 = vmatprep.mubr.msk.bf16.mxu1 %vm2986_vm0, %v2985_v0  ;;  %2058 = vmatpush3.bf16.msra.mxu1 %v2330_v62 }
 0x608   : > { %2059 = vmatprep.subr.bf16.mxu1 %v2985_v0 }
 0x60b   : > { %2060 = vmatpush3.bf16.msra.mxu1 %v2331_v63 }
 0x60c   : > { %2061 = vmatprep.subr.bf16.mxu1 %v2985_v0 }
 0x60f   : > { %2062 = vmatpush3.bf16.msra.mxu1 %v2332_v11 }
 0x610   : > { %2063 = vmatprep.subr.bf16.mxu1 %v2985_v0 }
 0x613   : > { %2064 = vmatpush3.bf16.msra.mxu1 %v2333_v12 }
 0x6d9   : > { %v1347_v47 = vpop.f32.mrb[12].mxu1 }
 0x6da   : > { %v1348_v49 = vadd.f32 %v1939_v46, %v1347_v47  ;;  %v2047_v50 = vpop.f32.mrb[13].mxu1 }
 0x6db   : > { %v1350_v51 = vpop.f32.mrb[14].mxu1 }
 0x6dc   : > { %v2048_v52 = vpop.f32.mrb[15].mxu1  ;;  %v1353_v53 = vadd.f32 %v1348_v49, %v806_v48 }
 0x6de   : > { %v1354_v54 = vsel %vm1309_vm7, %v1353_v53, 0.0 }
 0x6df   : > { %1355 = vadd.xlane.f32.xlu1 %v1354_v54 }
 0x76c   : > { %v1356_v55 = vpop.xlane.xlu1 %1355 }
 0x76d   : > { %v1358_v56 = vmul.f32 0.03125, %v1356_v55 }
 0x76f   : > { %v1359_v57 = vsub.f32 %v1353_v53, %v1358_v56 }
 0x771   : > { %v1360_v58 = vmul.f32 %v1359_v57, %v1359_v57 }
 0x773   : > { %v1361_v59 = vsel %vm1309_vm7, %v1360_v58, 0.0 }
 0x774   : > { %1362 = vadd.xlane.f32.xlu0 %v1361_v59 }
 0x801   : > { %v1363_v1 = vpop.xlane.xlu0 %1362 }
 0x802   : > { %v1364_v2 = vmul.f32 0.03125, %v1363_v1 }
 0x804   : > { %v1365_v3 = vadd.f32 1e-05, %v1364_v2 }
 0x806   : > { %2350 = vrsqrt.f32 %v1365_v3 }
 0x810   : > { %v2351_v4 = vpop.eup %2350 }
 0x811   : > { %v1367_v6 = vmul.f32 %v2351_v4, %v1359_v57 }
 0x813   : > { %v1375_v8 = vmul.f32 %v1943_v5, %v1367_v6 }
 0x815   : > { %v1383_v9 = vadd.f32 %v1944_v7, %v1375_v8 }
 0x817   : > { %v1384_v10 = vpack.c.bf16 %v1383_v9, %v1383_v9 }
 0x819   : > { %2054 = vmatmul.mubr.msk.bf16.vlgmr.msra.gmra.mrb[20].mxu0 %vm1309_vm7, %v1384_v10 }
 0x8ec   : > { %v1445_v14 = vpop.f32.mrb[20].mxu0 }
 0x8ed   : > { %v1446_v15 = vadd.f32 %v1945_v13, %v1445_v14  ;;  %v2055_v16 = vpop.f32.mrb[21].mxu0 }
 0x8ee   : > { %v1448_v17 = vpop.f32.mrb[22].mxu0 }
 0x8ef   : > { %v1451_v18 = vmax.f32 %v1446_v15, 0.0  ;;  %v2056_v19 = vpop.f32.mrb[23].mxu0 }
 0x8f1   : > { %v1452_v20 = vpack.c.bf16 %v1451_v18, %v1451_v18 }
 0x8f3   : > { %2066 = vmatmul.mubr.msk.bf16.vlgmr.msra.gmra.mrb[16].mxu1 %vm1492_vm8, %v1452_v20 }
 0x9c6   : > { %v1530_v22 = vpop.f32.mrb[16].mxu1 }
 0x9c7   : > { %v1531_v23 = vadd.f32 %v1949_v21, %v1530_v22  ;;  %v2067_v24 = vpop.f32.mrb[17].mxu1 }
 0x9c8   : > { %v1533_v0 = vpop.f32.mrb[18].mxu1 }
 0x9c9   : > { %v2068_v25 = vpop.f32.mrb[19].mxu1  ;;  %v1536_v26 = vadd.f32 %v1531_v23, %v1383_v9 }
 0x9cb   : > { %v1537_v27 = vsel %vm1309_vm7, %v1536_v26, 0.0 }
 0x9cc   : > { %1538 = vadd.xlane.f32.xlu0 %v1537_v27 }
 0xa59   : > { %v1539_v28 = vpop.xlane.xlu0 %1538 }
 0xa5a   : > { %v1540_v29 = vmul.f32 0.03125, %v1539_v28 }
 0xa5c   : > { %v1541_v30 = vsub.f32 %v1536_v26, %v1540_v29 }
 0xa5e   : > { %v1542_v31 = vmul.f32 %v1541_v30, %v1541_v30 }
 0xa60   : > { %v1543_v32 = vsel %vm1309_vm7, %v1542_v31, 0.0 }
 0xa61   : > { %1544 = vadd.xlane.f32.xlu1 %v1543_v32 }
 0xa62   : > { %2793 = shalt.err (!%p2790_p4)
}
 0xa63   : > { %s2794_s21 = scalar_lea.hbm %s3749_s19, 256  ;;  %s2798_s27 = scalar_lea.hbm %s3971_s2, 1024 }
 0xa64   : > { %p2795_p10 = scmp.ne.s32.totalorder %s3749_s19, %s2794_s21  ;;  %p2799_p3 = scmp.lt.u32.totalorder %s3749_s19, %s3971_s2 }
 0xa65   : > { %p2800_p11 = scmp.lt.u32.totalorder %s2798_s27, %s2794_s21  ;;  %p2802_p0 = scmp.lt.u32.totalorder %s2794_s21, %s3749_s19 }
 0xa66   : > { %p2796_p6 = pnand %p2795_p10, %p3972_p5 }
 0xa67   : > { %p2801_p8 = por %p2800_p11, %p2799_p3 }
 0xa68   : > { %p2797_p9 = pneg %p2796_p6 }
 0xa69   : > { %p2803_p13 = por %p2802_p0, %p2801_p8 }
 0xa6b   : > { %p2804_p7 = pnand %p2803_p13, %p2797_p9 }
 0xa6d   : > { %2807 = shalt.err (!%p2804_p7)
}
 0xa6e   : > { %s2998_s7 = smov 64   ;;  %s2999_s28 = smov 128   ;;  %v1955_v37 = vld [vmem:[#allocation21] ss:$0 sm:$0xff]  ;;  %v1956_v39 = vld [vmem:[#allocation23] ss:$0 sm:$0xff] }
 0xa6f   : > { %s3000_s12 = smov 4   ;;  %s1959_s5 = sshll.u32 %s3968_s8, 1 }
 0xa70   : > { %2124 = dma.vmem_to_hbm [thread:$0]  (%p3972_p5), %s3744_s24, 256, %s3749_s19, %s1573_s11, %s2998_s7, %s2999_s28, %s3000_s12  }
 0xa71   : > { %s1584_s21 = sadd.s32 %s3969_s1, %s1959_s5  ;;  %s794_s17 = scalar_lea.vmem [#allocation27], %s1911_s9 }
 0xa72   : > { %s1960_s16 = sshll.u32 %s1584_s21, 7  ;;  %s1588_s27 = sshll.u32 %s794_s17, 4  ;;  %s3784_s27 = int_to_ptr.vmem [resolvable:$true] %s1588_s27 }
 0xa73   : > { %s3973_s19 = sld [smem:[#allocation62_spill]]  ;;  %s1568_s8 = scalar_lea.sflag [#allocation5], %s3604_s6 }
 0xa74   : > { %s2808_s1 = scalar_lea.vmem %s3784_s27, 128  ;;  %s3001_s9 = smov [#allocation27]  }
 0xa75   : > { %p2809_p1 = scmp.ne.s32.totalorder %s3784_s27, %s2808_s1  ;;  %s2812_s29 = sshll.u32 %s3001_s9, 4  ;;  %s2813_s29 = int_to_ptr.vmem [resolvable:$false] %s2812_s29 }
 0xa76   : > { %s2814_s7 = scalar_lea.vmem %s2813_s29, 256  ;;  %p2815_p4 = scmp.lt.s32.totalorder %s3784_s27, %s2813_s29 }
 0xa77   : > { %p2810_p2 = pnand %p2809_p1, %p3972_p5  ;;  %p2816_p10 = scmp.lt.s32.totalorder %s2814_s7, %s2808_s1 }
 0xa79   : > { %s3782_s11 = scalar_lea.hbm %s3973_s19, %s1960_s16  ;;  %p2811_p12 = pneg %p2810_p2 }
 0xa7a   : > { %p2817_p6 = por %p2816_p10, %p2815_p4 }
 0xa7c   : > { %p2818_p9 = pnand %p2817_p6, %p2811_p12 }
 0xaee   : > { %v1545_v33 = vpop.xlane.xlu1 %1544 }
 0xaef   : > { %v1546_v34 = vmul.f32 0.03125, %v1545_v33 }
 0xaf1   : > { %v1547_v35 = vadd.f32 1e-05, %v1546_v34 }
 0xaf3   : > { %2352 = vrsqrt.f32 %v1547_v35 }
 0xafd   : > { %v2353_v36 = vpop.eup %2352 }
 0xafe   : > { %v1549_v38 = vmul.f32 %v2353_v36, %v1541_v30 }
 0xb00   : > { %v1557_v40 = vmul.f32 %v1955_v37, %v1549_v38 }
 0xb02   : > { %v1565_v41 = vadd.f32 %v1956_v39, %v1557_v40 }
 0xb04   : > { %1566 = vst.msk [vmem:[%s794_s17] sm:$0xff] %vm1309_vm7, %v1565_v41 }
 0xb05   : > { %2821 = shalt.err (!%p2818_p9)
}
 0xb06   : > { %s2822_s6 = scalar_lea.hbm %s3782_s11, 128  ;;  %s2826_s5 = scalar_lea.hbm %s3973_s19, 512 }
 0xb07   : > { %p2823_p3 = scmp.ne.s32.totalorder %s3782_s11, %s2822_s6  ;;  %p2827_p0 = scmp.lt.u32.totalorder %s3782_s11, %s3973_s19 }
 0xb08   : > { %p2828_p13 = scmp.lt.u32.totalorder %s2826_s5, %s2822_s6  ;;  %p2830_p1 = scmp.lt.u32.totalorder %s2822_s6, %s3782_s11 }
 0xb09   : > { %p2824_p11 = pnand %p2823_p3, %p3972_p5 }
 0xb0a   : > { %p2829_p7 = por %p2828_p13, %p2827_p0 }
 0xb0b   : > { %p2825_p8 = pneg %p2824_p11 }
 0xb0c   : > { %p2831_p2 = por %p2830_p1, %p2829_p7 }
 0xb0e   : > { %p2832_p12 = pnand %p2831_p2, %p2825_p8 }
 0xb10   : > { %2835 = shalt.err (!%p2832_p12)
}
 0xb11   : > { %2123 = dma.vmem_to_hbm [thread:$0]  (%p3972_p5), %s3784_s27, 128, %s3782_s11, %s1568_s8  }
 0xb12 PF: > { %s3974_s17 = sld [smem:[#allocation41_spill]]  ;;  %p2206_p4 = scmp.ge.s32.totalorder %s2966_s0, 2 }
 0xb13   : > { %p3975_p10 = scmp.ne.s32.totalorder %s3944_s3, 0 }
 0xb15   : > { %p2175_p6 = pnand %p2206_p4, %p3975_p10 }
 0xb18   : > { %s1617_s10 = sand.u32 1, %s3974_s17  }
 0xb19   : > { %s1618_s24 = scalar_lea.sflag [#allocation5], %s1617_s10 }
 0xb1a   : > { %2917 = dma.done.wait (!%p2175_p6), %s1618_s24, 128  }
 0xb1b   : > { %2919 = vsyncadd (!%p2175_p6), %s1618_s24, 4294967168  ;;  %s1627_s1 = scalar_lea.sflag [#allocation29], %s1617_s10 }
 0xb1c   : > { %2921 = dma.done.wait (!%p2175_p6), %s1627_s1, 256  }
 0xb1d   : > { %2923 = vsyncadd (!%p2175_p6), %s1627_s1, 4294967040  ;;  %s45_s0 = sadd.s32 1, %s2966_s0   ;;  %s3976_s24 = sld [smem:[#allocation42_spill]] }
 0xb1e   : > { %p42_p9 = scmp.ge.s32.totalorder %s45_s0, 6   ;;  %s3977_s14 = sld [smem:[#allocation43_spill]] }
 0xb1f   : > { %s3978_s27 = sld [smem:[#allocation46_spill]]  ;;  %s3979_s11 = smov %s3989_s26 }
 0xb20   : > { %s3980_s21 = smov %s2930_s22  ;;  %s3981_s22 = smov %s2934_s23 }
 0xb21   : > { %s3982_s23 = smov %s3518_s25  ;;  %s3984_s26 = smov %s3995_s4 }
 0xb22   : > { %s3985_s28 = smov %s2962_s30  ;;  %s3986_s29 = smov %s3979_s11 }
 0xb23   : > { %s3987_s30 = smov %s3993_s15  ;;  %44 = sbr.rel (!%p42_p9) target bundleno = 36 (0x24), region = 217 }
 0xb24   : > { %s3983_s25 = smov %s3977_s14 }
 0xb2a   :  { %1632 = vsyncpa [#allocation4], 1 }
 0xb2b   :  { %1634 = vsyncpa [#allocation4 + $0x1], 1 }
 0xb2c   :  { %1635 = vsyncpa [#allocation7], 1 }
 0xb2d   :  { %1637 = vsyncpa [#allocation7 + $0x1], 1 }
 0xb2e   :  { %1638 = vsyncpa [#allocation10], 1 }
 0xb2f   :  { %1639 = vsyncpa [#allocation13], 1 }
 0xb30   :  { %1640 = vsyncpa [#allocation16], 1 }
 0xb31   :  { %1641 = vsyncpa [#allocation19], 1 }
 0xb32   :  { %1642 = vsyncpa [#allocation22], 1 }
 0xb33   :  { %1643 = vsyncpa [#allocation25], 1 }
 0xb34   :  { %1644 = vsyncpa [#allocation5], 1 }
 0xb35   :  { %1646 = vsyncpa [#allocation5 + $0x1], 1 }
 0xb36   :  { %1647 = vsyncpa [#allocation29], 1 }
 0xb37   :  { %1649 = vsyncpa [#allocation29 + $0x1], 1 }

// kernel: encoder_forward.7
= control target key start
LH: loop header
LB: loop body
LE: loop exit
PB: predicated region body
PF: predicated region fallthrough
CT: control target
= control target key end

     0   :  { %s3881_s0 = inlined_call_operand.hbm [shape: bf16[2,16,32], index: 0, kind: input, shape index: {}]   ;;  %s3882_s1 = inlined_call_operand.hbm [shape: bf16[2,16,64], index: 1, kind: input, shape index: {}]   ;;  %s3883_s2 = inlined_call_operand.hbm [shape: f32[2,16,32], index: 2, kind: input, shape index: {}]   ;;  %s3884_s3 = inlined_call_operand.hbm [shape: bf16[32,32], index: 3, kind: input, shape index: {}]   ;;  %s3885_s4 = inlined_call_operand.hbm [shape: f32[1,32], index: 4, kind: input, shape index: {}]   ;;  %s3886_s5 = inlined_call_operand.hbm [shape: f32[1,32], index: 5, kind: input, shape index: {}]   ;;  %s3887_s6 = inlined_call_operand.hbm [shape: f32[1,32], index: 6, kind: input, shape index: {}]   ;;  %s3888_s7 = inlined_call_operand.hbm [shape: bf16[32,64], index: 7, kind: input, shape index: {}]   ;;  %s3889_s8 = inlined_call_operand.hbm [shape: f32[1,64], index: 8, kind: input, shape index: {}]   ;;  %s3890_s9 = inlined_call_operand.hbm [shape: bf16[64,32], index: 9, kind: input, shape index: {}]   ;;  %s3891_s10 = inlined_call_operand.hbm [shape: f32[1,32], index: 10, kind: input, shape index: {}]   ;;  %s3892_s11 = inlined_call_operand.hbm [shape: f32[1,32], index: 11, kind: input, shape index: {}]   ;;  %s3893_s12 = inlined_call_operand.hbm [shape: f32[1,32], index: 12, kind: input, shape index: {}]   ;;  %s3894_s13 = inlined_call_operand.hbm [shape: f32[1,32], index: 13, kind: input, shape index: {}]   ;;  %s3895_s14 = inlined_call_operand.hbm [shape: f32[1,32], index: 14, kind: input, shape index: {}]   ;;  %s3896_s15 = inlined_call_operand.hbm [shape: f32[2,16,32], index: 15, kind: output, shape index: {0}]   ;;  %s3897_s16 = inlined_call_operand.hbm [shape: bf16[2,4,16,16], index: 16, kind: output, shape index: {1}]  }
   0x1   :  { %3925 = sst [smem:[#allocation48_spill]] %s3881_s0 }
   0x2   :  { %3926 = sst [smem:[#allocation49_spill]] %s3882_s1 }
   0x3   :  { %3927 = sst [smem:[#allocation50_spill]] %s3883_s2 }
   0x4   :  { %3928 = sst [smem:[#allocation51_spill]] %s3884_s3 }
   0x5   :  { %3929 = sst [smem:[#allocation52_spill]] %s3885_s4 }
   0x6   :  { %3930 = sst [smem:[#allocation53_spill]] %s3886_s5 }
   0x7   :  { %3931 = sst [smem:[#allocation54_spill]] %s3887_s6 }
   0x8   :  { %3932 = sst [smem:[#allocation55_spill]] %s3888_s7 }
   0x9   :  { %3933 = sst [smem:[#allocation56_spill]] %s3889_s8 }
   0xa   :  { %3934 = sst [smem:[#allocation57_spill]] %s3890_s9 }
   0xb   :  { %3935 = sst [smem:[#allocation58_spill]] %s3891_s10 }
   0xc   :  { %3936 = sst [smem:[#allocation59_spill]] %s3892_s11 }
   0xd   :  { %3937 = sst [smem:[#allocation60_spill]] %s3893_s12 }
   0xe   :  { %3938 = sst [smem:[#allocation61_spill]] %s3895_s14 }
   0xf   :  { %3939 = sst [smem:[#allocation62_spill]] %s3896_s15 }
  0x10   :  { %3940 = sst [smem:[#allocation63_spill]] %s3897_s16 }
  0x11   :  { %22 = vsyncpa [#allocation4], 0 }
  0x12   :  { %24 = vsyncpa [#allocation4 + $0x1], 0 }
  0x13   :  { %25 = vsyncpa [#allocation7], 0 }
  0x14   :  { %27 = vsyncpa [#allocation7 + $0x1], 0 }
  0x15   :  { %28 = vsyncpa [#allocation10], 0 }
  0x16   :  { %29 = vsyncpa [#allocation13], 0 }
  0x17   :  { %30 = vsyncpa [#allocation16], 0 }
  0x18   :  { %31 = vsyncpa [#allocation19], 0 }
  0x19   :  { %32 = vsyncpa [#allocation22], 0 }
  0x1a   :  { %33 = vsyncpa [#allocation25], 0 }
  0x1b   :  { %34 = vsyncpa [#allocation5], 0 }
  0x1c   :  { %36 = vsyncpa [#allocation5 + $0x1], 0 }
  0x1d   :  { %37 = vsyncpa [#allocation29], 0 }
  0x1e   :  { %39 = vsyncpa [#allocation29 + $0x1], 0  ;;  %s3120_s21 = smov 0   ;;  %s3122_s22 = smov 0  }
  0x1f   :  { %s3124_s23 = smov 0   ;;  %s3126_s24 = smov 0  }
  0x20   :  { %s3128_s25 = smov 0   ;;  %s3130_s26 = smov 0  }
  0x21   :  { %s3132_s27 = smov 0   ;;  %s3134_s28 = smov 0  }
  0x22   :  { %s3136_s29 = smov 0   ;;  %s3138_s30 = smov 0  }
  0x23   :  { %s3140_s0 = smov 0  }
  0x24 LB: > { %3941 = sst [smem:[#allocation41_spill]] %s2971_s24  ;;  %s3176_s17 = sadd.s32 4294967295, %s2999_s0   ;;  %s2999_s0 = sphi %s3140_s0, %s45_s0   ;;  %s2995_s30 = sphi %s3138_s30, %s4022_s30   ;;  %s2991_s29 = sphi %s3136_s29, %s4021_s29   ;;  %s2987_s28 = sphi %s3134_s28, %s4020_s28   ;;  %s2983_s27 = sphi %s3132_s27, %s4013_s27   ;;  %s2979_s26 = sphi %s3130_s26, %s4019_s26   ;;  %s2975_s25 = sphi %s3128_s25, %s4018_s25   ;;  %s2971_s24 = sphi %s3126_s24, %s4011_s24   ;;  %s2967_s23 = sphi %s3124_s23, %s4017_s23   ;;  %s2963_s22 = sphi %s3122_s22, %s4016_s22   ;;  %s2959_s21 = sphi %s3120_s21, %s4015_s21  }
  0x25   : > { %3942 = sst [smem:[#allocation42_spill]] %s2975_s25  ;;  %p1914_p0 = scmp.ge.s32.totalorder %s2999_s0, 1 }
  0x26   : > { %3943 = sst [smem:[#allocation43_spill]] %s2979_s26  ;;  %p3912_p1 = scmp.eq.s32.totalorder %s3176_s17, 0 }
  0x27   : > { %3944 = sst [smem:[#allocation44_spill]] %s2983_s27  ;;  %p452_p2 = scmp.lt.s32.totalorder %s2999_s0, 5 }
  0x28   : > { %3945 = sst [smem:[#allocation45_spill]] %s2987_s28  ;;  %s3001_s19 = smov [#allocation9]  }
  0x29   : > { %3946 = sst [smem:[#allocation46_spill]] %s2991_s29  ;;  %p3181_p3 = pnand %p1914_p0, %p452_p2 }
  0x2a   : > { %s464_s20 = sshll.u32 %s3001_s19, 4  ;;  %s3002_s16 = smov [#allocation12]   ;;  %s3185_s20 = int_to_ptr.vmem [resolvable:$true] %s464_s20 }
  0x2b   : > { %s3947_s18 = scalar_select %p3181_p3, 1, 0 }
  0x2c   : > { %p2158_p4 = pneg %p3181_p3  ;;  %s489_s27 = sshll.u32 %s3002_s16, 4  ;;  %s3195_s27 = int_to_ptr.vmem [resolvable:$true] %s489_s27 }
  0x2d   : > { %3948 = sst [smem:[#allocation47_spill]] %s3947_s18  ;;  %s3003_s28 = smov [#allocation15]  }
  0x2e   : > { %p3191_p5 = pnand %p2158_p4, %p3912_p1  ;;  %s3197_s2 = sshll.u32 %s3003_s28, 4  ;;  %s511_s2 = int_to_ptr.vmem [resolvable:$true] %s3197_s2 }
  0x2f   : > { %s3950_s3 = sld [smem:[#allocation51_spill]] }
  0x30   : > { %s3949_s15 = scalar_select %p3191_p5, 1, 0 }
  0x31   : > { %p3207_p7 = pneg %p3191_p5 }
  0x35   : > { %s2387_s19 = scalar_lea.hbm %s3950_s3, 256 }
  0x36   : > { %p2388_p6 = scmp.ne.s32.totalorder %s3950_s3, %s2387_s19  ;;  %p2394_p10 = scmp.lt.u32.totalorder %s2387_s19, %s3950_s3 }
  0x38   : > { %p2390_p8 = pnand %p3207_p7, %p2388_p6 }
  0x3a   : > { %p2391_p9 = pneg %p2390_p8 }
  0x3c   : > { %p2396_p11 = pnand %p2394_p10, %p2391_p9 }
  0x3e   : > { %2399 = shalt.err (!%p2396_p11)
}
  0x3f   : > { %s2400_s24 = scalar_lea.vmem %s3185_s20, 256  ;;  %p2408_p2 = scmp.lt.s32.totalorder %s3185_s20, %s3185_s20 }
  0x40   : > { %p2401_p12 = scmp.ne.s32.totalorder %s3185_s20, %s2400_s24  ;;  %p2409_p4 = scmp.lt.s32.totalorder %s2400_s24, %s2400_s24 }
  0x42   : > { %p2403_p13 = pnand %p2401_p12, %p3207_p7  ;;  %p2410_p6 = por %p2409_p4, %p2408_p2 }
  0x44   : > { %p2404_p0 = pneg %p2403_p13 }
  0x46   : > { %p2411_p8 = pnand %p2410_p6, %p2404_p0 }
  0x48   : > { %2414 = shalt.err (!%p2411_p8)
}
  0x49   : > { %s3004_s25 = smov 64   ;;  %s3005_s26 = smov 4  }
  0x4a   : > { %2161 = dma.hbm_to_vmem [thread:$0]  (!%p3191_p5), %s3950_s3, 256, %s3185_s20, [#allocation10], %s3004_s25, %s3004_s25, %s3005_s26  }
  0x4b   : > { %s3952_s5 = sld [smem:[#allocation53_spill]] }
  0x51   : > { %s2415_s24 = scalar_lea.hbm %s3952_s5, 16 }
  0x52   : > { %p2416_p9 = scmp.ne.s32.totalorder %s3952_s5, %s2415_s24  ;;  %p2422_p12 = scmp.lt.u32.totalorder %s2415_s24, %s3952_s5 }
  0x54   : > { %p2418_p10 = pnand %p2416_p9, %p3207_p7 }
  0x56   : > { %p2419_p11 = pneg %p2418_p10 }
  0x58   : > { %p2424_p13 = pnand %p2422_p12, %p2419_p11 }
  0x5a   : > { %2427 = shalt.err (!%p2424_p13)
}
  0x5b   : > { %s2428_s20 = scalar_lea.vmem %s3195_s27, 16  ;;  %s2435_s12 = scalar_lea.vmem %s3195_s27, 32 }
  0x5c   : > { %p2429_p0 = scmp.ne.s32.totalorder %s3195_s27, %s2428_s20  ;;  %p2436_p6 = scmp.lt.s32.totalorder %s3195_s27, %s3195_s27 }
  0x5d   : > { %p2437_p8 = scmp.lt.s32.totalorder %s2435_s12, %s2428_s20 }
  0x5e   : > { %p2431_p2 = pnand %p2429_p0, %p3207_p7 }
  0x5f   : > { %p2438_p9 = por %p2437_p8, %p2436_p6 }
  0x60   : > { %p2432_p4 = pneg %p2431_p2 }
  0x62   : > { %p2439_p10 = pnand %p2438_p9, %p2432_p4 }
  0x64   : > { %2442 = shalt.err (!%p2439_p10)
}
  0x65   : > { %2167 = dma.hbm_to_vmem [thread:$0]  (!%p3191_p5), %s3952_s5, 16, %s3195_s27, [#allocation13]  }
  0x66   : > { %s3953_s7 = sld [smem:[#allocation55_spill]] }
  0x6c   : > { %s2443_s19 = scalar_lea.hbm %s3953_s7, 256 }
  0x6d   : > { %p2444_p11 = scmp.ne.s32.totalorder %s3953_s7, %s2443_s19  ;;  %p2450_p0 = scmp.lt.u32.totalorder %s2443_s19, %s3953_s7 }
  0x6f   : > { %p2446_p12 = pnand %p2444_p11, %p3207_p7 }
  0x71   : > { %p2447_p13 = pneg %p2446_p12 }
  0x73   : > { %p2452_p2 = pnand %p2450_p0, %p2447_p13 }
  0x75   : > { %2455 = shalt.err (!%p2452_p2)
}
  0x76   : > { %s2456_s12 = scalar_lea.vmem %s511_s2, 256  ;;  %p2464_p9 = scmp.lt.s32.totalorder %s511_s2, %s511_s2 }
  0x77   : > { %p2457_p4 = scmp.ne.s32.totalorder %s511_s2, %s2456_s12  ;;  %p2465_p10 = scmp.lt.s32.totalorder %s2456_s12, %s2456_s12 }
  0x79   : > { %p2459_p6 = pnand %p2457_p4, %p3207_p7  ;;  %p2466_p1 = por %p2465_p10, %p2464_p9 }
  0x7b   : > { %p2460_p8 = pneg %p2459_p6 }
  0x7d   : > { %p2467_p3 = pnand %p2466_p1, %p2460_p8 }
  0x7f   : > { %2470 = shalt.err (!%p2467_p3)
}
  0x80   : > { %2173 = dma.hbm_to_vmem [thread:$0]  (!%p3191_p5), %s3953_s7, 256, %s511_s2, [#allocation16], %s3004_s25, %s3004_s25, %s3005_s26  }
  0x81   : > { %s3006_s10 = smov [#allocation18]   ;;  %s3007_s18 = smov [#allocation21]  }
  0x82   : > { %s534_s14 = sshll.u32 %s3006_s10, 4  ;;  %s559_s19 = sshll.u32 %s3007_s18, 4  ;;  %s535_s14 = int_to_ptr.vmem [resolvable:$true] %s534_s14  ;;  %s560_s19 = int_to_ptr.vmem [resolvable:$true] %s559_s19 }
  0x83   : > { %s3954_s9 = sld [smem:[#allocation57_spill]] }
  0x89   : > { %s2471_s24 = scalar_lea.hbm %s3954_s9, 512 }
  0x8a   : > { %p2472_p1 = scmp.ne.s32.totalorder %s3954_s9, %s2471_s24  ;;  %p2478_p12 = scmp.lt.u32.totalorder %s2471_s24, %s3954_s9 }
  0x8c   : > { %p2474_p3 = pnand %p2472_p1, %p3207_p7 }
  0x8e   : > { %p2475_p11 = pneg %p2474_p3 }
  0x90   : > { %p2480_p13 = pnand %p2478_p12, %p2475_p11 }
  0x92   : > { %2483 = shalt.err (!%p2480_p13)
}
  0x93   : > { %s2484_s2 = scalar_lea.vmem %s535_s14, 512  ;;  %p2492_p6 = scmp.lt.s32.totalorder %s535_s14, %s535_s14 }
  0x94   : > { %p2485_p0 = scmp.ne.s32.totalorder %s535_s14, %s2484_s2  ;;  %p2493_p8 = scmp.lt.s32.totalorder %s2484_s2, %s2484_s2 }
  0x96   : > { %p2487_p2 = pnand %p2485_p0, %p3207_p7  ;;  %p2494_p9 = por %p2493_p8, %p2492_p6 }
  0x98   : > { %p2488_p4 = pneg %p2487_p2 }
  0x9a   : > { %p2495_p10 = pnand %p2494_p9, %p2488_p4 }
  0x9c   : > { %2498 = shalt.err (!%p2495_p10)
}
  0x9d   : > { %2179 = dma.hbm_to_vmem [thread:$0]  (!%p3191_p5), %s3954_s9, 512, %s535_s14, [#allocation19], %s3004_s25, %s3004_s25, %s3005_s26  }
  0x9e   : > { %s3955_s11 = sld [smem:[#allocation59_spill]] }
  0xa4   : > { %s2499_s16 = scalar_lea.hbm %s3955_s11, 16 }
  0xa5   : > { %p2500_p1 = scmp.ne.s32.totalorder %s3955_s11, %s2499_s16  ;;  %p2506_p12 = scmp.lt.u32.totalorder %s2499_s16, %s3955_s11 }
  0xa7   : > { %p2502_p3 = pnand %p2500_p1, %p3207_p7 }
  0xa9   : > { %p2503_p11 = pneg %p2502_p3 }
  0xab   : > { %p2508_p13 = pnand %p2506_p12, %p2503_p11 }
  0xad   : > { %2511 = shalt.err (!%p2508_p13)
}
  0xae   : > { %s2512_s27 = scalar_lea.vmem %s560_s19, 16  ;;  %s2519_s14 = scalar_lea.vmem %s560_s19, 32 }
  0xaf   : > { %p2513_p0 = scmp.ne.s32.totalorder %s560_s19, %s2512_s27  ;;  %p2520_p6 = scmp.lt.s32.totalorder %s560_s19, %s560_s19 }
  0xb0   : > { %p2521_p8 = scmp.lt.s32.totalorder %s2519_s14, %s2512_s27 }
  0xb1   : > { %p2515_p2 = pnand %p2513_p0, %p3207_p7 }
  0xb2   : > { %p2522_p9 = por %p2521_p8, %p2520_p6 }
  0xb3   : > { %p2516_p4 = pneg %p2515_p2 }
  0xb5   : > { %p2523_p10 = pnand %p2522_p9, %p2516_p4 }
  0xb7   : > { %2526 = shalt.err (!%p2523_p10)
}
  0xb8   : > { %2185 = dma.hbm_to_vmem [thread:$0]  (!%p3191_p5), %s3955_s11, 16, %s560_s19, [#allocation22]  }
  0xb9   : > { %s3008_s8 = smov [#allocation24]   ;;  %s2527_s28 = scalar_lea.hbm %s3894_s13, 16 }
  0xba   : > { %s581_s10 = sshll.u32 %s3008_s8, 4  ;;  %p2528_p1 = scmp.ne.s32.totalorder %s3894_s13, %s2527_s28  ;;  %s582_s10 = int_to_ptr.vmem [resolvable:$true] %s581_s10 }
  0xbb   : > { %p2534_p12 = scmp.lt.u32.totalorder %s2527_s28, %s3894_s13 }
  0xbc   : > { %p2530_p3 = pnand %p2528_p1, %p3207_p7 }
  0xbe   : > { %p2531_p11 = pneg %p2530_p3 }
  0xc0   : > { %p2536_p13 = pnand %p2534_p12, %p2531_p11 }
  0xc2   : > { %2539 = shalt.err (!%p2536_p13)
}
  0xc3   : > { %s2540_s19 = scalar_lea.vmem %s582_s10, 16  ;;  %s2547_s14 = scalar_lea.vmem %s582_s10, 32 }
  0xc4   : > { %p2541_p0 = scmp.ne.s32.totalorder %s582_s10, %s2540_s19  ;;  %p2548_p6 = scmp.lt.s32.totalorder %s582_s10, %s582_s10 }
  0xc5   : > { %p2549_p8 = scmp.lt.s32.totalorder %s2547_s14, %s2540_s19 }
  0xc6   : > { %p2543_p2 = pnand %p2541_p0, %p3207_p7 }
  0xc7   : > { %p2550_p9 = por %p2549_p8, %p2548_p6 }
  0xc8   : > { %p2544_p4 = pneg %p2543_p2 }
  0xca   : > { %p2551_p10 = pnand %p2550_p9, %p2544_p4 }
  0xcc   : > { %2554 = shalt.err (!%p2551_p10)
}
  0xcd   : > { %2191 = dma.hbm_to_vmem [thread:$0]  (!%p3191_p5), %s3894_s13, 16, %s582_s10, [#allocation25]  }
  0xce   : > { %p3915_p1 = scmp.eq.s32.totalorder %s2999_s0, 0  ;;  %p99_p3 = scmp.ne.s32.totalorder %s2967_s23, %s2963_s22 }
  0xcf   : > { %p105_p11 = scmp.ne.s32.totalorder %s2963_s22, %s2959_s21  ;;  %p3914_p12 = scmp.lt.s32.totalorder %s2999_s0, 4 }
  0xd0   : > { %s623_s18 = sand.u32 1, %s2999_s0   ;;  %p101_p13 = por %p99_p3, %p3915_p1 }
  0xd1   : > { %p3956_p0 = scmp.eq.s32.totalorder %s3176_s17, 0  ;;  %s625_s28 = sand.u32 1, %s2967_s23  }
  0xd2   : > { %s1931_s24 = sshll.u32 %s625_s28, 3  ;;  %s1996_s20 = sshll.u32 %s2995_s30, 7 }
  0xd3   : > { %p3346_p2 = por %p105_p11, %p3956_p0  ;;  %s3958_s1 = sld [smem:[#allocation49_spill]] }
  0xd4   : > { %s627_s21 = scalar_lea.vmem [#allocation6], %s1931_s24  ;;  %p3359_p4 = pnand %p3914_p12, %p101_p13 }
  0xd5   : > { %s3957_s16 = scalar_select %p3346_p2, 1, 0 }
  0xd6   : > { %s634_s19 = sshll.u32 %s627_s21, 4  ;;  %s3009_s2 = smov [#allocation11]   ;;  %s3363_s19 = int_to_ptr.vmem [resolvable:$true] %s634_s19 }
  0xd7   : > { %s3365_s3 = sshll.u32 %s3009_s2, 4  ;;  %s3367_s28 = scalar_lea.sflag [#allocation7], %s623_s18  ;;  %s479_s3 = int_to_ptr.vmem [resolvable:$true] %s3365_s3 }
  0xd8   : > { %p2557_p8 = pneg %p3359_p4 }
  0xd9   : > { %s3355_s10 = scalar_lea.hbm %s3958_s1, %s1996_s20  ;;  %s2560_s27 = scalar_lea.hbm %s3958_s1, 256 }
  0xda   : > { %s2555_s20 = scalar_lea.hbm %s3355_s10, 128  ;;  %p2561_p3 = scmp.lt.u32.totalorder %s3355_s10, %s3958_s1 }
  0xdb   : > { %p2556_p6 = scmp.ne.s32.totalorder %s3355_s10, %s2555_s20  ;;  %p2562_p11 = scmp.lt.u32.totalorder %s2560_s27, %s2555_s20 }
  0xdc   : > { %p2564_p0 = scmp.lt.u32.totalorder %s2555_s20, %s3355_s10 }
  0xdd   : > { %p2558_p9 = pnand %p2557_p8, %p2556_p6  ;;  %p2563_p13 = por %p2562_p11, %p2561_p3 }
  0xdf   : > { %p2559_p10 = pneg %p2558_p9  ;;  %p2565_p12 = por %p2564_p0, %p2563_p13 }
  0xe1   : > { %p2566_p1 = pnand %p2565_p12, %p2559_p10 }
  0xe3   : > { %2569 = shalt.err (!%p2566_p1)
}
  0xe4   : > { %s2570_s18 = scalar_lea.vmem %s3363_s19, 128  ;;  %s3010_s2 = smov [#allocation6]  }
  0xe5   : > { %p2571_p6 = scmp.ne.s32.totalorder %s3363_s19, %s2570_s18  ;;  %s2575_s24 = sshll.u32 %s3010_s2, 4  ;;  %s2576_s24 = int_to_ptr.vmem [resolvable:$false] %s2575_s24 }
  0xe6   : > { %s2577_s8 = scalar_lea.vmem %s2576_s24, 256  ;;  %p2578_p5 = scmp.lt.s32.totalorder %s3363_s19, %s2576_s24 }
  0xe7   : > { %p2573_p9 = pnand %p2571_p6, %p2557_p8  ;;  %p2579_p3 = scmp.lt.s32.totalorder %s2577_s8, %s2570_s18 }
  0xe9   : > { %p2574_p2 = pneg %p2573_p9  ;;  %p2580_p11 = por %p2579_p3, %p2578_p5 }
  0xeb   : > { %p2581_p13 = pnand %p2580_p11, %p2574_p2 }
  0xed   : > { %2584 = shalt.err (!%p2581_p13)
}
  0xee   : > { %2201 = dma.hbm_to_vmem [thread:$0]  (!%p3359_p4), %s3355_s10, 128, %s3363_s19, %s3367_s28, %s3004_s25, %s3004_s25, %s3005_s26  }
  0xef   : > { %s3960_s4 = sld [smem:[#allocation52_spill]] }
  0xf5   : > { %s2585_s27 = scalar_lea.hbm %s3960_s4, 16 }
  0xf6   : > { %p2586_p5 = scmp.ne.s32.totalorder %s3960_s4, %s2585_s27  ;;  %p2592_p2 = scmp.lt.u32.totalorder %s2585_s27, %s3960_s4 }
  0xf8   : > { %p2588_p1 = pnand %p2586_p5, %p3207_p7 }
  0xfa   : > { %p2589_p12 = pneg %p2588_p1 }
  0xfc   : > { %p2594_p8 = pnand %p2592_p2, %p2589_p12 }
  0xfe   : > { %2597 = shalt.err (!%p2594_p8)
}
  0xff   : > { %s2598_s24 = scalar_lea.vmem %s479_s3, 16  ;;  %s2605_s25 = scalar_lea.vmem %s479_s3, 32 }
 0x100   : > { %p2599_p4 = scmp.ne.s32.totalorder %s479_s3, %s2598_s24  ;;  %p2606_p6 = scmp.lt.s32.totalorder %s479_s3, %s479_s3 }
 0x101   : > { %p2607_p9 = scmp.lt.s32.totalorder %s2605_s25, %s2598_s24 }
 0x102   : > { %p2601_p10 = pnand %p2599_p4, %p3207_p7 }
 0x103   : > { %p2608_p3 = por %p2607_p9, %p2606_p6 }
 0x104   : > { %p2602_p0 = pneg %p2601_p10 }
 0x106   : > { %p2609_p11 = pnand %p2608_p3, %p2602_p0 }
 0x108   : > { %2612 = shalt.err (!%p2609_p11)
}
 0x109   : > { %p3961_p13 = scmp.ne.s32.totalorder %s3949_s15, 0  ;;  %s3011_s19 = smov [#allocation14]  }
 0x10a   : > { %s500_s8 = sshll.u32 %s3011_s19, 4  ;;  %s3012_s20 = smov [#allocation17]   ;;  %s501_s8 = int_to_ptr.vmem [resolvable:$true] %s500_s8 }
 0x10b   : > { %2164 = dma.hbm_to_vmem [thread:$0]  (!%p3961_p13), %s3960_s4, 16, %s479_s3, [#allocation10]  }
 0x10c   : > { %s524_s12 = sshll.u32 %s3012_s20, 4  ;;  %s3962_s6 = sld [smem:[#allocation54_spill]]  ;;  %s525_s12 = int_to_ptr.vmem [resolvable:$true] %s524_s12 }
 0x112   : > { %s2613_s18 = scalar_lea.hbm %s3962_s6, 16 }
 0x113   : > { %p2614_p5 = scmp.ne.s32.totalorder %s3962_s6, %s2613_s18  ;;  %p2620_p2 = scmp.lt.u32.totalorder %s2613_s18, %s3962_s6 }
 0x115   : > { %p2616_p1 = pnand %p2614_p5, %p3207_p7 }
 0x117   : > { %p2617_p12 = pneg %p2616_p1 }
 0x119   : > { %p2622_p8 = pnand %p2620_p2, %p2617_p12 }
 0x11b   : > { %2625 = shalt.err (!%p2622_p8)
}
 0x11c   : > { %s2626_s3 = scalar_lea.vmem %s501_s8, 16  ;;  %s2633_s26 = scalar_lea.vmem %s501_s8, 32 }
 0x11d   : > { %p2627_p4 = scmp.ne.s32.totalorder %s501_s8, %s2626_s3  ;;  %p2634_p6 = scmp.lt.s32.totalorder %s501_s8, %s501_s8 }
 0x11e   : > { %p2635_p9 = scmp.lt.s32.totalorder %s2633_s26, %s2626_s3 }
 0x11f   : > { %p2629_p10 = pnand %p2627_p4, %p3207_p7 }
 0x120   : > { %p2636_p3 = por %p2635_p9, %p2634_p6 }
 0x121   : > { %p2630_p0 = pneg %p2629_p10 }
 0x123   : > { %p2637_p11 = pnand %p2636_p3, %p2630_p0 }
 0x125   : > { %2640 = shalt.err (!%p2637_p11)
}
 0x126   : > { %2170 = dma.hbm_to_vmem [thread:$0]  (!%p3961_p13), %s3962_s6, 16, %s501_s8, [#allocation13]  }
 0x127   : > { %s3963_s21 = sld [smem:[#allocation56_spill]] }
 0x12d   : > { %s3964_s18 = smov %s3963_s21  ;;  %s2641_s14 = scalar_lea.hbm %s3963_s21, 16 }
 0x12e   : > { %p2642_p5 = scmp.ne.s32.totalorder %s3964_s18, %s2641_s14  ;;  %p2648_p2 = scmp.lt.u32.totalorder %s2641_s14, %s3964_s18 }
 0x130   : > { %p2644_p1 = pnand %p2642_p5, %p3207_p7 }
 0x132   : > { %p2645_p12 = pneg %p2644_p1 }
 0x134   : > { %p2650_p8 = pnand %p2648_p2, %p2645_p12 }
 0x136   : > { %2653 = shalt.err (!%p2650_p8)
}
 0x137   : > { %s2654_s26 = scalar_lea.vmem %s525_s12, 16  ;;  %s2661_s8 = scalar_lea.vmem %s525_s12, 32 }
 0x138   : > { %p2655_p4 = scmp.ne.s32.totalorder %s525_s12, %s2654_s26  ;;  %p2662_p6 = scmp.lt.s32.totalorder %s525_s12, %s525_s12 }
 0x139   : > { %p2663_p9 = scmp.lt.s32.totalorder %s2661_s8, %s2654_s26 }
 0x13a   : > { %p2657_p10 = pnand %p2655_p4, %p3207_p7 }
 0x13b   : > { %p2664_p3 = por %p2663_p9, %p2662_p6 }
 0x13c   : > { %p2658_p0 = pneg %p2657_p10 }
 0x13e   : > { %p2665_p11 = pnand %p2664_p3, %p2658_p0 }
 0x140   : > { %2668 = shalt.err (!%p2665_p11)
}
 0x141   : > { %2176 = dma.hbm_to_vmem [thread:$0]  (!%p3961_p13), %s3964_s18, 16, %s525_s12, [#allocation16]  }
 0x142   : > { %s3013_s20 = smov [#allocation20]   ;;  %s3014_s21 = smov [#allocation23]  }
 0x143   : > { %s548_s27 = sshll.u32 %s3013_s20, 4  ;;  %s570_s14 = sshll.u32 %s3014_s21, 4  ;;  %s549_s27 = int_to_ptr.vmem [resolvable:$true] %s548_s27  ;;  %s571_s14 = int_to_ptr.vmem [resolvable:$true] %s570_s14 }
 0x144   : > { %s3965_s25 = sld [smem:[#allocation58_spill]] }
 0x14a   : > { %s3966_s3 = smov %s3965_s25  ;;  %s2669_s1 = scalar_lea.hbm %s3965_s25, 16 }
 0x14b   : > { %p2670_p5 = scmp.ne.s32.totalorder %s3966_s3, %s2669_s1  ;;  %p2676_p2 = scmp.lt.u32.totalorder %s2669_s1, %s3966_s3 }
 0x14d   : > { %p2672_p1 = pnand %p2670_p5, %p3207_p7 }
 0x14f   : > { %p2673_p12 = pneg %p2672_p1 }
 0x151   : > { %p2678_p8 = pnand %p2676_p2, %p2673_p12 }
 0x153   : > { %2681 = shalt.err (!%p2678_p8)
}
 0x154   : > { %s2682_s12 = scalar_lea.vmem %s549_s27, 16  ;;  %s2689_s19 = scalar_lea.vmem %s549_s27, 32 }
 0x155   : > { %p2683_p4 = scmp.ne.s32.totalorder %s549_s27, %s2682_s12  ;;  %p2690_p6 = scmp.lt.s32.totalorder %s549_s27, %s549_s27 }
 0x156   : > { %p2691_p9 = scmp.lt.s32.totalorder %s2689_s19, %s2682_s12 }
 0x157   : > { %p2685_p10 = pnand %p2683_p4, %p3207_p7 }
 0x158   : > { %p2692_p3 = por %p2691_p9, %p2690_p6 }
 0x159   : > { %p2686_p0 = pneg %p2685_p10 }
 0x15b   : > { %p2693_p11 = pnand %p2692_p3, %p2686_p0 }
 0x15d   : > { %2696 = shalt.err (!%p2693_p11)
}
 0x15e   : > { %2182 = dma.hbm_to_vmem [thread:$0]  (!%p3961_p13), %s3966_s3, 16, %s549_s27, [#allocation19]  }
 0x15f   : > { %s3967_s2 = sld [smem:[#allocation60_spill]] }
 0x165   : > { %s2697_s24 = scalar_lea.hbm %s3967_s2, 16 }
 0x166   : > { %p2698_p5 = scmp.ne.s32.totalorder %s3967_s2, %s2697_s24  ;;  %p2704_p2 = scmp.lt.u32.totalorder %s2697_s24, %s3967_s2 }
 0x168   : > { %p2700_p1 = pnand %p2698_p5, %p3207_p7 }
 0x16a   : > { %p2701_p12 = pneg %p2700_p1 }
 0x16c   : > { %p2706_p8 = pnand %p2704_p2, %p2701_p12 }
 0x16e   : > { %2709 = shalt.err (!%p2706_p8)
}
 0x16f   : > { %s2710_s12 = scalar_lea.vmem %s571_s14, 16  ;;  %s2717_s27 = scalar_lea.vmem %s571_s14, 32 }
 0x170   : > { %p2711_p4 = scmp.ne.s32.totalorder %s571_s14, %s2710_s12  ;;  %p2718_p6 = scmp.lt.s32.totalorder %s571_s14, %s571_s14 }
 0x171   : > { %p2719_p9 = scmp.lt.s32.totalorder %s2717_s27, %s2710_s12 }
 0x172   : > { %p2713_p10 = pnand %p2711_p4, %p3207_p7 }
 0x173   : > { %p2720_p3 = por %p2719_p9, %p2718_p6 }
 0x174   : > { %p2714_p0 = pneg %p2713_p10 }
 0x176   : > { %p2721_p11 = pnand %p2720_p3, %p2714_p0 }
 0x178   : > { %2724 = shalt.err (!%p2721_p11)
}
 0x179   : > { %2188 = dma.hbm_to_vmem [thread:$0]  (!%p3961_p13), %s3967_s2, 16, %s571_s14, [#allocation22]  }
 0x17a   : > { %s3015_s21 = smov [#allocation26]   ;;  %s3968_s25 = sld [smem:[#allocation61_spill]] }
 0x17b   : > { %s592_s1 = sshll.u32 %s3015_s21, 4  ;;  %s593_s1 = int_to_ptr.vmem [resolvable:$true] %s592_s1 }
 0x180   : > { %s3969_s8 = smov %s3968_s25  ;;  %s2725_s26 = scalar_lea.hbm %s3968_s25, 16 }
 0x181   : > { %p2726_p5 = scmp.ne.s32.totalorder %s3969_s8, %s2725_s26  ;;  %p2732_p2 = scmp.lt.u32.totalorder %s2725_s26, %s3969_s8 }
 0x183   : > { %p2728_p1 = pnand %p2726_p5, %p3207_p7 }
 0x185   : > { %p2729_p12 = pneg %p2728_p1 }
 0x187   : > { %p2734_p8 = pnand %p2732_p2, %p2729_p12 }
 0x189   : > { %2737 = shalt.err (!%p2734_p8)
}
 0x18a   : > { %s2738_s14 = scalar_lea.vmem %s593_s1, 16  ;;  %s2745_s19 = scalar_lea.vmem %s593_s1, 32 }
 0x18b   : > { %p2739_p4 = scmp.ne.s32.totalorder %s593_s1, %s2738_s14  ;;  %p2746_p6 = scmp.lt.s32.totalorder %s593_s1, %s593_s1 }
 0x18c   : > { %p2747_p9 = scmp.lt.s32.totalorder %s2745_s19, %s2738_s14 }
 0x18d   : > { %p2741_p10 = pnand %p2739_p4, %p3207_p7 }
 0x18e   : > { %p2748_p3 = por %p2747_p9, %p2746_p6 }
 0x18f   : > { %p2742_p0 = pneg %p2741_p10 }
 0x191   : > { %p2749_p11 = pnand %p2748_p3, %p2742_p0 }
 0x193   : > { %2752 = shalt.err (!%p2749_p11)
}
 0x194   : > { %s3970_s21 = sld [smem:[#allocation46_spill]]  ;;  %s3971_s4 = sld [smem:[#allocation43_spill]] }
 0x195   : > { %s3972_s24 = sld [smem:[#allocation42_spill]]  ;;  %s3973_s29 = sld [smem:[#allocation41_spill]] }
 0x196   : > { %2194 = dma.hbm_to_vmem [thread:$0]  (!%p3961_p13), %s3969_s8, 16, %s593_s1, [#allocation25]  }
 0x197   : > { %s1913_s25 = sadd.s32 4294967294, %s2999_s0   ;;  %s57_s15 = sadd.s32 1, %s2995_s30 }
 0x198   : > { %p3974_p1 = scmp.eq.s32.totalorder %s2999_s0, 0  ;;  %p411_p8 = scmp.eq.s32.totalorder %s3176_s17, 3 }
 0x199   : > { %p417_p4 = scmp.eq.s32.totalorder %s1913_s25, 3  ;;  %p3976_p10 = scmp.eq.s32.totalorder %s3176_s17, 0 }
 0x19a   : > { %s54_s26 = sadd.s32 1, %s3970_s21  ;;  %s66_s10 = sadd.s32 1, %s3971_s4 }
 0x19b   : > { %p55_p7 = scmp.ge.s32.totalorder %s54_s26, 2  ;;  %p73_p5 = scmp.ne.s32.totalorder %s3971_s4, %s3972_s24 }
 0x19c   : > { %p79_p2 = scmp.ne.s32.totalorder %s3972_s24, %s3973_s29  ;;  %s3546_s24 = sand.u32 1, %s3971_s4  }
 0x19d   : > { %s4024_s26 = smov (%p55_p7, %s54_s26), 0  ;;  %s4026_s15 = smov (!%p55_p7, %s57_s15), %s2995_s30 }
 0x19e   : > { %s62_s12 = ssub.s32 %s3970_s21, %s4024_s26  ;;  %p3520_p12 = por %p3974_p1, %p73_p5 }
 0x19f   : > { %p59_p13 = scmp.ge.s32.totalorder %s4026_s15, 2  ;;  %p3531_p0 = por %p3976_p10, %p79_p2 }
 0x1a0   : > { %p3535_p6 = por %p411_p8, %p73_p5  ;;  %p3541_p9 = por %p417_p4, %p79_p2 }
 0x1a1   : > { %s4028_s15 = smov (%p59_p13, %s4026_s15), 0  ;;  %s3980_s29 = sadd.s32 1, %s2967_s23 }
 0x1a2   : > { %s3977_s27 = scalar_select %p3531_p0, 1, 0 }
 0x1a3   : > { %s3978_s14 = scalar_select %p3535_p6, 1, 0 }
 0x1a4   : > { %s61_s19 = ssub.s32 %s2995_s30, %s4028_s15  ;;  %s1928_s2 = sshll.u32 %s3546_s24, 2 }
 0x1a5   : > { %s3979_s3 = scalar_select %p3541_p9, 1, 0 }
 0x1a6   : > { %s63_s20 = sor.u32 %s62_s12, %s61_s19  ;;  %p90_p3 = scmp.eq.s32.totalorder %s61_s19, 0 }
 0x1a7   : > { %p64_p11 = scmp.eq.s32.totalorder %s63_s20, 0  ;;  %s1929_s5 = sshll.u32 %s2995_s30, 1 }
 0x1a8   : > { %s3551_s25 = scalar_select %p90_p3, %s2967_s23, %s3980_s29  }
 0x1a9   : > { %s4030_s4 = smov (!%p64_p11, %s3971_s4), %s66_s10  ;;  %s3559_s6 = sadd.s32 %s3970_s21, %s1929_s5 }
 0x1aa   : > { %s607_s7 = scalar_lea.vmem [#allocation3], %s1928_s2  ;;  %s1930_s19 = sshll.u32 %s3559_s6, 6 }
 0x1ab   : > { %s616_s12 = sshll.u32 %s607_s7, 4  ;;  %s3981_s9 = sld [smem:[#allocation48_spill]]  ;;  %s3562_s12 = int_to_ptr.vmem [resolvable:$true] %s616_s12 }
 0x1ac   : > { %p3982_p7 = scmp.lt.s32.totalorder %s2999_s0, 4  ;;  %s1936_s7 = sshll.u32 %s3559_s6, 7 }
 0x1ad   : > { %s604_s21 = scalar_lea.sflag [#allocation4], %s3546_s24 }
 0x1ae   : > { %p3573_p5 = pnand %p3982_p7, %p3520_p12 }
 0x1b0   : > { %p2755_p13 = pneg %p3573_p5 }
 0x1b1   : > { %s3567_s11 = scalar_lea.hbm %s3981_s9, %s1930_s19  ;;  %s2758_s29 = scalar_lea.hbm %s3981_s9, 256 }
 0x1b2   : > { %s2753_s10 = scalar_lea.hbm %s3567_s11, 64  ;;  %p2759_p12 = scmp.lt.u32.totalorder %s3567_s11, %s3981_s9 }
 0x1b3   : > { %p2754_p1 = scmp.ne.s32.totalorder %s3567_s11, %s2753_s10  ;;  %p2760_p4 = scmp.lt.u32.totalorder %s2758_s29, %s2753_s10 }
 0x1b4   : > { %p2762_p3 = scmp.lt.u32.totalorder %s2753_s10, %s3567_s11 }
 0x1b5   : > { %p2756_p2 = pnand %p2755_p13, %p2754_p1  ;;  %p2761_p10 = por %p2760_p4, %p2759_p12 }
 0x1b7   : > { %p2757_p8 = pneg %p2756_p2  ;;  %p2763_p11 = por %p2762_p3, %p2761_p10 }
 0x1b9   : > { %p2764_p7 = pnand %p2763_p11, %p2757_p8 }
 0x1bb   : > { %2767 = shalt.err (!%p2764_p7)
}
 0x1bc   : > { %s2768_s2 = scalar_lea.vmem %s3562_s12, 64  ;;  %s3016_s8 = smov [#allocation3]  }
 0x1bd   : > { %p2769_p1 = scmp.ne.s32.totalorder %s3562_s12, %s2768_s2  ;;  %s2773_s1 = sshll.u32 %s3016_s8, 4  ;;  %s2774_s1 = int_to_ptr.vmem [resolvable:$false] %s2773_s1 }
 0x1be   : > { %s2775_s19 = scalar_lea.vmem %s2774_s1, 128  ;;  %p2776_p6 = scmp.lt.s32.totalorder %s3562_s12, %s2774_s1 }
 0x1bf   : > { %p2771_p2 = pnand %p2769_p1, %p2755_p13  ;;  %p2777_p12 = scmp.lt.s32.totalorder %s2775_s19, %s2768_s2 }
 0x1c1   : > { %p2772_p9 = pneg %p2771_p2  ;;  %p2778_p4 = por %p2777_p12, %p2776_p6 }
 0x1c3   : > { %p2779_p10 = pnand %p2778_p4, %p2772_p9 }
 0x1c5   : > { %2782 = shalt.err (!%p2779_p10)
}
 0x1c6   : > { %2198 = dma.hbm_to_vmem [thread:$0]  (!%p3573_p5), %s3567_s11, 64, %s3562_s12, %s604_s21  }
 0x1c7   : > { %s3984_s20 = sld [smem:[#allocation50_spill]]  ;;  %s3985_s9 = sshll.u32 %s3546_s24, 3 }
 0x1c8   : > { %s648_s2 = scalar_lea.vmem [#allocation8], %s3985_s9 }
 0x1c9   : > { %s657_s1 = sshll.u32 %s648_s2, 4  ;;  %s658_s1 = int_to_ptr.vmem [resolvable:$true] %s657_s1 }
 0x1cd   : > { %s3610_s8 = scalar_lea.hbm %s3984_s20, %s1936_s7  ;;  %s2788_s12 = scalar_lea.hbm %s3984_s20, 512 }
 0x1ce   : > { %s2783_s19 = scalar_lea.hbm %s3610_s8, 128  ;;  %p2789_p3 = scmp.lt.u32.totalorder %s3610_s8, %s3984_s20 }
 0x1cf   : > { %p2784_p6 = scmp.ne.s32.totalorder %s3610_s8, %s2783_s19  ;;  %p2790_p11 = scmp.lt.u32.totalorder %s2788_s12, %s2783_s19 }
 0x1d0   : > { %p2792_p1 = scmp.lt.u32.totalorder %s2783_s19, %s3610_s8 }
 0x1d1   : > { %p2786_p9 = pnand %p2784_p6, %p2755_p13  ;;  %p2791_p7 = por %p2790_p11, %p2789_p3 }
 0x1d3   : > { %p2787_p8 = pneg %p2786_p9  ;;  %p2793_p2 = por %p2792_p1, %p2791_p7 }
 0x1d5   : > { %p2794_p12 = pnand %p2793_p2, %p2787_p8 }
 0x1d7   : > { %2797 = shalt.err (!%p2794_p12)
}
 0x1d8   : > { %s2798_s9 = scalar_lea.vmem %s658_s1, 128  ;;  %s3017_s24 = smov [#allocation8]  }
 0x1d9   : > { %p2799_p4 = scmp.ne.s32.totalorder %s658_s1, %s2798_s9  ;;  %s2803_s10 = sshll.u32 %s3017_s24, 4  ;;  %s2804_s10 = int_to_ptr.vmem [resolvable:$false] %s2803_s10 }
 0x1da   : > { %s2805_s29 = scalar_lea.vmem %s2804_s10, 256  ;;  %p2806_p9 = scmp.lt.s32.totalorder %s658_s1, %s2804_s10 }
 0x1db   : > { %p2801_p10 = pnand %p2799_p4, %p2755_p13  ;;  %p2807_p0 = scmp.lt.s32.totalorder %s2805_s29, %s2798_s9 }
 0x1dd   : > { %p2802_p6 = pneg %p2801_p10  ;;  %p2808_p3 = por %p2807_p0, %p2806_p9 }
 0x1df   : > { %p2809_p11 = pnand %p2808_p3, %p2802_p6 }
 0x1e1   : > { %2812 = shalt.err (!%p2809_p11)
}
 0x1e2   : > { %2204 = dma.hbm_to_vmem [thread:$0]  (!%p3573_p5), %s3610_s8, 128, %s658_s1, %s3367_s28  }
 0x1e3   : > { %s3986_s2 = sld [smem:[#allocation47_spill]] }
 0x1e9   : > { %p3987_p8 = scmp.ne.s32.totalorder %s3986_s2, 0 }
 0x1ea   : > { %s3988_s19 = sld [smem:[#allocation42_spill]] (!%p3987_p8)  ;;  %p3989_p0 = scmp.ne.s32.totalorder (!%p3987_p8), %s3977_s27, 0 }
 0x1eb   : > { %666 = sbr.rel (%p3987_p8) target bundleno = 3147 (0xc4b), region = 80 }
 0x1f0   : > { %s3637_s6 = sand.u32 (!%p3987_p8), 1, %s3988_s19  }
 0x1f1   : > { %s1938_s11 = sshll.u32 (!%p3987_p8), %s3637_s6, 2  ;;  %s669_s12 = scalar_lea.sflag (!%p3987_p8), [#allocation4], %s3637_s6 }
 0x1f2   : > { %s3641_s7 = scalar_lea.vmem [#allocation3], %s1938_s11 }
 0x1f3   : > { %2914 = dma.done.wait (%p3989_p0), %s669_s12, 64  }
 0x1f4   : > { %2916 = vsyncadd (%p3989_p0), %s669_s12, 4294967232  ;;  %s677_s28 = sand.u32 1, %s3176_s17   ;;  %s679_s5 = sand.u32 1, %s2963_s22  }
 0x1f5   : > { %s1939_s8 = sshll.u32 %s679_s5, 3  ;;  %s678_s1 = scalar_lea.sflag [#allocation7], %s677_s28 }
 0x1f6   : > { %s681_s21 = scalar_lea.vmem [#allocation6], %s1939_s8  ;;  %p3990_p5 = scmp.ne.s32.totalorder %s3957_s16, 0 }
 0x1f8   : > { %2918 = dma.done.wait (%p3990_p5), %s678_s1, 128  }
 0x1f9   : > { %2920 = vsyncadd (%p3990_p5), %s678_s1, 4294967168  ;;  %s1940_s9 = sshll.u32 %s3637_s6, 3 }
 0x1fa   : > { %s3656_s24 = scalar_lea.vmem [#allocation8], %s1940_s9 }
 0x1fb   : > { %2922 = dma.done.wait (%p3989_p0), %s678_s1, 128  }
 0x1fc   : > { %2924 = vsyncadd (%p3989_p0), %s678_s1, 4294967168  ;;  %p3991_p13 = scmp.eq.s32.totalorder %s3176_s17, 0 }
 0x1fe   : > { %2926 = dma.done.wait (%p3991_p13), [#allocation10], 272   ;;  %p3992_p7 = pmov %p3991_p13 }
 0x200   : > { %2928 = vsyncadd (%p3992_p7), [#allocation10], 4294967024  ;;  %p3993_p1 = pmov %p3992_p7 }
 0x202   : > { %2930 = dma.done.wait (%p3993_p1), [#allocation13], 32   ;;  %p3994_p2 = pmov %p3993_p1 }
 0x203   : > { %p3995_p12 = pmov %p3993_p1 }
 0x204   : > { %2932 = vsyncadd (%p3994_p2), [#allocation13], 4294967264 }
 0x205   : > { %2934 = dma.done.wait (%p3995_p12), [#allocation16], 272   ;;  %p3996_p4 = pmov %p3993_p1 }
 0x206   : > { %p3997_p10 = pmov %p3993_p1 }
 0x207   : > { %2936 = vsyncadd (%p3996_p4), [#allocation16], 4294967024 }
 0x208   : > { %2938 = dma.done.wait (%p3997_p10), [#allocation19], 528   ;;  %p3998_p6 = pmov %p3993_p1 }
 0x209   : > { %p3999_p9 = pmov %p3993_p1 }
 0x20a   : > { %2940 = vsyncadd (%p3998_p6), [#allocation19], 4294966768 }
 0x20b   : > { %2942 = dma.done.wait (%p3999_p9), [#allocation22], 32   ;;  %p4000_p3 = pmov %p3993_p1 }
 0x20c   : > { %p4001_p11 = pmov %p3993_p1 }
 0x20d   : > { %2944 = vsyncadd (%p4000_p3), [#allocation22], 4294967264 }
 0x20e   : > { %2946 = dma.done.wait (%p4001_p11), [#allocation25], 32   ;;  %p4002_p8 = pmov %p3993_p1 }
 0x20f   : > { %v3018_v0 = vmov 0.0   ;;  %vm3019_vm0 = vmmov 0   ;;  %vm812_vm1 = vcmask 64512   ;;  %v3692_v1 = vld [vmem:[%s681_s21] sm:$0xff]   ;;  %v803_v2 = vld [vmem:[%s3641_s7] sm:$0xf] }
 0x210   : > { %2948 = vsyncadd (%p4002_p8), [#allocation25], 4294967264  ;;  %2024 = vmatprep.subr.bf16.mxu0 %v3018_v0  ;;  %2026 = vmatprep.mubr.msk.bf16.mxu0 %vm3019_vm0, %v3018_v0  ;;  %s3020_s16 = smov 120   ;;  %v817_v3 = vsel %vm812_vm1, %v3692_v1, 0  ;;  %s3021_s17 = smov 112   ;;  %v1958_v4 = vcombine.low %v803_v2, %v803_v2  ;;  %vm859_vm2 = vcmask 130048  }
 0x211   : > { %2036 = vmatprep.subr.bf16.mxu1 %v3018_v0  ;;  %2038 = vmatprep.mubr.msk.bf16.mxu1 %vm3019_vm0, %v3018_v0  ;;  %s3022_s27 = smov 104   ;;  %s3023_s10 = smov 96   ;;  %vm875_vm3 = vcmask 125952   ;;  %vm1044_vm4 = vcmask 130112   ;;  %vm1163_vm5 = vcmask 195712   ;;  %vm1282_vm6 = vcmask 261312  }
 0x212   : > { %929 = vrot.lane.b32.xlu0 %v3692_v1, %s3020_s16  ;;  %1048 = vrot.lane.b32.xlu1 %v3692_v1, %s3021_s17  ;;  %s3024_s29 = smov 80   ;;  %s3025_s2 = smov 72   ;;  %vm1309_vm7 = vcmask 261120   ;;  %vm1492_vm8 = vcmask 523264  }
 0x213   : > { %2025 = vmatpush3.bf16.xpose.msra.mxu0 %v817_v3  ;;  %s3026_s19 = smov 88   ;;  %s1954_s11 = sshll.u32 %s3637_s6, 4 }
 0x214   : > { %2030 = vmatprep.subr.bf16.mxu0 %v3018_v0  ;;  %s3733_s12 = scalar_lea.vmem [#allocation28], %s1954_s11  ;;  %s3027_s7 = smov 8  }
 0x215   : > { %s3028_s28 = smov 16   ;;  %s3029_s5 = smov 24  }
 0x216   : > { %927 = vrot.lane.b32.xlu0 %v1958_v4, %s3020_s16  ;;  %1046 = vrot.lane.b32.xlu1 %v1958_v4, %s3021_s17  ;;  %s4003_s8 = sld [smem:[#allocation45_spill]]  ;;  %s4004_s1 = sld [smem:[#allocation44_spill]] }
 0x217   : > { %s1602_s11 = scalar_lea.sflag [#allocation29], %s3637_s6  ;;  %p4007_p5 = scmp.ne.s32.totalorder %s3978_s14, 0 }
 0x21a   : > { %2027 = vmatmul.mubr.msk.bf16.vlgmr.msra.gmra.mrb[0].mxu0 %vm812_vm1, %v803_v2  ;;  %1167 = vrot.lane.b32.xlu0 %v3692_v1, %s3022_s27 }
 0x21b   : > { %1165 = vrot.lane.b32.xlu1 %v1958_v4, %s3022_s27  ;;  %2032 = vmatprep.mubr.msk.bf16.mxu0 %vm3019_vm0, %v3018_v0 }
 0x21c   : > { %s1992_s21 = sshll.u32 %s4003_s8, 3 }
 0x21d   : > { %s1628_s16 = sadd.s32 %s4004_s1, %s1992_s21 }
 0x21e   : > { %s1993_s17 = sshll.u32 %s1628_s16, 6 }
 0x284   : > { %v930_v5 = vpop.permute.xlu0 %929  ;;  %v1049_v7 = vpop.permute.xlu1 %1048 }
 0x285   : > { %v935_v6 = vsel %vm812_vm1, %v930_v5, 0  ;;  %v1054_v9 = vsel %vm812_vm1, %v1049_v7, 0 }
 0x286   : > { %2037 = vmatpush3.bf16.xpose.msra.mxu1 %v935_v6 }
 0x287   : > { %2048 = vmatprep.subr.bf16.mxu1 %v3018_v0 }
 0x288   : > { %v928_v8 = vpop.permute.xlu0 %927  ;;  %v1047_v11 = vpop.permute.xlu1 %1046 }
 0x28c   : > { %v1168_v10 = vpop.permute.xlu0 %1167 }
 0x28d   : > { %2039 = vmatmul.mubr.msk.bf16.vlgmr.msra.gmra.mrb[0].mxu1 %vm812_vm1, %v928_v8  ;;  %v1173_v12 = vsel %vm812_vm1, %v1168_v10, 0  ;;  %v1166_v13 = vpop.permute.xlu1 %1165 }
 0x28e   : > { %2049 = vmatpush3.bf16.xpose.msra.mxu1 %v1054_v9  ;;  %2050 = vmatprep.mubr.msk.bf16.mxu1 %vm3019_vm0, %v3018_v0 }
 0x28f   : > { %2060 = vmatprep.subr.bf16.mxu1 %v3018_v0 }
 0x295   : > { %2051 = vmatmul.mubr.msk.bf16.vlgmr.msra.gmra.mrb[4].mxu1 %vm812_vm1, %v1047_v11 }
 0x296   : > { %2061 = vmatpush3.bf16.xpose.msra.mxu1 %v1173_v12  ;;  %2062 = vmatprep.mubr.msk.bf16.mxu1 %vm3019_vm0, %v3018_v0 }
 0x297   : > { %2072 = vmatprep.subr.bf16.mxu1 %v3018_v0 }
 0x29d   : > { %2063 = vmatmul.mubr.msk.bf16.vlgmr.msra.gmra.mrb[8].mxu1 %vm812_vm1, %v1166_v13 }
 0x29e   : > { %2076 = vmatprep.mubr.msk.bf16.mxu1 %vm3019_vm0, %v3018_v0 }
 0x2ed   : > { %v853_v14 = vpop.f32.mrb[0].mxu0 }
 0x2ee   : > { %v860_v15 = vsel %vm859_vm2, %v853_v14, -inf  ;;  %v2028_v16 = vpop.f32.mrb[1].mxu0 }
 0x2ef   : > { %861 = vmax.xlane.f32.xlu0 %v860_v15  ;;  %v856_v17 = vpop.f32.mrb[2].mxu0 }
 0x2f0   : > { %v2029_v18 = vpop.f32.mrb[3].mxu0 }
 0x360   : > { %v971_v19 = vpop.f32.mrb[0].mxu1 }
 0x361   : > { %v2040_v20 = vpop.f32.mrb[1].mxu1  ;;  %v977_v21 = vsel %vm859_vm2, %v971_v19, -inf }
 0x362   : > { %978 = vmax.xlane.f32.xlu1 %v977_v21  ;;  %v974_v22 = vpop.f32.mrb[2].mxu1 }
 0x363   : > { %v2041_v23 = vpop.f32.mrb[3].mxu1 }
 0x368   : > { %v1090_v24 = vpop.f32.mrb[4].mxu1 }
 0x369   : > { %v2052_v25 = vpop.f32.mrb[5].mxu1  ;;  %v1096_v26 = vsel %vm859_vm2, %v1090_v24, -inf }
 0x36a   : > { %v1093_v27 = vpop.f32.mrb[6].mxu1  ;;  %1097 = vmax.xlane.f32.xlu0 %v1096_v26 }
 0x36b   : > { %v2053_v28 = vpop.f32.mrb[7].mxu1 }
 0x370   : > { %v1209_v29 = vpop.f32.mrb[8].mxu1 }
 0x371   : > { %v2064_v30 = vpop.f32.mrb[9].mxu1  ;;  %v1215_v31 = vsel %vm859_vm2, %v1209_v29, -inf }
 0x372   : > { %v1212_v32 = vpop.f32.mrb[10].mxu1  ;;  %1216 = vmax.xlane.f32.xlu0 %v1215_v31  ;;  %v2357_v31 = vld [vmem:[#allocation9] sm:$0xff]  }
 0x373   : > { %v2065_v33 = vpop.f32.mrb[11].mxu1  ;;  %2073 = vmatpush3.bf16.msra.mxu1 %v2357_v31  ;;  %v2358_v32 = vld [vmem:[#allocation9 + $0x8] sm:$0xff]  }
 0x374   : > { %2074 = vmatprep.subr.bf16.mxu1 %v3018_v0 }
 0x377   : > { %2075 = vmatpush3.bf16.msra.mxu1 %v2358_v32 }
 0x378   : > { %2088 = vmatprep.subr.bf16.mxu1 %v3018_v0 }
 0x37c   : > { %v862_v34 = vpop.xlane.xlu0 %861 }
 0x37d   : > { %v863_v35 = vsub.f32 %v853_v14, %v862_v34 }
 0x37f   : > { %v864_v36 = vmul.f32 1.442695, %v863_v35 }
 0x381   : > { %2365 = vpow2.f32 %v864_v36 }
 0x38b   : > { %v2366_v37 = vpop.eup %2365 }
 0x38c   : > { %v866_v38 = vsel %vm859_vm2, %v2366_v37, 0.0 }
 0x38d   : > { %867 = vadd.xlane.f32.xlu1 %v866_v38 }
 0x39e   : > { %877 = vrot.lane.b32.xlu1 %v3692_v1, %s3023_s10 }
 0x3ef   : > { %v979_v39 = vpop.xlane.xlu1 %978 }
 0x3f0   : > { %v980_v40 = vsub.f32 %v971_v19, %v979_v39 }
 0x3f2   : > { %v981_v41 = vmul.f32 1.442695, %v980_v40 }
 0x3f4   : > { %2367 = vpow2.f32 %v981_v41 }
 0x3f7   : > { %v1098_v42 = vpop.xlane.xlu0 %1097 }
 0x3f8   : > { %v1099_v43 = vsub.f32 %v1090_v24, %v1098_v42 }
 0x3fa   : > { %v1100_v44 = vmul.f32 1.442695, %v1099_v43 }
 0x3fc   : > { %2369 = vpow2.f32 %v1100_v44 }
 0x3fe   : > { %v2368_v45 = vpop.eup %2367 }
 0x3ff   : > { %v1217_v46 = vpop.xlane.xlu0 %1216  ;;  %v983_v47 = vsel %vm859_vm2, %v2368_v45, 0.0 }
 0x400   : > { %v1218_v48 = vsub.f32 %v1209_v29, %v1217_v46  ;;  %984 = vadd.xlane.f32.xlu0 %v983_v47  ;;  %v1968_v46 = vld [vmem:[#allocation11] ss:$0 sm:$0xff] }
 0x402   : > { %v1219_v49 = vmul.f32 1.442695, %v1218_v48  ;;  %v806_v48 = vld [vmem:[%s3656_s24] sm:$0xff]  ;;  %s1631_s24 = sshll.u32 %s3733_s12, 4  ;;  %s3779_s24 = int_to_ptr.vmem [resolvable:$true] %s1631_s24 }
 0x404   : > { %2371 = vpow2.f32 %v1219_v49 }
 0x406   : > { %v2370_v50 = vpop.eup %2369 }
 0x407   : > { %v1102_v51 = vsel %vm859_vm2, %v2370_v50, 0.0 }
 0x408   : > { %1103 = vadd.xlane.f32.xlu1 %v1102_v51 }
 0x40e   : > { %v2372_v52 = vpop.eup %2371 }
 0x40f   : > { %v1221_v53 = vsel %vm859_vm2, %v2372_v52, 0.0 }
 0x410   : > { %1222 = vadd.xlane.f32.xlu0 %v1221_v53 }
 0x419   : > { %1113 = vrot.lane.b32.xlu1 %v3692_v1, %s3024_s29  ;;  %s4005_s29 = sld [smem:[#allocation63_spill]] }
 0x41a   : > { %v868_v54 = vpop.xlane.xlu1 %867 }
 0x41b   : > { %2373 = vrcp.f32 %v868_v54 }
 0x41d   : > { %1232 = vrot.lane.b32.xlu1 %v3692_v1, %s3025_s2 }
 0x41e   : > { %v878_v55 = vpop.permute.xlu1 %877 }
 0x41f   : > { %2031 = vmatpush3.bf16.msra.mxu0 %v878_v55  ;;  %s4006_s2 = smov %s4005_s29 }
 0x420   : > { %2042 = vmatprep.subr.bf16.mxu0 %v3018_v0 }
 0x425   : > { %v2374_v56 = vpop.eup %2373 }
 0x426   : > { %v870_v57 = vmul.f32 %v2374_v56, %v868_v54  ;;  %994 = vrot.lane.b32.xlu0 %v3692_v1, %s3026_s19  ;;  %s3784_s19 = scalar_lea.hbm %s4005_s29, %s1993_s17 }
 0x428   : > { %v871_v58 = vsub.f32 2.0, %v870_v57 }
 0x42a   : > { %v872_v59 = vmul.f32 %v2374_v56, %v871_v58 }
 0x42c   : > { %v873_v60 = vmul.f32 %v2366_v37, %v872_v59 }
 0x42e   : > { %v874_v61 = vpack.c.bf16 %v873_v60, %v873_v60  ;;  %v2359_v60 = vld [vmem:[#allocation15] sm:$0xff]  }
 0x430   : > { %876 = vst.msk [vmem:[%s3733_s12] sm:$0xf] %vm875_vm3, %v874_v61  ;;  %2033 = vmatmul.mubr.msk.bf16.vlgmr.msra.gmra.mrb[4].mxu0 %vm859_vm2, %v874_v61  ;;  %v2360_v61 = vld [vmem:[#allocation15 + $0x8] sm:$0xff]  }
 0x431   : > { %2044 = vmatprep.mubr.msk.bf16.mxu0 %vm3019_vm0, %v3018_v0 }
 0x48d   : > { %v985_v62 = vpop.xlane.xlu0 %984 }
 0x48e   : > { %2375 = vrcp.f32 %v985_v62 }
 0x495   : > { %v1104_v63 = vpop.xlane.xlu1 %1103 }
 0x496   : > { %2377 = vrcp.f32 %v1104_v63 }
 0x498   : > { %v2376_v1 = vpop.eup %2375 }
 0x499   : > { %v987_v2 = vmul.f32 %v2376_v1, %v985_v62  ;;  %v1114_v12 = vpop.permute.xlu1 %1113  ;;  %v2361_v62 = vld [vmem:[#allocation18] sm:$0xff]  }
 0x49b   : > { %v988_v3 = vsub.f32 2.0, %v987_v2 }
 0x49d   : > { %v989_v4 = vmul.f32 %v2376_v1, %v988_v3  ;;  %v1223_v5 = vpop.xlane.xlu0 %1222  ;;  %v1233_v19 = vpop.permute.xlu1 %1232 }
 0x49e   : > { %2379 = vrcp.f32 %v1223_v5 }
 0x49f   : > { %v990_v6 = vmul.f32 %v2368_v45, %v989_v4 }
 0x4a0   : > { %v2378_v7 = vpop.eup %2377 }
 0x4a1   : > { %v991_v8 = vpack.c.bf16 %v990_v6, %v990_v6  ;;  %v1106_v9 = vmul.f32 %v2378_v7, %v1104_v63  ;;  %v995_v10 = vpop.permute.xlu0 %994  ;;  %v2362_v63 = vld [vmem:[#allocation18 + $0x8] sm:$0xff]  }
 0x4a2   : > { %2043 = vmatpush3.bf16.msra.mxu0 %v995_v10 }
 0x4a3   : > { %1960 = vst.msk [vmem:[%s3733_s12 + $0x4] sm:$0xf] %vm875_vm3, %v991_v8  ;;  %v1107_v11 = vsub.f32 2.0, %v1106_v9  ;;  %2054 = vmatprep.subr.bf16.mxu0 %v3018_v0 }
 0x4a5   : > { %v1108_v13 = vmul.f32 %v2378_v7, %v1107_v11  ;;  %2045 = vmatmul.mubr.msk.bf16.vlgmr.msra.gmra.mrb[8].mxu0 %vm859_vm2, %v991_v8  ;;  %v1973_v7 = vld [vmem:[#allocation14] ss:$0 sm:$0xff]  ;;  %v2363_v11 = vld [vmem:[#allocation18 + $0x10] sm:$0xff]  }
 0x4a6   : > { %2055 = vmatpush3.bf16.msra.mxu0 %v1114_v12  ;;  %2056 = vmatprep.mubr.msk.bf16.mxu0 %vm3019_vm0, %v3018_v0  ;;  %v2364_v12 = vld [vmem:[#allocation18 + $0x18] sm:$0xff]  }
 0x4a7   : > { %v1109_v14 = vmul.f32 %v2370_v50, %v1108_v13  ;;  %2066 = vmatprep.subr.bf16.mxu0 %v3018_v0  ;;  %v1974_v13 = vld [vmem:[#allocation17] ss:$0 sm:$0xff] }
 0x4a8   : > { %v2380_v15 = vpop.eup %2379 }
 0x4a9   : > { %v1110_v16 = vpack.c.bf16 %v1109_v14, %v1109_v14  ;;  %v1225_v17 = vmul.f32 %v2380_v15, %v1223_v5  ;;  %v1972_v5 = vld [vmem:[#allocation12] ss:$0 sm:$0xff] }
 0x4ab   : > { %1963 = vst.msk [vmem:[%s3733_s12 + $0x8] sm:$0xf] %vm875_vm3, %v1110_v16  ;;  %v1226_v18 = vsub.f32 2.0, %v1225_v17 }
 0x4ad   : > { %v1227_v20 = vmul.f32 %v2380_v15, %v1226_v18  ;;  %2057 = vmatmul.mubr.msk.bf16.vlgmr.msra.gmra.mrb[12].mxu0 %vm859_vm2, %v1110_v16 }
 0x4ae   : > { %2067 = vmatpush3.bf16.msra.mxu0 %v1233_v19  ;;  %2068 = vmatprep.mubr.msk.bf16.mxu0 %vm3019_vm0, %v3018_v0 }
 0x4af   : > { %v1228_v21 = vmul.f32 %v2372_v52, %v1227_v20  ;;  %2080 = vmatprep.subr.bf16.mxu0 %v3018_v0 }
 0x4b1   : > { %v1229_v22 = vpack.c.bf16 %v1228_v21, %v1228_v21  ;;  %v1978_v21 = vld [vmem:[#allocation20] ss:$0 sm:$0xff] }
 0x4b3   : > { %1966 = vst.msk [vmem:[%s3733_s12 + $0xc] sm:$0xf] %vm875_vm3, %v1229_v22 }
 0x4b5   : > { %2069 = vmatmul.mubr.msk.bf16.vlgmr.msra.gmra.mrb[16].mxu0 %vm859_vm2, %v1229_v22 }
 0x4b6   : > { %2084 = vmatprep.mubr.msk.bf16.mxu0 %vm3019_vm0, %v3018_v0  ;;  %2081 = vmatpush3.bf16.msra.mxu0 %v2359_v60 }
 0x4b7   : > { %2082 = vmatprep.subr.bf16.mxu0 %v3018_v0 }
 0x4ba   : > { %2083 = vmatpush3.bf16.msra.mxu0 %v2360_v61 }
 0x503   : > { %v917_v23 = vpop.f32.mrb[4].mxu0 }
 0x504   : > { %923 = vst.msk [vmem:[#allocation2] sm:$0xff] %vm812_vm1, %v917_v23  ;;  %v2034_v24 = vpop.f32.mrb[5].mxu0 }
 0x505   : > { %v920_v25 = vpop.f32.mrb[6].mxu0 }
 0x506   : > { %v2035_v26 = vpop.f32.mrb[7].mxu0 }
 0x578   : > { %v1034_v27 = vpop.f32.mrb[8].mxu0 }
 0x579   : > { %1041 = vrot.lane.b32.xlu0 %v1034_v27, %s3027_s7  ;;  %v2046_v28 = vpop.f32.mrb[9].mxu0  ;;  %s2813_s7 = scalar_lea.vmem %s3779_s24, 256 }
 0x57a   : > { %v1037_v29 = vpop.f32.mrb[10].mxu0  ;;  %p2814_p0 = scmp.ne.s32.totalorder %s3779_s24, %s2813_s7 }
 0x57b   : > { %v2047_v30 = vpop.f32.mrb[11].mxu0 }
 0x57c   : > { %p2815_p13 = pnand %p2814_p0, %p4007_p5 }
 0x57e   : > { %p2816_p7 = pneg %p2815_p13 }
 0x580   : > { %v1153_v33 = vpop.f32.mrb[12].mxu0 }
 0x581   : > { %1160 = vrot.lane.b32.xlu1 %v1153_v33, %s3028_s28  ;;  %v2058_v34 = vpop.f32.mrb[13].mxu0  ;;  %s3030_s28 = smov [#allocation28]  }
 0x582   : > { %v1156_v35 = vpop.f32.mrb[14].mxu0  ;;  %s2817_s12 = sshll.u32 %s3030_s28, 4  ;;  %s2818_s12 = int_to_ptr.vmem [resolvable:$false] %s2817_s12 }
 0x583   : > { %v2059_v36 = vpop.f32.mrb[15].mxu0  ;;  %p2820_p1 = scmp.lt.s32.totalorder %s3779_s24, %s2818_s12 }
 0x588   : > { %v1272_v37 = vpop.f32.mrb[16].mxu0 }
 0x589   : > { %1279 = vrot.lane.b32.xlu0 %v1272_v37, %s3029_s5  ;;  %v2070_v38 = vpop.f32.mrb[17].mxu0  ;;  %v1984_v37 = vld [vmem:[#allocation21] ss:$0 sm:$0xff]  ;;  %s2819_s5 = scalar_lea.vmem %s2818_s12, 512 }
 0x58a   : > { %v1275_v39 = vpop.f32.mrb[18].mxu0  ;;  %p2821_p2 = scmp.lt.s32.totalorder %s2819_s5, %s2813_s7 }
 0x58b   : > { %v2071_v40 = vpop.f32.mrb[19].mxu0  ;;  %v1985_v39 = vld [vmem:[#allocation23] ss:$0 sm:$0xff] }
 0x58c   : > { %p2822_p12 = por %p2821_p2, %p2820_p1 }
 0x58e   : > { %p2823_p4 = pnand %p2822_p12, %p2816_p7 }
 0x5eb   : > { %v1042_v41 = vpop.permute.xlu0 %1041 }
 0x5ec   : > { %1045 = vst.msk [vmem:[#allocation2] sm:$0xff] %vm1044_vm4, %v1042_v41 }
 0x5f3   : > { %v1161_v42 = vpop.permute.xlu1 %1160 }
 0x5f4   : > { %1164 = vst.msk [vmem:[#allocation2] sm:$0xff] %vm1163_vm5, %v1161_v42 }
 0x5fb   : > { %v1280_v43 = vpop.permute.xlu0 %1279 }
 0x5fc   : > { %1283 = vst.msk [vmem:[#allocation2] sm:$0xff] %vm1282_vm6, %v1280_v43 }
 0x603   : > { %v1284_v44 = vld [vmem:[#allocation2] sm:$0xff] }
 0x604   : > { %v1285_v45 = vpack.c.bf16 %v1284_v44, %v1284_v44 }
 0x606   : > { %2077 = vmatmul.mubr.msk.bf16.vlgmr.msra.gmra.mrb[12].mxu1 %vm1309_vm7, %v1285_v45 }
 0x607   : > { %2096 = vmatprep.mubr.msk.bf16.mxu1 %vm3019_vm0, %v3018_v0  ;;  %2089 = vmatpush3.bf16.msra.mxu1 %v2361_v62 }
 0x608   : > { %2090 = vmatprep.subr.bf16.mxu1 %v3018_v0 }
 0x60b   : > { %2091 = vmatpush3.bf16.msra.mxu1 %v2362_v63 }
 0x60c   : > { %2092 = vmatprep.subr.bf16.mxu1 %v3018_v0 }
 0x60f   : > { %2093 = vmatpush3.bf16.msra.mxu1 %v2363_v11 }
 0x610   : > { %2094 = vmatprep.subr.bf16.mxu1 %v3018_v0 }
 0x613   : > { %2095 = vmatpush3.bf16.msra.mxu1 %v2364_v12 }
 0x6d9   : > { %v1347_v47 = vpop.f32.mrb[12].mxu1 }
 0x6da   : > { %v1348_v49 = vadd.f32 %v1968_v46, %v1347_v47  ;;  %v2078_v50 = vpop.f32.mrb[13].mxu1 }
 0x6db   : > { %v1350_v51 = vpop.f32.mrb[14].mxu1 }
 0x6dc   : > { %v2079_v52 = vpop.f32.mrb[15].mxu1  ;;  %v1353_v53 = vadd.f32 %v1348_v49, %v806_v48 }
 0x6de   : > { %v1354_v54 = vsel %vm1309_vm7, %v1353_v53, 0.0 }
 0x6df   : > { %1355 = vadd.xlane.f32.xlu1 %v1354_v54 }
 0x76c   : > { %v1356_v55 = vpop.xlane.xlu1 %1355 }
 0x76d   : > { %v1358_v56 = vmul.f32 0.03125, %v1356_v55 }
 0x76f   : > { %v1359_v57 = vsub.f32 %v1353_v53, %v1358_v56 }
 0x771   : > { %v1360_v58 = vmul.f32 %v1359_v57, %v1359_v57 }
 0x773   : > { %v1361_v59 = vsel %vm1309_vm7, %v1360_v58, 0.0 }
 0x774   : > { %1362 = vadd.xlane.f32.xlu0 %v1361_v59 }
 0x801   : > { %v1363_v1 = vpop.xlane.xlu0 %1362 }
 0x802   : > { %v1364_v2 = vmul.f32 0.03125, %v1363_v1 }
 0x804   : > { %v1365_v3 = vadd.f32 1e-05, %v1364_v2 }
 0x806   : > { %2381 = vrsqrt.f32 %v1365_v3 }
 0x810   : > { %v2382_v4 = vpop.eup %2381 }
 0x811   : > { %v1367_v6 = vmul.f32 %v2382_v4, %v1359_v57 }
 0x813   : > { %v1375_v8 = vmul.f32 %v1972_v5, %v1367_v6 }
 0x815   : > { %v1383_v9 = vadd.f32 %v1973_v7, %v1375_v8 }
 0x817   : > { %v1384_v10 = vpack.c.bf16 %v1383_v9, %v1383_v9 }
 0x819   : > { %2085 = vmatmul.mubr.msk.bf16.vlgmr.msra.gmra.mrb[20].mxu0 %vm1309_vm7, %v1384_v10 }
 0x8ec   : > { %v1445_v14 = vpop.f32.mrb[20].mxu0 }
 0x8ed   : > { %v1446_v15 = vadd.f32 %v1974_v13, %v1445_v14  ;;  %v2086_v16 = vpop.f32.mrb[21].mxu0 }
 0x8ee   : > { %v1448_v17 = vpop.f32.mrb[22].mxu0 }
 0x8ef   : > { %v1451_v18 = vmax.f32 %v1446_v15, 0.0  ;;  %v2087_v19 = vpop.f32.mrb[23].mxu0 }
 0x8f1   : > { %v1452_v20 = vpack.c.bf16 %v1451_v18, %v1451_v18 }
 0x8f3   : > { %2097 = vmatmul.mubr.msk.bf16.vlgmr.msra.gmra.mrb[16].mxu1 %vm1492_vm8, %v1452_v20 }
 0x9c6   : > { %v1530_v22 = vpop.f32.mrb[16].mxu1 }
 0x9c7   : > { %v1531_v23 = vadd.f32 %v1978_v21, %v1530_v22  ;;  %v2098_v24 = vpop.f32.mrb[17].mxu1 }
 0x9c8   : > { %v1533_v25 = vpop.f32.mrb[18].mxu1 }
 0x9c9   : > { %v2099_v26 = vpop.f32.mrb[19].mxu1  ;;  %v1536_v27 = vadd.f32 %v1531_v23, %v1383_v9 }
 0x9cb   : > { %v1537_v0 = vsel %vm1309_vm7, %v1536_v27, 0.0 }
 0x9cc   : > { %1538 = vadd.xlane.f32.xlu0 %v1537_v0 }
 0xa59   : > { %v1539_v28 = vpop.xlane.xlu0 %1538 }
 0xa5a   : > { %v1540_v29 = vmul.f32 0.03125, %v1539_v28 }
 0xa5c   : > { %v1541_v30 = vsub.f32 %v1536_v27, %v1540_v29 }
 0xa5e   : > { %v1542_v31 = vmul.f32 %v1541_v30, %v1541_v30 }
 0xa60   : > { %v1543_v32 = vsel %vm1309_vm7, %v1542_v31, 0.0 }
 0xa61   : > { %1544 = vadd.xlane.f32.xlu1 %v1543_v32 }
 0xaee   : > { %v1545_v33 = vpop.xlane.xlu1 %1544 }
 0xaef   : > { %v1546_v34 = vmul.f32 0.03125, %v1545_v33 }
 0xaf1   : > { %v1547_v35 = vadd.f32 1e-05, %v1546_v34 }
 0xaf3   : > { %2383 = vrsqrt.f32 %v1547_v35 }
 0xafd   : > { %v2384_v36 = vpop.eup %2383 }
 0xafe   : > { %v1549_v38 = vmul.f32 %v2384_v36, %v1541_v30 }
 0xb00   : > { %v1557_v40 = vmul.f32 %v1984_v37, %v1549_v38 }
 0xb02   : > { %v1565_v41 = vadd.f32 %v1985_v39, %v1557_v40 }
 0xb04   : > { %v1566_v42 = vsel %vm1309_vm7, %v1565_v41, 0.0 }
 0xb05   : > { %1567 = vadd.xlane.f32.xlu0 %v1566_v42 }
 0xb92   : > { %v1568_v43 = vpop.xlane.xlu0 %1567 }
 0xb93   : > { %v1569_v44 = vmul.f32 0.03125, %v1568_v43 }
 0xb95   : > { %v1570_v45 = vsub.f32 %v1565_v41, %v1569_v44 }
 0xb97   : > { %v1571_v46 = vmul.f32 %v1570_v45, %v1570_v45 }
 0xb99   : > { %v1572_v47 = vsel %vm1309_vm7, %v1571_v46, 0.0 }
 0xb9a   : > { %1573 = vadd.xlane.f32.xlu1 %v1572_v47 }
 0xb9b   : > { %2826 = shalt.err (!%p2823_p4)
}
 0xb9c   : > { %s2827_s21 = scalar_lea.hbm %s3784_s19, 256  ;;  %s2831_s27 = scalar_lea.hbm %s4006_s2, 1024 }
 0xb9d   : > { %p2828_p10 = scmp.ne.s32.totalorder %s3784_s19, %s2827_s21  ;;  %p2832_p3 = scmp.lt.u32.totalorder %s3784_s19, %s4006_s2 }
 0xb9e   : > { %p2833_p11 = scmp.lt.u32.totalorder %s2831_s27, %s2827_s21  ;;  %p2835_p0 = scmp.lt.u32.totalorder %s2827_s21, %s3784_s19 }
 0xb9f   : > { %p2829_p6 = pnand %p2828_p10, %p4007_p5 }
 0xba0   : > { %p2834_p8 = por %p2833_p11, %p2832_p3 }
 0xba1   : > { %p2830_p9 = pneg %p2829_p6 }
 0xba2   : > { %p2836_p13 = por %p2835_p0, %p2834_p8 }
 0xba4   : > { %p2837_p7 = pnand %p2836_p13, %p2830_p9 }
 0xba6   : > { %2840 = shalt.err (!%p2837_p7)
}
 0xba7   : > { %s3031_s7 = smov 64   ;;  %s3032_s28 = smov 128   ;;  %v1986_v52 = vld [vmem:[#allocation24] ss:$0 sm:$0xff]  ;;  %v1987_v54 = vld [vmem:[#allocation26] ss:$0 sm:$0xff] }
 0xba8   : > { %s3033_s12 = smov 4   ;;  %s1990_s5 = sshll.u32 %s4003_s8, 1 }
 0xba9   : > { %2155 = dma.vmem_to_hbm [thread:$0]  (%p4007_p5), %s3779_s24, 256, %s3784_s19, %s1602_s11, %s3031_s7, %s3032_s28, %s3033_s12  }
 0xbaa   : > { %s1613_s21 = sadd.s32 %s4004_s1, %s1990_s5  ;;  %s794_s17 = scalar_lea.vmem [#allocation27], %s1940_s9 }
 0xbab   : > { %s1991_s16 = sshll.u32 %s1613_s21, 7  ;;  %s1617_s27 = sshll.u32 %s794_s17, 4  ;;  %s3819_s27 = int_to_ptr.vmem [resolvable:$true] %s1617_s27 }
 0xbac   : > { %s4008_s19 = sld [smem:[#allocation62_spill]]  ;;  %s1597_s8 = scalar_lea.sflag [#allocation5], %s3637_s6 }
 0xbad   : > { %s2841_s1 = scalar_lea.vmem %s3819_s27, 128  ;;  %s3034_s9 = smov [#allocation27]  }
 0xbae   : > { %p2842_p1 = scmp.ne.s32.totalorder %s3819_s27, %s2841_s1  ;;  %s2845_s29 = sshll.u32 %s3034_s9, 4  ;;  %s2846_s29 = int_to_ptr.vmem [resolvable:$false] %s2845_s29 }
 0xbaf   : > { %s2847_s7 = scalar_lea.vmem %s2846_s29, 256  ;;  %p2848_p4 = scmp.lt.s32.totalorder %s3819_s27, %s2846_s29 }
 0xbb0   : > { %p2843_p2 = pnand %p2842_p1, %p4007_p5  ;;  %p2849_p10 = scmp.lt.s32.totalorder %s2847_s7, %s2841_s1 }
 0xbb2   : > { %s3817_s11 = scalar_lea.hbm %s4008_s19, %s1991_s16  ;;  %p2844_p12 = pneg %p2843_p2 }
 0xbb3   : > { %p2850_p6 = por %p2849_p10, %p2848_p4 }
 0xbb5   : > { %p2851_p9 = pnand %p2850_p6, %p2844_p12 }
 0xc27   : > { %v1574_v48 = vpop.xlane.xlu1 %1573 }
 0xc28   : > { %v1575_v49 = vmul.f32 0.03125, %v1574_v48 }
 0xc2a   : > { %v1576_v50 = vadd.f32 1e-05, %v1575_v49 }
 0xc2c   : > { %2385 = vrsqrt.f32 %v1576_v50 }
 0xc36   : > { %v2386_v51 = vpop.eup %2385 }
 0xc37   : > { %v1578_v53 = vmul.f32 %v2386_v51, %v1570_v45 }
 0xc39   : > { %v1586_v55 = vmul.f32 %v1986_v52, %v1578_v53 }
 0xc3b   : > { %v1594_v56 = vadd.f32 %v1987_v54, %v1586_v55 }
 0xc3d   : > { %1595 = vst.msk [vmem:[%s794_s17] sm:$0xff] %vm1309_vm7, %v1594_v56 }
 0xc3e   : > { %2854 = shalt.err (!%p2851_p9)
}
 0xc3f   : > { %s2855_s6 = scalar_lea.hbm %s3817_s11, 128  ;;  %s2859_s5 = scalar_lea.hbm %s4008_s19, 512 }
 0xc40   : > { %p2856_p3 = scmp.ne.s32.totalorder %s3817_s11, %s2855_s6  ;;  %p2860_p0 = scmp.lt.u32.totalorder %s3817_s11, %s4008_s19 }
 0xc41   : > { %p2861_p13 = scmp.lt.u32.totalorder %s2859_s5, %s2855_s6  ;;  %p2863_p1 = scmp.lt.u32.totalorder %s2855_s6, %s3817_s11 }
 0xc42   : > { %p2857_p11 = pnand %p2856_p3, %p4007_p5 }
 0xc43   : > { %p2862_p7 = por %p2861_p13, %p2860_p0 }
 0xc44   : > { %p2858_p8 = pneg %p2857_p11 }
 0xc45   : > { %p2864_p2 = por %p2863_p1, %p2862_p7 }
 0xc47   : > { %p2865_p12 = pnand %p2864_p2, %p2858_p8 }
 0xc49   : > { %2868 = shalt.err (!%p2865_p12)
}
 0xc4a   : > { %2154 = dma.vmem_to_hbm [thread:$0]  (%p4007_p5), %s3819_s27, 128, %s3817_s11, %s1597_s8  }
 0xc4b PF: > { %s4009_s17 = sld [smem:[#allocation41_spill]]  ;;  %p2237_p4 = scmp.ge.s32.totalorder %s2999_s0, 2 }
 0xc4c   : > { %p4010_p10 = scmp.ne.s32.totalorder %s3979_s3, 0 }
 0xc4e   : > { %p2206_p6 = pnand %p2237_p4, %p4010_p10 }
 0xc51   : > { %s1646_s10 = sand.u32 1, %s4009_s17  }
 0xc52   : > { %s1647_s24 = scalar_lea.sflag [#allocation5], %s1646_s10 }
 0xc53   : > { %2950 = dma.done.wait (!%p2206_p6), %s1647_s24, 128  }
 0xc54   : > { %2952 = vsyncadd (!%p2206_p6), %s1647_s24, 4294967168  ;;  %s1656_s1 = scalar_lea.sflag [#allocation29], %s1646_s10 }
 0xc55   : > { %2954 = dma.done.wait (!%p2206_p6), %s1656_s1, 256  }
 0xc56   : > { %2956 = vsyncadd (!%p2206_p6), %s1656_s1, 4294967040  ;;  %s45_s0 = sadd.s32 1, %s2999_s0   ;;  %s4011_s24 = sld [smem:[#allocation42_spill]] }
 0xc57   : > { %p42_p9 = scmp.ge.s32.totalorder %s45_s0, 6   ;;  %s4012_s14 = sld [smem:[#allocation43_spill]] }
 0xc58   : > { %s4013_s27 = sld [smem:[#allocation46_spill]]  ;;  %s4014_s11 = smov %s4024_s26 }
 0xc59   : > { %s4015_s21 = smov %s2963_s22  ;;  %s4016_s22 = smov %s2967_s23 }
 0xc5a   : > { %s4017_s23 = smov %s3551_s25  ;;  %s4019_s26 = smov %s4030_s4 }
 0xc5b   : > { %s4020_s28 = smov %s2995_s30  ;;  %s4021_s29 = smov %s4014_s11 }
 0xc5c   : > { %s4022_s30 = smov %s4028_s15  ;;  %44 = sbr.rel (!%p42_p9) target bundleno = 36 (0x24), region = 217 }
 0xc5d   : > { %s4018_s25 = smov %s4012_s14 }
 0xc63   :  { %1661 = vsyncpa [#allocation4], 1 }
 0xc64   :  { %1663 = vsyncpa [#allocation4 + $0x1], 1 }
 0xc65   :  { %1664 = vsyncpa [#allocation7], 1 }
 0xc66   :  { %1666 = vsyncpa [#allocation7 + $0x1], 1 }
 0xc67   :  { %1667 = vsyncpa [#allocation10], 1 }
 0xc68   :  { %1668 = vsyncpa [#allocation13], 1 }
 0xc69   :  { %1669 = vsyncpa [#allocation16], 1 }
 0xc6a   :  { %1670 = vsyncpa [#allocation19], 1 }
 0xc6b   :  { %1671 = vsyncpa [#allocation22], 1 }
 0xc6c   :  { %1672 = vsyncpa [#allocation25], 1 }
 0xc6d   :  { %1673 = vsyncpa [#allocation5], 1 }
 0xc6e   :  { %1675 = vsyncpa [#allocation5 + $0x1], 1 }
 0xc6f   :  { %1676 = vsyncpa [#allocation29], 1 }
 0xc70   :  { %1678 = vsyncpa [#allocation29 + $0x1], 1 }

</bundles_post_ra>
